<compile_context>
chip_gen: v5e
topology: v5e:2x2
jax: 0.10.0
libtpu: 0.0.40
codegen_flags: <defaults>
</compile_context>

<pallas_src>
import jax
import jax.numpy as jnp
from jax.experimental import pallas as pl
from jax.experimental.pallas import tpu as pltpu

PROP_NAMES = ["Tg", "FFV", "Tc", "Density", "Rg"]
_LN_EPS = 1e-5


def _round_up(x, m):
    return ((x + m - 1) // m) * m


def _pad_hidden(h):
    # MXU-friendly FFN hidden width: prefer multiples of 256 (v6e/v7x 256-wide
    # MXU) when the extra zero-padding is small, else multiples of 128 (v5e
    # native); leave tiny widths alone (full-extent blocks are still legal).
    if h < 128:
        return h
    h128 = _round_up(h, 128)
    h256 = _round_up(h, 256)
    return h256 if (h256 - h) * 8 <= h else h128


def _layernorm(y, g, b, eps=_LN_EPS):
    # Two-pass statistics (mean, then centered variance): matches PyTorch's
    # numerically safer formulation; the extra cross-lane reduction is cheap
    # next to the matmuls.
    mu = jnp.mean(y, axis=-1, keepdims=True)
    d = y - mu
    var = jnp.mean(d * d, axis=-1, keepdims=True)
    return d * jax.lax.rsqrt(var + eps) * g + b


def _layer_step(h, w_attn, b_attn, ln1g, ln1b, w1, b1, w2, b2, ln2g, ln2b):
    bf16, f32 = jnp.bfloat16, jnp.float32
    # seq_len == 1 => softmax over one key == 1 exactly, so attention reduces
    # to out_proj(v_proj(h)); W_attn = W_v @ W_o is pre-composed in the wrapper.
    attn = jnp.dot(h.astype(bf16), w_attn, preferred_element_type=f32) + b_attn
    h = _layernorm(h + attn, ln1g, ln1b)
    f = jnp.dot(h.astype(bf16), w1, preferred_element_type=f32) + b1
    f = jnp.maximum(f, 0.0)
    f = jnp.dot(f.astype(bf16), w2, preferred_element_type=f32) + b2
    return _layernorm(h + f, ln2g, ln2b)


def _resident_kernel(x_ref, w_in_ref, b_in_ref, wa_ref, ba_ref,
                     ln1g_ref, ln1b_ref, w1_ref, b1_ref, w2_ref, b2_ref,
                     ln2g_ref, ln2b_ref, wh_ref, bh_ref, out_ref):
    """All weights VMEM-resident (constant index_maps, single-buffered)."""
    f32, bf16 = jnp.float32, jnp.bfloat16
    h = (jnp.dot(x_ref[...], w_in_ref[...], preferred_element_type=f32)
         + b_in_ref[...])
    num_layers = wa_ref.shape[0]

    def step(l, h):
        return _layer_step(h, wa_ref[l], ba_ref[l], ln1g_ref[l], ln1b_ref[l],
                           w1_ref[l], b1_ref[l], w2_ref[l], b2_ref[l],
                           ln2g_ref[l], ln2b_ref[l])

    if num_layers < 6:
        # Shallow stacks: static unroll gives the LLO scheduler full visibility.
        for l in range(num_layers):
            h = step(l, h)
    else:
        # Deep stacks: fori_loop bounds live ranges / code size (avoids vreg
        # spills from an 8+-layer static unroll).
        h = jax.lax.fori_loop(0, num_layers, step, h)

    # Fused heads: one lane-dense matmul + one full (TM, Wp) unmasked store.
    out_ref[...] = (jnp.dot(h.astype(bf16), wh_ref[...],
                            preferred_element_type=f32) + bh_ref[...])


def _streaming_kernel(x_ref, w_in_ref, b_in_ref, wa_ref, ba_ref,
                      ln1g_ref, ln1b_ref, w1_ref, b1_ref, w2_ref, b2_ref,
                      ln2g_ref, ln2b_ref, wh_ref, bh_ref, out_ref, h_ref):
    """Layer-streaming path: grid = (batch_tiles, num_layers); per-layer
    weights are DMA'd (double-buffered) one layer at a time; the hidden state
    is carried in a (TM, E) f32 VMEM scratch across the 'arbitrary' layer axis."""
    f32, bf16 = jnp.float32, jnp.bfloat16
    l = pl.program_id(1)

    @pl.when(l == 0)
    def _():
        h_ref[...] = (jnp.dot(x_ref[...], w_in_ref[...],
                              preferred_element_type=f32) + b_in_ref[...])

    h_ref[...] = _layer_step(h_ref[...], wa_ref[0], ba_ref[0],
                             ln1g_ref[0], ln1b_ref[0],
                             w1_ref[0], b1_ref[0], w2_ref[0], b2_ref[0],
                             ln2g_ref[0], ln2b_ref[0])

    @pl.when(l == pl.num_programs(1) - 1)
    def _():
        out_ref[...] = (jnp.dot(h_ref[...].astype(bf16), wh_ref[...],
                                preferred_element_type=f32) + bh_ref[...])


def polymer_transformer_forward(x, params):
    B, D = x.shape
    E = params["w_in"].shape[1]
    L = params["w_v"].shape[0]
    H = params["w_ff1"].shape[2]
    P = params["w_heads"].shape[1]
    bf16, f32 = jnp.bfloat16, jnp.float32

    # ---- constant folding / pre-composition (exact up to bf16 rounding) ----
    b_in = (params["b_in"] + params["pos"]).astype(f32)   # fold pos encoding
    w_in = params["w_in"].astype(bf16)

    # seq_len == 1: attention == out_proj(v_proj(h)); compose the projections.
    w_attn = jnp.einsum("lij,ljk->lik", params["w_v"], params["w_o"]).astype(bf16)
    b_attn = (jnp.einsum("lij,ljk->lik", params["b_v"], params["w_o"])
              + params["b_o"]).astype(f32)

    # Zero-pad the FFN hidden dim to an MXU-friendly width (numerically exact).
    Hp = _pad_hidden(H)
    w1 = jnp.pad(params["w_ff1"], ((0, 0), (0, 0), (0, Hp - H))).astype(bf16)
    b1 = jnp.pad(params["b_ff1"], ((0, 0), (0, 0), (0, Hp - H))).astype(f32)
    w2 = jnp.pad(params["w_ff2"], ((0, 0), (0, Hp - H), (0, 0))).astype(bf16)
    b2 = params["b_ff2"].astype(f32)

    ln1g = params["ln1_g"].astype(f32)
    ln1b = params["ln1_b"].astype(f32)
    ln2g = params["ln2_g"].astype(f32)
    ln2b = params["ln2_b"].astype(f32)

    # Fuse the 5 property heads + reconstruction head; pad to lane-dense width.
    W = P + D
    Wp = max(128, _round_up(W, 128))
    w_head = jnp.concatenate([params["w_heads"], params["w_rec"]], axis=1)
    w_head = jnp.pad(w_head, ((0, 0), (0, Wp - W))).astype(bf16)
    b_head = jnp.concatenate([params["b_heads"], params["b_rec"]], axis=1)
    b_head = jnp.pad(b_head, ((0, 0), (0, Wp - W))).astype(f32)

    # ---- generation-aware VMEM budget ----
    try:
        info = pltpu.get_tpu_info()
        vmem_cap = int(getattr(info, "vmem_capacity_bytes", 0)) or 64 * (1 << 20)
    except Exception:
        vmem_cap = 64 * (1 << 20)          # conservative default (v7x per-core)
    vmem_budget = int(vmem_cap * 0.85)     # headroom for compiler scratch/spill

    # ---- batch tiling: >= 2 tiles (v7x megacore), minimal padding waste ----
    max_tm = 512 if vmem_cap >= (96 << 20) else 256
    num_tiles = max(2, -(-B // max_tm))
    TM = max(8, _round_up(-(-B // num_tiles), 8))
    Bp = TM * num_tiles
    x_pad = jnp.pad(x, ((0, Bp - B), (0, 0))).astype(bf16)   # stream x in bf16

    args = (x_pad, w_in, b_in, w_attn, b_attn, ln1g, ln1b,
            w1, b1, w2, b2, ln2g, ln2b, w_head, b_head)

    # ---- resident-vs-streaming decision (single-buffered weight footprint) ----
    weight_bytes = sum(int(a.size) * a.dtype.itemsize for a in args[1:])
    per_layer_bytes = sum(int(a.size) * a.dtype.itemsize
                          for a in (w_attn, b_attn, ln1g, ln1b,
                                    w1, b1, w2, b2, ln2g, ln2b)) // L
    head_bytes = sum(int(a.size) * a.dtype.itemsize
                     for a in (w_in, b_in, w_head, b_head))
    tile_bytes = 2 * (TM * D * 2 + TM * Wp * 4)     # double-buffered x / out tiles
    act_bytes = TM * (2 * E + Hp + Wp) * 4          # in-kernel f32 temporaries (rough)
    margin = 4 << 20
    resident_need = weight_bytes + tile_bytes + act_bytes + margin
    streaming_need = (head_bytes + 2 * per_layer_bytes + tile_bytes
                      + TM * E * 4 + act_bytes + margin)
    use_streaming = resident_need > vmem_budget
    need = streaming_need if use_streaming else resident_need
    vmem_limit = int(min(vmem_budget, max(2 * need, 32 << 20)))

    flops = 2 * Bp * (D * E + L * (E * E + 2 * E * Hp) + E * Wp)
    cost = pl.CostEstimate(
        flops=int(flops),
        transcendentals=int(2 * L * Bp),          # rsqrt per LayerNorm row
        bytes_accessed=int(x_pad.size * 2 + weight_bytes + Bp * Wp * 4),
    )

    def _call(single_buffer):
        def const_spec(a):
            # Whole array VMEM-resident; constant block index across all steps.
            n = a.ndim
            imap = ((lambda i, l, n=n: (0,) * n) if use_streaming
                    else (lambda i, n=n: (0,) * n))
            if single_buffer:
                return pl.BlockSpec(a.shape, imap, pipeline_mode=pl.Buffered(1))
            return pl.BlockSpec(a.shape, imap)

        if use_streaming:
            def layer_spec(a):
                # One layer slice per step; default double buffering overlaps
                # layer l+1's weight DMA with layer l's compute.
                nz = a.ndim - 1
                return pl.BlockSpec((1,) + a.shape[1:],
                                    lambda i, l, nz=nz: (l,) + (0,) * nz)
            in_specs = [pl.BlockSpec((TM, D), lambda i, l: (i, 0)),
                        const_spec(w_in), const_spec(b_in),
                        layer_spec(w_attn), layer_spec(b_attn),
                        layer_spec(ln1g), layer_spec(ln1b),
                        layer_spec(w1), layer_spec(b1),
                        layer_spec(w2), layer_spec(b2),
                        layer_spec(ln2g), layer_spec(ln2b),
                        const_spec(w_head), const_spec(b_head)]
            out_specs = pl.BlockSpec((TM, Wp), lambda i, l: (i, 0))
            grid = (num_tiles, L)
            scratch = [pltpu.VMEM((TM, E), jnp.float32)]
            dims = ("parallel", "arbitrary")
            kernel = _streaming_kernel
        else:
            in_specs = [pl.BlockSpec((TM, D), lambda i: (i, 0))]
            in_specs += [const_spec(a) for a in args[1:]]
            out_specs = pl.BlockSpec((TM, Wp), lambda i: (i, 0))
            grid = (num_tiles,)
            scratch = []
            dims = ("parallel",)
            kernel = _resident_kernel

        return pl.pallas_call(
            kernel,
            out_shape=jax.ShapeDtypeStruct((Bp, Wp), f32),
            grid=grid,
            in_specs=in_specs,
            out_specs=out_specs,
            scratch_shapes=scratch,
            compiler_params=pltpu.CompilerParams(
                dimension_semantics=dims,
                vmem_limit_bytes=vmem_limit,
            ),
            cost_estimate=cost,
        )(*args)

    try:
        out = _call(True)
    except Exception:
        # Fallback for jax versions without BlockSpec(pipeline_mode=Buffered(1)):
        # default double-buffered resident weights (correctness unchanged).
        out = _call(False)

    props = out[:B, :P]
    recon = out[:B, P:P + D]
    property_outputs = {name: props[:, i:i + 1] for i, name in enumerate(PROP_NAMES)}
    return property_outputs, recon


def init_params(key, input_dim, embedding_dim, num_layers, hidden_dim, num_properties):
    E, H, L = embedding_dim, hidden_dim, num_layers
    ks = jax.random.split(key, 16)

    def lin(k, fan_in, shape):
        return (jax.random.uniform(k, shape, jnp.float32, -1.0, 1.0)
                / jnp.sqrt(jnp.float32(fan_in)))

    return {
        "w_in": lin(ks[0], input_dim, (input_dim, E)),
        "b_in": lin(ks[1], input_dim, (1, E)),
        "pos": jax.random.normal(ks[2], (1, E), jnp.float32),
        # attention (only the V slice of in_proj matters for seq_len == 1)
        "w_v": lin(ks[3], E, (L, E, E)),
        "b_v": lin(ks[4], E, (L, 1, E)),
        "w_o": lin(ks[5], E, (L, E, E)),
        "b_o": lin(ks[6], E, (L, 1, E)),
        "ln1_g": jnp.ones((L, 1, E), jnp.float32),
        "ln1_b": jnp.zeros((L, 1, E), jnp.float32),
        # feed-forward
        "w_ff1": lin(ks[7], E, (L, E, H)),
        "b_ff1": lin(ks[8], E, (L, 1, H)),
        "w_ff2": lin(ks[9], H, (L, H, E)),
        "b_ff2": lin(ks[10], H, (L, 1, E)),
        "ln2_g": jnp.ones((L, 1, E), jnp.float32),
        "ln2_b": jnp.zeros((L, 1, E), jnp.float32),
        # heads
        "w_heads": lin(ks[11], E, (E, num_properties)),
        "b_heads": lin(ks[12], E, (1, num_properties)),
        "w_rec": lin(ks[13], E, (E, input_dim)),
        "b_rec": lin(ks[14], E, (1, input_dim)),
    }


def reference_forward_bf16(x, params):
    """Mirrors the kernel math exactly (composed W_v@W_o, bf16 matmul operands,
    f32 accumulation / LayerNorm) for a tight implementation check."""
    bf16, f32 = jnp.bfloat16, jnp.float32

    def mm(a, w):
        return jnp.dot(a.astype(bf16), w.astype(bf16), preferred_element_type=f32)

    w_attn = jnp.einsum("lij,ljk->lik", params["w_v"], params["w_o"])
    b_attn = jnp.einsum("lij,ljk->lik", params["b_v"], params["w_o"]) + params["b_o"]
    h = mm(x, params["w_in"]) + (params["b_in"] + params["pos"])
    for l in range(params["w_v"].shape[0]):
        attn = mm(h, w_attn[l]) + b_attn[l]
        h = _layernorm(h + attn, params["ln1_g"][l], params["ln1_b"][l])
        f = jnp.maximum(mm(h, params["w_ff1"][l]) + params["b_ff1"][l], 0.0)
        f = mm(f, params["w_ff2"][l]) + params["b_ff2"][l]
        h = _layernorm(h + f, params["ln2_g"][l], params["ln2_b"][l])
    props = mm(h, params["w_heads"]) + params["b_heads"]
    recon = mm(h, params["w_rec"]) + params["b_rec"]
    return {n: props[:, i:i + 1] for i, n in enumerate(PROP_NAMES)}, recon


def reference_forward_f32(x, params):
    """Full-f32, uncomposed (PyTorch eval-mode style) math: guards against the
    mirrored reference hiding a gross numerical issue in the kernel."""
    h = x @ params["w_in"] + (params["b_in"] + params["pos"])
    for l in range(params["w_v"].shape[0]):
        v = h @ params["w_v"][l] + params["b_v"][l]
        attn = v @ params["w_o"][l] + params["b_o"][l]
        h = _layernorm(h + attn, params["ln1_g"][l], params["ln1_b"][l])
        f = jnp.maximum(h @ params["w_ff1"][l] + params["b_ff1"][l], 0.0)
        f = f @ params["w_ff2"][l] + params["b_ff2"][l]
        h = _layernorm(h + f, params["ln2_g"][l], params["ln2_b"][l])
    props = h @ params["w_heads"] + params["b_heads"]
    recon = h @ params["w_rec"] + params["b_rec"]
    return {n: props[:, i:i + 1] for i, n in enumerate(PROP_NAMES)}, recon


if __name__ == "__main__":
    # Small shapes consistent with the module's forward: x is (batch, input_dim).
    batch, input_dim = 2, 16
    embedding_dim, num_layers, hidden_dim, num_properties = 32, 4, 32, 5

    key = jax.random.PRNGKey(0)
    kx, kp = jax.random.split(key)
    x = jax.random.normal(kx, (batch, input_dim), jnp.float32)
    params = init_params(kp, input_dim, embedding_dim, num_layers, hidden_dim,
                         num_properties)

    property_outputs, reconstruction = polymer_transformer_forward(x, params)
    jax.block_until_ready(reconstruction)
    for v in property_outputs.values():
        jax.block_until_ready(v)

    # Tight check: reference mirroring the kernel's bf16/f32 math.
    ref_props, ref_recon = reference_forward_bf16(x, params)
    for name in PROP_NAMES:
        assert jnp.allclose(property_outputs[name], ref_props[name],
                            atol=3e-3, rtol=3e-3), name
    assert jnp.allclose(reconstruction, ref_recon, atol=3e-3, rtol=3e-3)

    # Sanity check: full-f32 uncomposed (PyTorch-style) math, loose tolerance
    # (bf16 MXU operands accumulate small rounding error across layers).
    f32_props, f32_recon = reference_forward_f32(x, params)
    for name in PROP_NAMES:
        assert jnp.allclose(property_outputs[name], f32_props[name],
                            atol=1e-1, rtol=1e-1), name
    assert jnp.allclose(reconstruction, f32_recon, atol=1e-1, rtol=1e-1)

    print("KERNEL_OK")
</pallas_src>

<mosaic_0001>
module attributes {stable_mosaic.version = 11 : i64} {
  func.func @_resident_kernel(%arg0: i32, %arg1: memref<8x16xbf16, #tpu.memory_space<vmem>>, %arg2: memref<16x32xbf16, #tpu.memory_space<vmem>>, %arg3: memref<1x32xf32, #tpu.memory_space<vmem>>, %arg4: memref<4x32x32xbf16, #tpu.memory_space<vmem>>, %arg5: memref<4x1x32xf32, #tpu.memory_space<vmem>>, %arg6: memref<4x1x32xf32, #tpu.memory_space<vmem>>, %arg7: memref<4x1x32xf32, #tpu.memory_space<vmem>>, %arg8: memref<4x32x32xbf16, #tpu.memory_space<vmem>>, %arg9: memref<4x1x32xf32, #tpu.memory_space<vmem>>, %arg10: memref<4x32x32xbf16, #tpu.memory_space<vmem>>, %arg11: memref<4x1x32xf32, #tpu.memory_space<vmem>>, %arg12: memref<4x1x32xf32, #tpu.memory_space<vmem>>, %arg13: memref<4x1x32xf32, #tpu.memory_space<vmem>>, %arg14: memref<32x128xbf16, #tpu.memory_space<vmem>>, %arg15: memref<1x128xf32, #tpu.memory_space<vmem>>, %arg16: memref<8x128xf32, #tpu.memory_space<vmem>>) attributes {dimension_semantics = [#tpu.dimension_semantics<parallel>], iteration_bounds = array<i64: 2>, scalar_prefetch = 0 : i64, scratch_operands = 0 : i64, tpu.core_type = #tpu.core_type<tc>, window_params = [{transform_indices = @transform_0, window_bounds = array<i64: 8, 16>}, {pipeline_mode = #tpu.pipeline_mode<synchronous>, transform_indices = @transform_1, window_bounds = array<i64: 16, 32>}, {pipeline_mode = #tpu.pipeline_mode<synchronous>, transform_indices = @transform_2, window_bounds = array<i64: 1, 32>}, {pipeline_mode = #tpu.pipeline_mode<synchronous>, transform_indices = @transform_3, window_bounds = array<i64: 4, 32, 32>}, {pipeline_mode = #tpu.pipeline_mode<synchronous>, transform_indices = @transform_4, window_bounds = array<i64: 4, 1, 32>}, {pipeline_mode = #tpu.pipeline_mode<synchronous>, transform_indices = @transform_5, window_bounds = array<i64: 4, 1, 32>}, {pipeline_mode = #tpu.pipeline_mode<synchronous>, transform_indices = @transform_6, window_bounds = array<i64: 4, 1, 32>}, {pipeline_mode = #tpu.pipeline_mode<synchronous>, transform_indices = @transform_7, window_bounds = array<i64: 4, 32, 32>}, {pipeline_mode = #tpu.pipeline_mode<synchronous>, transform_indices = @transform_8, window_bounds = array<i64: 4, 1, 32>}, {pipeline_mode = #tpu.pipeline_mode<synchronous>, transform_indices = @transform_9, window_bounds = array<i64: 4, 32, 32>}, {pipeline_mode = #tpu.pipeline_mode<synchronous>, transform_indices = @transform_10, window_bounds = array<i64: 4, 1, 32>}, {pipeline_mode = #tpu.pipeline_mode<synchronous>, transform_indices = @transform_11, window_bounds = array<i64: 4, 1, 32>}, {pipeline_mode = #tpu.pipeline_mode<synchronous>, transform_indices = @transform_12, window_bounds = array<i64: 4, 1, 32>}, {pipeline_mode = #tpu.pipeline_mode<synchronous>, transform_indices = @transform_13, window_bounds = array<i64: 32, 128>}, {pipeline_mode = #tpu.pipeline_mode<synchronous>, transform_indices = @transform_14, window_bounds = array<i64: 1, 128>}, {transform_indices = @transform_15, window_bounds = array<i64: 8, 128>}]} {
    %c0 = arith.constant 0 : index
    %c0_0 = arith.constant 0 : index
    %0 = vector.load %arg1[%c0, %c0_0] : memref<8x16xbf16, #tpu.memory_space<vmem>>, vector<8x16xbf16>
    %c0_1 = arith.constant 0 : index
    %c0_2 = arith.constant 0 : index
    %1 = vector.load %arg2[%c0_1, %c0_2] : memref<16x32xbf16, #tpu.memory_space<vmem>>, vector<16x32xbf16>
    %cst = arith.constant dense<0.000000e+00> : vector<8x32xf32>
    %2 = tpu.matmul %0, %1, %cst {dimension_numbers = #tpu.dot_dimension_numbers<[1], [0], [0], [1], [0, 0, 1, 1], [], []>} : vector<8x16xbf16>, vector<16x32xbf16>, vector<8x32xf32> -> vector<8x32xf32>
    %c0_3 = arith.constant 0 : index
    %c0_4 = arith.constant 0 : index
    %3 = vector.load %arg3[%c0_3, %c0_4] : memref<1x32xf32, #tpu.memory_space<vmem>>, vector<1x32xf32>
    %4 = vector.broadcast %3 : vector<1x32xf32> to vector<8x32xf32>
    %5 = arith.addf %2, %4 : vector<8x32xf32>
    %c0_5 = arith.constant 0 : index
    %c0_6 = arith.constant 0 : index
    %c0_7 = arith.constant 0 : index
    %6 = vector.load %arg4[%c0_5, %c0_6, %c0_7] : memref<4x32x32xbf16, #tpu.memory_space<vmem>>, vector<1x32x32xbf16>
    %7 = vector.shape_cast %6 : vector<1x32x32xbf16> to vector<32x32xbf16>
    %c0_8 = arith.constant 0 : index
    %c0_9 = arith.constant 0 : index
    %c0_10 = arith.constant 0 : index
    %8 = vector.load %arg5[%c0_8, %c0_9, %c0_10] : memref<4x1x32xf32, #tpu.memory_space<vmem>>, vector<1x1x32xf32>
    %9 = vector.shape_cast %8 : vector<1x1x32xf32> to vector<1x32xf32>
    %c0_11 = arith.constant 0 : index
    %c0_12 = arith.constant 0 : index
    %c0_13 = arith.constant 0 : index
    %10 = vector.load %arg6[%c0_11, %c0_12, %c0_13] : memref<4x1x32xf32, #tpu.memory_space<vmem>>, vector<1x1x32xf32>
    %11 = vector.shape_cast %10 : vector<1x1x32xf32> to vector<1x32xf32>
    %c0_14 = arith.constant 0 : index
    %c0_15 = arith.constant 0 : index
    %c0_16 = arith.constant 0 : index
    %12 = vector.load %arg7[%c0_14, %c0_15, %c0_16] : memref<4x1x32xf32, #tpu.memory_space<vmem>>, vector<1x1x32xf32>
    %13 = vector.shape_cast %12 : vector<1x1x32xf32> to vector<1x32xf32>
    %c0_17 = arith.constant 0 : index
    %c0_18 = arith.constant 0 : index
    %c0_19 = arith.constant 0 : index
    %14 = vector.load %arg8[%c0_17, %c0_18, %c0_19] : memref<4x32x32xbf16, #tpu.memory_space<vmem>>, vector<1x32x32xbf16>
    %15 = vector.shape_cast %14 : vector<1x32x32xbf16> to vector<32x32xbf16>
    %c0_20 = arith.constant 0 : index
    %c0_21 = arith.constant 0 : index
    %c0_22 = arith.constant 0 : index
    %16 = vector.load %arg9[%c0_20, %c0_21, %c0_22] : memref<4x1x32xf32, #tpu.memory_space<vmem>>, vector<1x1x32xf32>
    %17 = vector.shape_cast %16 : vector<1x1x32xf32> to vector<1x32xf32>
    %c0_23 = arith.constant 0 : index
    %c0_24 = arith.constant 0 : index
    %c0_25 = arith.constant 0 : index
    %18 = vector.load %arg10[%c0_23, %c0_24, %c0_25] : memref<4x32x32xbf16, #tpu.memory_space<vmem>>, vector<1x32x32xbf16>
    %19 = vector.shape_cast %18 : vector<1x32x32xbf16> to vector<32x32xbf16>
    %c0_26 = arith.constant 0 : index
    %c0_27 = arith.constant 0 : index
    %c0_28 = arith.constant 0 : index
    %20 = vector.load %arg11[%c0_26, %c0_27, %c0_28] : memref<4x1x32xf32, #tpu.memory_space<vmem>>, vector<1x1x32xf32>
    %21 = vector.shape_cast %20 : vector<1x1x32xf32> to vector<1x32xf32>
    %c0_29 = arith.constant 0 : index
    %c0_30 = arith.constant 0 : index
    %c0_31 = arith.constant 0 : index
    %22 = vector.load %arg12[%c0_29, %c0_30, %c0_31] : memref<4x1x32xf32, #tpu.memory_space<vmem>>, vector<1x1x32xf32>
    %23 = vector.shape_cast %22 : vector<1x1x32xf32> to vector<1x32xf32>
    %c0_32 = arith.constant 0 : index
    %c0_33 = arith.constant 0 : index
    %c0_34 = arith.constant 0 : index
    %24 = vector.load %arg13[%c0_32, %c0_33, %c0_34] : memref<4x1x32xf32, #tpu.memory_space<vmem>>, vector<1x1x32xf32>
    %25 = vector.shape_cast %24 : vector<1x1x32xf32> to vector<1x32xf32>
    %26 = arith.truncf %5 : vector<8x32xf32> to vector<8x32xbf16>
    %cst_35 = arith.constant dense<0.000000e+00> : vector<8x32xf32>
    %27 = tpu.matmul %26, %7, %cst_35 {dimension_numbers = #tpu.dot_dimension_numbers<[1], [0], [0], [1], [0, 0, 1, 1], [], []>} : vector<8x32xbf16>, vector<32x32xbf16>, vector<8x32xf32> -> vector<8x32xf32>
    %28 = vector.broadcast %9 : vector<1x32xf32> to vector<8x32xf32>
    %29 = arith.addf %27, %28 : vector<8x32xf32>
    %30 = arith.addf %5, %29 : vector<8x32xf32>
    %cst_36 = arith.constant dense<0.000000e+00> : vector<8xf32>
    %31 = vector.multi_reduction <add>, %30, %cst_36 [1] : vector<8x32xf32> to vector<8xf32>
    %32 = vector.shape_cast %31 : vector<8xf32> to vector<8x1xf32>
    %cst_37 = arith.constant 3.200000e+01 : f32
    %33 = vector.broadcast %cst_37 : f32 to vector<8x1xf32>
    %34 = arith.divf %32, %33 : vector<8x1xf32>
    %35 = vector.broadcast %34 : vector<8x1xf32> to vector<8x32xf32>
    %36 = arith.subf %30, %35 : vector<8x32xf32>
    %37 = arith.mulf %36, %36 : vector<8x32xf32>
    %cst_38 = arith.constant dense<0.000000e+00> : vector<8xf32>
    %38 = vector.multi_reduction <add>, %37, %cst_38 [1] : vector<8x32xf32> to vector<8xf32>
    %39 = vector.shape_cast %38 : vector<8xf32> to vector<8x1xf32>
    %cst_39 = arith.constant 3.200000e+01 : f32
    %40 = vector.broadcast %cst_39 : f32 to vector<8x1xf32>
    %41 = arith.divf %39, %40 : vector<8x1xf32>
    %cst_40 = arith.constant 9.99999974E-6 : f32
    %42 = vector.broadcast %cst_40 : f32 to vector<8x1xf32>
    %43 = arith.addf %41, %42 : vector<8x1xf32>
    %44 = math.rsqrt %43 : vector<8x1xf32>
    %45 = vector.broadcast %44 : vector<8x1xf32> to vector<8x32xf32>
    %46 = arith.mulf %36, %45 : vector<8x32xf32>
    %47 = vector.broadcast %11 : vector<1x32xf32> to vector<8x32xf32>
    %48 = arith.mulf %46, %47 : vector<8x32xf32>
    %49 = vector.broadcast %13 : vector<1x32xf32> to vector<8x32xf32>
    %50 = arith.addf %48, %49 : vector<8x32xf32>
    %51 = arith.truncf %50 : vector<8x32xf32> to vector<8x32xbf16>
    %cst_41 = arith.constant dense<0.000000e+00> : vector<8x32xf32>
    %52 = tpu.matmul %51, %15, %cst_41 {dimension_numbers = #tpu.dot_dimension_numbers<[1], [0], [0], [1], [0, 0, 1, 1], [], []>} : vector<8x32xbf16>, vector<32x32xbf16>, vector<8x32xf32> -> vector<8x32xf32>
    %53 = vector.broadcast %17 : vector<1x32xf32> to vector<8x32xf32>
    %54 = arith.addf %52, %53 : vector<8x32xf32>
    %cst_42 = arith.constant 0.000000e+00 : f32
    %55 = vector.broadcast %cst_42 : f32 to vector<8x32xf32>
    %56 = arith.maximumf %54, %55 : vector<8x32xf32>
    %57 = arith.truncf %56 : vector<8x32xf32> to vector<8x32xbf16>
    %cst_43 = arith.constant dense<0.000000e+00> : vector<8x32xf32>
    %58 = tpu.matmul %57, %19, %cst_43 {dimension_numbers = #tpu.dot_dimension_numbers<[1], [0], [0], [1], [0, 0, 1, 1], [], []>} : vector<8x32xbf16>, vector<32x32xbf16>, vector<8x32xf32> -> vector<8x32xf32>
    %59 = vector.broadcast %21 : vector<1x32xf32> to vector<8x32xf32>
    %60 = arith.addf %58, %59 : vector<8x32xf32>
    %61 = arith.addf %50, %60 : vector<8x32xf32>
    %cst_44 = arith.constant dense<0.000000e+00> : vector<8xf32>
    %62 = vector.multi_reduction <add>, %61, %cst_44 [1] : vector<8x32xf32> to vector<8xf32>
    %63 = vector.shape_cast %62 : vector<8xf32> to vector<8x1xf32>
    %cst_45 = arith.constant 3.200000e+01 : f32
    %64 = vector.broadcast %cst_45 : f32 to vector<8x1xf32>
    %65 = arith.divf %63, %64 : vector<8x1xf32>
    %66 = vector.broadcast %65 : vector<8x1xf32> to vector<8x32xf32>
    %67 = arith.subf %61, %66 : vector<8x32xf32>
    %68 = arith.mulf %67, %67 : vector<8x32xf32>
    %cst_46 = arith.constant dense<0.000000e+00> : vector<8xf32>
    %69 = vector.multi_reduction <add>, %68, %cst_46 [1] : vector<8x32xf32> to vector<8xf32>
    %70 = vector.shape_cast %69 : vector<8xf32> to vector<8x1xf32>
    %cst_47 = arith.constant 3.200000e+01 : f32
    %71 = vector.broadcast %cst_47 : f32 to vector<8x1xf32>
    %72 = arith.divf %70, %71 : vector<8x1xf32>
    %cst_48 = arith.constant 9.99999974E-6 : f32
    %73 = vector.broadcast %cst_48 : f32 to vector<8x1xf32>
    %74 = arith.addf %72, %73 : vector<8x1xf32>
    %75 = math.rsqrt %74 : vector<8x1xf32>
    %76 = vector.broadcast %75 : vector<8x1xf32> to vector<8x32xf32>
    %77 = arith.mulf %67, %76 : vector<8x32xf32>
    %78 = vector.broadcast %23 : vector<1x32xf32> to vector<8x32xf32>
    %79 = arith.mulf %77, %78 : vector<8x32xf32>
    %80 = vector.broadcast %25 : vector<1x32xf32> to vector<8x32xf32>
    %81 = arith.addf %79, %80 : vector<8x32xf32>
    %c1 = arith.constant 1 : index
    %c0_49 = arith.constant 0 : index
    %c0_50 = arith.constant 0 : index
    %82 = vector.load %arg4[%c1, %c0_49, %c0_50] : memref<4x32x32xbf16, #tpu.memory_space<vmem>>, vector<1x32x32xbf16>
    %83 = vector.shape_cast %82 : vector<1x32x32xbf16> to vector<32x32xbf16>
    %c1_51 = arith.constant 1 : index
    %c0_52 = arith.constant 0 : index
    %c0_53 = arith.constant 0 : index
    %84 = vector.load %arg5[%c1_51, %c0_52, %c0_53] : memref<4x1x32xf32, #tpu.memory_space<vmem>>, vector<1x1x32xf32>
    %85 = vector.shape_cast %84 : vector<1x1x32xf32> to vector<1x32xf32>
    %c1_54 = arith.constant 1 : index
    %c0_55 = arith.constant 0 : index
    %c0_56 = arith.constant 0 : index
    %86 = vector.load %arg6[%c1_54, %c0_55, %c0_56] : memref<4x1x32xf32, #tpu.memory_space<vmem>>, vector<1x1x32xf32>
    %87 = vector.shape_cast %86 : vector<1x1x32xf32> to vector<1x32xf32>
    %c1_57 = arith.constant 1 : index
    %c0_58 = arith.constant 0 : index
    %c0_59 = arith.constant 0 : index
    %88 = vector.load %arg7[%c1_57, %c0_58, %c0_59] : memref<4x1x32xf32, #tpu.memory_space<vmem>>, vector<1x1x32xf32>
    %89 = vector.shape_cast %88 : vector<1x1x32xf32> to vector<1x32xf32>
    %c1_60 = arith.constant 1 : index
    %c0_61 = arith.constant 0 : index
    %c0_62 = arith.constant 0 : index
    %90 = vector.load %arg8[%c1_60, %c0_61, %c0_62] : memref<4x32x32xbf16, #tpu.memory_space<vmem>>, vector<1x32x32xbf16>
    %91 = vector.shape_cast %90 : vector<1x32x32xbf16> to vector<32x32xbf16>
    %c1_63 = arith.constant 1 : index
    %c0_64 = arith.constant 0 : index
    %c0_65 = arith.constant 0 : index
    %92 = vector.load %arg9[%c1_63, %c0_64, %c0_65] : memref<4x1x32xf32, #tpu.memory_space<vmem>>, vector<1x1x32xf32>
    %93 = vector.shape_cast %92 : vector<1x1x32xf32> to vector<1x32xf32>
    %c1_66 = arith.constant 1 : index
    %c0_67 = arith.constant 0 : index
    %c0_68 = arith.constant 0 : index
    %94 = vector.load %arg10[%c1_66, %c0_67, %c0_68] : memref<4x32x32xbf16, #tpu.memory_space<vmem>>, vector<1x32x32xbf16>
    %95 = vector.shape_cast %94 : vector<1x32x32xbf16> to vector<32x32xbf16>
    %c1_69 = arith.constant 1 : index
    %c0_70 = arith.constant 0 : index
    %c0_71 = arith.constant 0 : index
    %96 = vector.load %arg11[%c1_69, %c0_70, %c0_71] : memref<4x1x32xf32, #tpu.memory_space<vmem>>, vector<1x1x32xf32>
    %97 = vector.shape_cast %96 : vector<1x1x32xf32> to vector<1x32xf32>
    %c1_72 = arith.constant 1 : index
    %c0_73 = arith.constant 0 : index
    %c0_74 = arith.constant 0 : index
    %98 = vector.load %arg12[%c1_72, %c0_73, %c0_74] : memref<4x1x32xf32, #tpu.memory_space<vmem>>, vector<1x1x32xf32>
    %99 = vector.shape_cast %98 : vector<1x1x32xf32> to vector<1x32xf32>
    %c1_75 = arith.constant 1 : index
    %c0_76 = arith.constant 0 : index
    %c0_77 = arith.constant 0 : index
    %100 = vector.load %arg13[%c1_75, %c0_76, %c0_77] : memref<4x1x32xf32, #tpu.memory_space<vmem>>, vector<1x1x32xf32>
    %101 = vector.shape_cast %100 : vector<1x1x32xf32> to vector<1x32xf32>
    %102 = arith.truncf %81 : vector<8x32xf32> to vector<8x32xbf16>
    %cst_78 = arith.constant dense<0.000000e+00> : vector<8x32xf32>
    %103 = tpu.matmul %102, %83, %cst_78 {dimension_numbers = #tpu.dot_dimension_numbers<[1], [0], [0], [1], [0, 0, 1, 1], [], []>} : vector<8x32xbf16>, vector<32x32xbf16>, vector<8x32xf32> -> vector<8x32xf32>
    %104 = vector.broadcast %85 : vector<1x32xf32> to vector<8x32xf32>
    %105 = arith.addf %103, %104 : vector<8x32xf32>
    %106 = arith.addf %81, %105 : vector<8x32xf32>
    %cst_79 = arith.constant dense<0.000000e+00> : vector<8xf32>
    %107 = vector.multi_reduction <add>, %106, %cst_79 [1] : vector<8x32xf32> to vector<8xf32>
    %108 = vector.shape_cast %107 : vector<8xf32> to vector<8x1xf32>
    %cst_80 = arith.constant 3.200000e+01 : f32
    %109 = vector.broadcast %cst_80 : f32 to vector<8x1xf32>
    %110 = arith.divf %108, %109 : vector<8x1xf32>
    %111 = vector.broadcast %110 : vector<8x1xf32> to vector<8x32xf32>
    %112 = arith.subf %106, %111 : vector<8x32xf32>
    %113 = arith.mulf %112, %112 : vector<8x32xf32>
    %cst_81 = arith.constant dense<0.000000e+00> : vector<8xf32>
    %114 = vector.multi_reduction <add>, %113, %cst_81 [1] : vector<8x32xf32> to vector<8xf32>
    %115 = vector.shape_cast %114 : vector<8xf32> to vector<8x1xf32>
    %cst_82 = arith.constant 3.200000e+01 : f32
    %116 = vector.broadcast %cst_82 : f32 to vector<8x1xf32>
    %117 = arith.divf %115, %116 : vector<8x1xf32>
    %cst_83 = arith.constant 9.99999974E-6 : f32
    %118 = vector.broadcast %cst_83 : f32 to vector<8x1xf32>
    %119 = arith.addf %117, %118 : vector<8x1xf32>
    %120 = math.rsqrt %119 : vector<8x1xf32>
    %121 = vector.broadcast %120 : vector<8x1xf32> to vector<8x32xf32>
    %122 = arith.mulf %112, %121 : vector<8x32xf32>
    %123 = vector.broadcast %87 : vector<1x32xf32> to vector<8x32xf32>
    %124 = arith.mulf %122, %123 : vector<8x32xf32>
    %125 = vector.broadcast %89 : vector<1x32xf32> to vector<8x32xf32>
    %126 = arith.addf %124, %125 : vector<8x32xf32>
    %127 = arith.truncf %126 : vector<8x32xf32> to vector<8x32xbf16>
    %cst_84 = arith.constant dense<0.000000e+00> : vector<8x32xf32>
    %128 = tpu.matmul %127, %91, %cst_84 {dimension_numbers = #tpu.dot_dimension_numbers<[1], [0], [0], [1], [0, 0, 1, 1], [], []>} : vector<8x32xbf16>, vector<32x32xbf16>, vector<8x32xf32> -> vector<8x32xf32>
    %129 = vector.broadcast %93 : vector<1x32xf32> to vector<8x32xf32>
    %130 = arith.addf %128, %129 : vector<8x32xf32>
    %cst_85 = arith.constant 0.000000e+00 : f32
    %131 = vector.broadcast %cst_85 : f32 to vector<8x32xf32>
    %132 = arith.maximumf %130, %131 : vector<8x32xf32>
    %133 = arith.truncf %132 : vector<8x32xf32> to vector<8x32xbf16>
    %cst_86 = arith.constant dense<0.000000e+00> : vector<8x32xf32>
    %134 = tpu.matmul %133, %95, %cst_86 {dimension_numbers = #tpu.dot_dimension_numbers<[1], [0], [0], [1], [0, 0, 1, 1], [], []>} : vector<8x32xbf16>, vector<32x32xbf16>, vector<8x32xf32> -> vector<8x32xf32>
    %135 = vector.broadcast %97 : vector<1x32xf32> to vector<8x32xf32>
    %136 = arith.addf %134, %135 : vector<8x32xf32>
    %137 = arith.addf %126, %136 : vector<8x32xf32>
    %cst_87 = arith.constant dense<0.000000e+00> : vector<8xf32>
    %138 = vector.multi_reduction <add>, %137, %cst_87 [1] : vector<8x32xf32> to vector<8xf32>
    %139 = vector.shape_cast %138 : vector<8xf32> to vector<8x1xf32>
    %cst_88 = arith.constant 3.200000e+01 : f32
    %140 = vector.broadcast %cst_88 : f32 to vector<8x1xf32>
    %141 = arith.divf %139, %140 : vector<8x1xf32>
    %142 = vector.broadcast %141 : vector<8x1xf32> to vector<8x32xf32>
    %143 = arith.subf %137, %142 : vector<8x32xf32>
    %144 = arith.mulf %143, %143 : vector<8x32xf32>
    %cst_89 = arith.constant dense<0.000000e+00> : vector<8xf32>
    %145 = vector.multi_reduction <add>, %144, %cst_89 [1] : vector<8x32xf32> to vector<8xf32>
    %146 = vector.shape_cast %145 : vector<8xf32> to vector<8x1xf32>
    %cst_90 = arith.constant 3.200000e+01 : f32
    %147 = vector.broadcast %cst_90 : f32 to vector<8x1xf32>
    %148 = arith.divf %146, %147 : vector<8x1xf32>
    %cst_91 = arith.constant 9.99999974E-6 : f32
    %149 = vector.broadcast %cst_91 : f32 to vector<8x1xf32>
    %150 = arith.addf %148, %149 : vector<8x1xf32>
    %151 = math.rsqrt %150 : vector<8x1xf32>
    %152 = vector.broadcast %151 : vector<8x1xf32> to vector<8x32xf32>
    %153 = arith.mulf %143, %152 : vector<8x32xf32>
    %154 = vector.broadcast %99 : vector<1x32xf32> to vector<8x32xf32>
    %155 = arith.mulf %153, %154 : vector<8x32xf32>
    %156 = vector.broadcast %101 : vector<1x32xf32> to vector<8x32xf32>
    %157 = arith.addf %155, %156 : vector<8x32xf32>
    %c2 = arith.constant 2 : index
    %c0_92 = arith.constant 0 : index
    %c0_93 = arith.constant 0 : index
    %158 = vector.load %arg4[%c2, %c0_92, %c0_93] : memref<4x32x32xbf16, #tpu.memory_space<vmem>>, vector<1x32x32xbf16>
    %159 = vector.shape_cast %158 : vector<1x32x32xbf16> to vector<32x32xbf16>
    %c2_94 = arith.constant 2 : index
    %c0_95 = arith.constant 0 : index
    %c0_96 = arith.constant 0 : index
    %160 = vector.load %arg5[%c2_94, %c0_95, %c0_96] : memref<4x1x32xf32, #tpu.memory_space<vmem>>, vector<1x1x32xf32>
    %161 = vector.shape_cast %160 : vector<1x1x32xf32> to vector<1x32xf32>
    %c2_97 = arith.constant 2 : index
    %c0_98 = arith.constant 0 : index
    %c0_99 = arith.constant 0 : index
    %162 = vector.load %arg6[%c2_97, %c0_98, %c0_99] : memref<4x1x32xf32, #tpu.memory_space<vmem>>, vector<1x1x32xf32>
    %163 = vector.shape_cast %162 : vector<1x1x32xf32> to vector<1x32xf32>
    %c2_100 = arith.constant 2 : index
    %c0_101 = arith.constant 0 : index
    %c0_102 = arith.constant 0 : index
    %164 = vector.load %arg7[%c2_100, %c0_101, %c0_102] : memref<4x1x32xf32, #tpu.memory_space<vmem>>, vector<1x1x32xf32>
    %165 = vector.shape_cast %164 : vector<1x1x32xf32> to vector<1x32xf32>
    %c2_103 = arith.constant 2 : index
    %c0_104 = arith.constant 0 : index
    %c0_105 = arith.constant 0 : index
    %166 = vector.load %arg8[%c2_103, %c0_104, %c0_105] : memref<4x32x32xbf16, #tpu.memory_space<vmem>>, vector<1x32x32xbf16>
    %167 = vector.shape_cast %166 : vector<1x32x32xbf16> to vector<32x32xbf16>
    %c2_106 = arith.constant 2 : index
    %c0_107 = arith.constant 0 : index
    %c0_108 = arith.constant 0 : index
    %168 = vector.load %arg9[%c2_106, %c0_107, %c0_108] : memref<4x1x32xf32, #tpu.memory_space<vmem>>, vector<1x1x32xf32>
    %169 = vector.shape_cast %168 : vector<1x1x32xf32> to vector<1x32xf32>
    %c2_109 = arith.constant 2 : index
    %c0_110 = arith.constant 0 : index
    %c0_111 = arith.constant 0 : index
    %170 = vector.load %arg10[%c2_109, %c0_110, %c0_111] : memref<4x32x32xbf16, #tpu.memory_space<vmem>>, vector<1x32x32xbf16>
    %171 = vector.shape_cast %170 : vector<1x32x32xbf16> to vector<32x32xbf16>
    %c2_112 = arith.constant 2 : index
    %c0_113 = arith.constant 0 : index
    %c0_114 = arith.constant 0 : index
    %172 = vector.load %arg11[%c2_112, %c0_113, %c0_114] : memref<4x1x32xf32, #tpu.memory_space<vmem>>, vector<1x1x32xf32>
    %173 = vector.shape_cast %172 : vector<1x1x32xf32> to vector<1x32xf32>
    %c2_115 = arith.constant 2 : index
    %c0_116 = arith.constant 0 : index
    %c0_117 = arith.constant 0 : index
    %174 = vector.load %arg12[%c2_115, %c0_116, %c0_117] : memref<4x1x32xf32, #tpu.memory_space<vmem>>, vector<1x1x32xf32>
    %175 = vector.shape_cast %174 : vector<1x1x32xf32> to vector<1x32xf32>
    %c2_118 = arith.constant 2 : index
    %c0_119 = arith.constant 0 : index
    %c0_120 = arith.constant 0 : index
    %176 = vector.load %arg13[%c2_118, %c0_119, %c0_120] : memref<4x1x32xf32, #tpu.memory_space<vmem>>, vector<1x1x32xf32>
    %177 = vector.shape_cast %176 : vector<1x1x32xf32> to vector<1x32xf32>
    %178 = arith.truncf %157 : vector<8x32xf32> to vector<8x32xbf16>
    %cst_121 = arith.constant dense<0.000000e+00> : vector<8x32xf32>
    %179 = tpu.matmul %178, %159, %cst_121 {dimension_numbers = #tpu.dot_dimension_numbers<[1], [0], [0], [1], [0, 0, 1, 1], [], []>} : vector<8x32xbf16>, vector<32x32xbf16>, vector<8x32xf32> -> vector<8x32xf32>
    %180 = vector.broadcast %161 : vector<1x32xf32> to vector<8x32xf32>
    %181 = arith.addf %179, %180 : vector<8x32xf32>
    %182 = arith.addf %157, %181 : vector<8x32xf32>
    %cst_122 = arith.constant dense<0.000000e+00> : vector<8xf32>
    %183 = vector.multi_reduction <add>, %182, %cst_122 [1] : vector<8x32xf32> to vector<8xf32>
    %184 = vector.shape_cast %183 : vector<8xf32> to vector<8x1xf32>
    %cst_123 = arith.constant 3.200000e+01 : f32
    %185 = vector.broadcast %cst_123 : f32 to vector<8x1xf32>
    %186 = arith.divf %184, %185 : vector<8x1xf32>
    %187 = vector.broadcast %186 : vector<8x1xf32> to vector<8x32xf32>
    %188 = arith.subf %182, %187 : vector<8x32xf32>
    %189 = arith.mulf %188, %188 : vector<8x32xf32>
    %cst_124 = arith.constant dense<0.000000e+00> : vector<8xf32>
    %190 = vector.multi_reduction <add>, %189, %cst_124 [1] : vector<8x32xf32> to vector<8xf32>
    %191 = vector.shape_cast %190 : vector<8xf32> to vector<8x1xf32>
    %cst_125 = arith.constant 3.200000e+01 : f32
    %192 = vector.broadcast %cst_125 : f32 to vector<8x1xf32>
    %193 = arith.divf %191, %192 : vector<8x1xf32>
    %cst_126 = arith.constant 9.99999974E-6 : f32
    %194 = vector.broadcast %cst_126 : f32 to vector<8x1xf32>
    %195 = arith.addf %193, %194 : vector<8x1xf32>
    %196 = math.rsqrt %195 : vector<8x1xf32>
    %197 = vector.broadcast %196 : vector<8x1xf32> to vector<8x32xf32>
    %198 = arith.mulf %188, %197 : vector<8x32xf32>
    %199 = vector.broadcast %163 : vector<1x32xf32> to vector<8x32xf32>
    %200 = arith.mulf %198, %199 : vector<8x32xf32>
    %201 = vector.broadcast %165 : vector<1x32xf32> to vector<8x32xf32>
    %202 = arith.addf %200, %201 : vector<8x32xf32>
    %203 = arith.truncf %202 : vector<8x32xf32> to vector<8x32xbf16>
    %cst_127 = arith.constant dense<0.000000e+00> : vector<8x32xf32>
    %204 = tpu.matmul %203, %167, %cst_127 {dimension_numbers = #tpu.dot_dimension_numbers<[1], [0], [0], [1], [0, 0, 1, 1], [], []>} : vector<8x32xbf16>, vector<32x32xbf16>, vector<8x32xf32> -> vector<8x32xf32>
    %205 = vector.broadcast %169 : vector<1x32xf32> to vector<8x32xf32>
    %206 = arith.addf %204, %205 : vector<8x32xf32>
    %cst_128 = arith.constant 0.000000e+00 : f32
    %207 = vector.broadcast %cst_128 : f32 to vector<8x32xf32>
    %208 = arith.maximumf %206, %207 : vector<8x32xf32>
    %209 = arith.truncf %208 : vector<8x32xf32> to vector<8x32xbf16>
    %cst_129 = arith.constant dense<0.000000e+00> : vector<8x32xf32>
    %210 = tpu.matmul %209, %171, %cst_129 {dimension_numbers = #tpu.dot_dimension_numbers<[1], [0], [0], [1], [0, 0, 1, 1], [], []>} : vector<8x32xbf16>, vector<32x32xbf16>, vector<8x32xf32> -> vector<8x32xf32>
    %211 = vector.broadcast %173 : vector<1x32xf32> to vector<8x32xf32>
    %212 = arith.addf %210, %211 : vector<8x32xf32>
    %213 = arith.addf %202, %212 : vector<8x32xf32>
    %cst_130 = arith.constant dense<0.000000e+00> : vector<8xf32>
    %214 = vector.multi_reduction <add>, %213, %cst_130 [1] : vector<8x32xf32> to vector<8xf32>
    %215 = vector.shape_cast %214 : vector<8xf32> to vector<8x1xf32>
    %cst_131 = arith.constant 3.200000e+01 : f32
    %216 = vector.broadcast %cst_131 : f32 to vector<8x1xf32>
    %217 = arith.divf %215, %216 : vector<8x1xf32>
    %218 = vector.broadcast %217 : vector<8x1xf32> to vector<8x32xf32>
    %219 = arith.subf %213, %218 : vector<8x32xf32>
    %220 = arith.mulf %219, %219 : vector<8x32xf32>
    %cst_132 = arith.constant dense<0.000000e+00> : vector<8xf32>
    %221 = vector.multi_reduction <add>, %220, %cst_132 [1] : vector<8x32xf32> to vector<8xf32>
    %222 = vector.shape_cast %221 : vector<8xf32> to vector<8x1xf32>
    %cst_133 = arith.constant 3.200000e+01 : f32
    %223 = vector.broadcast %cst_133 : f32 to vector<8x1xf32>
    %224 = arith.divf %222, %223 : vector<8x1xf32>
    %cst_134 = arith.constant 9.99999974E-6 : f32
    %225 = vector.broadcast %cst_134 : f32 to vector<8x1xf32>
    %226 = arith.addf %224, %225 : vector<8x1xf32>
    %227 = math.rsqrt %226 : vector<8x1xf32>
    %228 = vector.broadcast %227 : vector<8x1xf32> to vector<8x32xf32>
    %229 = arith.mulf %219, %228 : vector<8x32xf32>
    %230 = vector.broadcast %175 : vector<1x32xf32> to vector<8x32xf32>
    %231 = arith.mulf %229, %230 : vector<8x32xf32>
    %232 = vector.broadcast %177 : vector<1x32xf32> to vector<8x32xf32>
    %233 = arith.addf %231, %232 : vector<8x32xf32>
    %c3 = arith.constant 3 : index
    %c0_135 = arith.constant 0 : index
    %c0_136 = arith.constant 0 : index
    %234 = vector.load %arg4[%c3, %c0_135, %c0_136] : memref<4x32x32xbf16, #tpu.memory_space<vmem>>, vector<1x32x32xbf16>
    %235 = vector.shape_cast %234 : vector<1x32x32xbf16> to vector<32x32xbf16>
    %c3_137 = arith.constant 3 : index
    %c0_138 = arith.constant 0 : index
    %c0_139 = arith.constant 0 : index
    %236 = vector.load %arg5[%c3_137, %c0_138, %c0_139] : memref<4x1x32xf32, #tpu.memory_space<vmem>>, vector<1x1x32xf32>
    %237 = vector.shape_cast %236 : vector<1x1x32xf32> to vector<1x32xf32>
    %c3_140 = arith.constant 3 : index
    %c0_141 = arith.constant 0 : index
    %c0_142 = arith.constant 0 : index
    %238 = vector.load %arg6[%c3_140, %c0_141, %c0_142] : memref<4x1x32xf32, #tpu.memory_space<vmem>>, vector<1x1x32xf32>
    %239 = vector.shape_cast %238 : vector<1x1x32xf32> to vector<1x32xf32>
    %c3_143 = arith.constant 3 : index
    %c0_144 = arith.constant 0 : index
    %c0_145 = arith.constant 0 : index
    %240 = vector.load %arg7[%c3_143, %c0_144, %c0_145] : memref<4x1x32xf32, #tpu.memory_space<vmem>>, vector<1x1x32xf32>
    %241 = vector.shape_cast %240 : vector<1x1x32xf32> to vector<1x32xf32>
    %c3_146 = arith.constant 3 : index
    %c0_147 = arith.constant 0 : index
    %c0_148 = arith.constant 0 : index
    %242 = vector.load %arg8[%c3_146, %c0_147, %c0_148] : memref<4x32x32xbf16, #tpu.memory_space<vmem>>, vector<1x32x32xbf16>
    %243 = vector.shape_cast %242 : vector<1x32x32xbf16> to vector<32x32xbf16>
    %c3_149 = arith.constant 3 : index
    %c0_150 = arith.constant 0 : index
    %c0_151 = arith.constant 0 : index
    %244 = vector.load %arg9[%c3_149, %c0_150, %c0_151] : memref<4x1x32xf32, #tpu.memory_space<vmem>>, vector<1x1x32xf32>
    %245 = vector.shape_cast %244 : vector<1x1x32xf32> to vector<1x32xf32>
    %c3_152 = arith.constant 3 : index
    %c0_153 = arith.constant 0 : index
    %c0_154 = arith.constant 0 : index
    %246 = vector.load %arg10[%c3_152, %c0_153, %c0_154] : memref<4x32x32xbf16, #tpu.memory_space<vmem>>, vector<1x32x32xbf16>
    %247 = vector.shape_cast %246 : vector<1x32x32xbf16> to vector<32x32xbf16>
    %c3_155 = arith.constant 3 : index
    %c0_156 = arith.constant 0 : index
    %c0_157 = arith.constant 0 : index
    %248 = vector.load %arg11[%c3_155, %c0_156, %c0_157] : memref<4x1x32xf32, #tpu.memory_space<vmem>>, vector<1x1x32xf32>
    %249 = vector.shape_cast %248 : vector<1x1x32xf32> to vector<1x32xf32>
    %c3_158 = arith.constant 3 : index
    %c0_159 = arith.constant 0 : index
    %c0_160 = arith.constant 0 : index
    %250 = vector.load %arg12[%c3_158, %c0_159, %c0_160] : memref<4x1x32xf32, #tpu.memory_space<vmem>>, vector<1x1x32xf32>
    %251 = vector.shape_cast %250 : vector<1x1x32xf32> to vector<1x32xf32>
    %c3_161 = arith.constant 3 : index
    %c0_162 = arith.constant 0 : index
    %c0_163 = arith.constant 0 : index
    %252 = vector.load %arg13[%c3_161, %c0_162, %c0_163] : memref<4x1x32xf32, #tpu.memory_space<vmem>>, vector<1x1x32xf32>
    %253 = vector.shape_cast %252 : vector<1x1x32xf32> to vector<1x32xf32>
    %254 = arith.truncf %233 : vector<8x32xf32> to vector<8x32xbf16>
    %cst_164 = arith.constant dense<0.000000e+00> : vector<8x32xf32>
    %255 = tpu.matmul %254, %235, %cst_164 {dimension_numbers = #tpu.dot_dimension_numbers<[1], [0], [0], [1], [0, 0, 1, 1], [], []>} : vector<8x32xbf16>, vector<32x32xbf16>, vector<8x32xf32> -> vector<8x32xf32>
    %256 = vector.broadcast %237 : vector<1x32xf32> to vector<8x32xf32>
    %257 = arith.addf %255, %256 : vector<8x32xf32>
    %258 = arith.addf %233, %257 : vector<8x32xf32>
    %cst_165 = arith.constant dense<0.000000e+00> : vector<8xf32>
    %259 = vector.multi_reduction <add>, %258, %cst_165 [1] : vector<8x32xf32> to vector<8xf32>
    %260 = vector.shape_cast %259 : vector<8xf32> to vector<8x1xf32>
    %cst_166 = arith.constant 3.200000e+01 : f32
    %261 = vector.broadcast %cst_166 : f32 to vector<8x1xf32>
    %262 = arith.divf %260, %261 : vector<8x1xf32>
    %263 = vector.broadcast %262 : vector<8x1xf32> to vector<8x32xf32>
    %264 = arith.subf %258, %263 : vector<8x32xf32>
    %265 = arith.mulf %264, %264 : vector<8x32xf32>
    %cst_167 = arith.constant dense<0.000000e+00> : vector<8xf32>
    %266 = vector.multi_reduction <add>, %265, %cst_167 [1] : vector<8x32xf32> to vector<8xf32>
    %267 = vector.shape_cast %266 : vector<8xf32> to vector<8x1xf32>
    %cst_168 = arith.constant 3.200000e+01 : f32
    %268 = vector.broadcast %cst_168 : f32 to vector<8x1xf32>
    %269 = arith.divf %267, %268 : vector<8x1xf32>
    %cst_169 = arith.constant 9.99999974E-6 : f32
    %270 = vector.broadcast %cst_169 : f32 to vector<8x1xf32>
    %271 = arith.addf %269, %270 : vector<8x1xf32>
    %272 = math.rsqrt %271 : vector<8x1xf32>
    %273 = vector.broadcast %272 : vector<8x1xf32> to vector<8x32xf32>
    %274 = arith.mulf %264, %273 : vector<8x32xf32>
    %275 = vector.broadcast %239 : vector<1x32xf32> to vector<8x32xf32>
    %276 = arith.mulf %274, %275 : vector<8x32xf32>
    %277 = vector.broadcast %241 : vector<1x32xf32> to vector<8x32xf32>
    %278 = arith.addf %276, %277 : vector<8x32xf32>
    %279 = arith.truncf %278 : vector<8x32xf32> to vector<8x32xbf16>
    %cst_170 = arith.constant dense<0.000000e+00> : vector<8x32xf32>
    %280 = tpu.matmul %279, %243, %cst_170 {dimension_numbers = #tpu.dot_dimension_numbers<[1], [0], [0], [1], [0, 0, 1, 1], [], []>} : vector<8x32xbf16>, vector<32x32xbf16>, vector<8x32xf32> -> vector<8x32xf32>
    %281 = vector.broadcast %245 : vector<1x32xf32> to vector<8x32xf32>
    %282 = arith.addf %280, %281 : vector<8x32xf32>
    %cst_171 = arith.constant 0.000000e+00 : f32
    %283 = vector.broadcast %cst_171 : f32 to vector<8x32xf32>
    %284 = arith.maximumf %282, %283 : vector<8x32xf32>
    %285 = arith.truncf %284 : vector<8x32xf32> to vector<8x32xbf16>
    %cst_172 = arith.constant dense<0.000000e+00> : vector<8x32xf32>
    %286 = tpu.matmul %285, %247, %cst_172 {dimension_numbers = #tpu.dot_dimension_numbers<[1], [0], [0], [1], [0, 0, 1, 1], [], []>} : vector<8x32xbf16>, vector<32x32xbf16>, vector<8x32xf32> -> vector<8x32xf32>
    %287 = vector.broadcast %249 : vector<1x32xf32> to vector<8x32xf32>
    %288 = arith.addf %286, %287 : vector<8x32xf32>
    %289 = arith.addf %278, %288 : vector<8x32xf32>
    %cst_173 = arith.constant dense<0.000000e+00> : vector<8xf32>
    %290 = vector.multi_reduction <add>, %289, %cst_173 [1] : vector<8x32xf32> to vector<8xf32>
    %291 = vector.shape_cast %290 : vector<8xf32> to vector<8x1xf32>
    %cst_174 = arith.constant 3.200000e+01 : f32
    %292 = vector.broadcast %cst_174 : f32 to vector<8x1xf32>
    %293 = arith.divf %291, %292 : vector<8x1xf32>
    %294 = vector.broadcast %293 : vector<8x1xf32> to vector<8x32xf32>
    %295 = arith.subf %289, %294 : vector<8x32xf32>
    %296 = arith.mulf %295, %295 : vector<8x32xf32>
    %cst_175 = arith.constant dense<0.000000e+00> : vector<8xf32>
    %297 = vector.multi_reduction <add>, %296, %cst_175 [1] : vector<8x32xf32> to vector<8xf32>
    %298 = vector.shape_cast %297 : vector<8xf32> to vector<8x1xf32>
    %cst_176 = arith.constant 3.200000e+01 : f32
    %299 = vector.broadcast %cst_176 : f32 to vector<8x1xf32>
    %300 = arith.divf %298, %299 : vector<8x1xf32>
    %cst_177 = arith.constant 9.99999974E-6 : f32
    %301 = vector.broadcast %cst_177 : f32 to vector<8x1xf32>
    %302 = arith.addf %300, %301 : vector<8x1xf32>
    %303 = math.rsqrt %302 : vector<8x1xf32>
    %304 = vector.broadcast %303 : vector<8x1xf32> to vector<8x32xf32>
    %305 = arith.mulf %295, %304 : vector<8x32xf32>
    %306 = vector.broadcast %251 : vector<1x32xf32> to vector<8x32xf32>
    %307 = arith.mulf %305, %306 : vector<8x32xf32>
    %308 = vector.broadcast %253 : vector<1x32xf32> to vector<8x32xf32>
    %309 = arith.addf %307, %308 : vector<8x32xf32>
    %310 = arith.truncf %309 : vector<8x32xf32> to vector<8x32xbf16>
    %c0_178 = arith.constant 0 : index
    %c0_179 = arith.constant 0 : index
    %311 = vector.load %arg14[%c0_178, %c0_179] : memref<32x128xbf16, #tpu.memory_space<vmem>>, vector<32x128xbf16>
    %cst_180 = arith.constant dense<0.000000e+00> : vector<8x128xf32>
    %312 = tpu.matmul %310, %311, %cst_180 {dimension_numbers = #tpu.dot_dimension_numbers<[1], [0], [0], [1], [0, 0, 1, 1], [], []>} : vector<8x32xbf16>, vector<32x128xbf16>, vector<8x128xf32> -> vector<8x128xf32>
    %c0_181 = arith.constant 0 : index
    %c0_182 = arith.constant 0 : index
    %313 = vector.load %arg15[%c0_181, %c0_182] : memref<1x128xf32, #tpu.memory_space<vmem>>, vector<1x128xf32>
    %314 = vector.broadcast %313 : vector<1x128xf32> to vector<8x128xf32>
    %315 = arith.addf %312, %314 : vector<8x128xf32>
    %c0_183 = arith.constant 0 : index
    %c0_184 = arith.constant 0 : index
    %316 = vector.load %arg16[%c0_183, %c0_184] : memref<8x128xf32, #tpu.memory_space<vmem>>, vector<8x128xf32>
    tpu.vector_store %arg16[%c0_183, %c0_184], %315 {strides = array<i32>} : memref<8x128xf32, #tpu.memory_space<vmem>>, vector<8x128xf32>,
    return
  }
  func.func @transform_0(%arg0: i32) -> (i32, i32) {
    %c0_i32 = arith.constant 0 : i32
    %c0_i32_0 = arith.constant 0 : i32
    return %arg0, %c0_i32 : i32, i32
  }
  func.func @transform_1(%arg0: i32) -> (i32, i32) {
    %c0_i32 = arith.constant 0 : i32
    %c0_i32_0 = arith.constant 0 : i32
    %c0_i32_1 = arith.constant 0 : i32
    return %c0_i32, %c0_i32_0 : i32, i32
  }
  func.func @transform_2(%arg0: i32) -> (i32, i32) {
    %c0_i32 = arith.constant 0 : i32
    %c0_i32_0 = arith.constant 0 : i32
    %c0_i32_1 = arith.constant 0 : i32
    return %c0_i32, %c0_i32_0 : i32, i32
  }
  func.func @transform_3(%arg0: i32) -> (i32, i32, i32) {
    %c0_i32 = arith.constant 0 : i32
    %c0_i32_0 = arith.constant 0 : i32
    %c0_i32_1 = arith.constant 0 : i32
    %c0_i32_2 = arith.constant 0 : i32
    return %c0_i32, %c0_i32_0, %c0_i32_1 : i32, i32, i32
  }
  func.func @transform_4(%arg0: i32) -> (i32, i32, i32) {
    %c0_i32 = arith.constant 0 : i32
    %c0_i32_0 = arith.constant 0 : i32
    %c0_i32_1 = arith.constant 0 : i32
    %c0_i32_2 = arith.constant 0 : i32
    return %c0_i32, %c0_i32_0, %c0_i32_1 : i32, i32, i32
  }
  func.func @transform_5(%arg0: i32) -> (i32, i32, i32) {
    %c0_i32 = arith.constant 0 : i32
    %c0_i32_0 = arith.constant 0 : i32
    %c0_i32_1 = arith.constant 0 : i32
    %c0_i32_2 = arith.constant 0 : i32
    return %c0_i32, %c0_i32_0, %c0_i32_1 : i32, i32, i32
  }
  func.func @transform_6(%arg0: i32) -> (i32, i32, i32) {
    %c0_i32 = arith.constant 0 : i32
    %c0_i32_0 = arith.constant 0 : i32
    %c0_i32_1 = arith.constant 0 : i32
    %c0_i32_2 = arith.constant 0 : i32
    return %c0_i32, %c0_i32_0, %c0_i32_1 : i32, i32, i32
  }
  func.func @transform_7(%arg0: i32) -> (i32, i32, i32) {
    %c0_i32 = arith.constant 0 : i32
    %c0_i32_0 = arith.constant 0 : i32
    %c0_i32_1 = arith.constant 0 : i32
    %c0_i32_2 = arith.constant 0 : i32
    return %c0_i32, %c0_i32_0, %c0_i32_1 : i32, i32, i32
  }
  func.func @transform_8(%arg0: i32) -> (i32, i32, i32) {
    %c0_i32 = arith.constant 0 : i32
    %c0_i32_0 = arith.constant 0 : i32
    %c0_i32_1 = arith.constant 0 : i32
    %c0_i32_2 = arith.constant 0 : i32
    return %c0_i32, %c0_i32_0, %c0_i32_1 : i32, i32, i32
  }
  func.func @transform_9(%arg0: i32) -> (i32, i32, i32) {
    %c0_i32 = arith.constant 0 : i32
    %c0_i32_0 = arith.constant 0 : i32
    %c0_i32_1 = arith.constant 0 : i32
    %c0_i32_2 = arith.constant 0 : i32
    return %c0_i32, %c0_i32_0, %c0_i32_1 : i32, i32, i32
  }
  func.func @transform_10(%arg0: i32) -> (i32, i32, i32) {
    %c0_i32 = arith.constant 0 : i32
    %c0_i32_0 = arith.constant 0 : i32
    %c0_i32_1 = arith.constant 0 : i32
    %c0_i32_2 = arith.constant 0 : i32
    return %c0_i32, %c0_i32_0, %c0_i32_1 : i32, i32, i32
  }
  func.func @transform_11(%arg0: i32) -> (i32, i32, i32) {
    %c0_i32 = arith.constant 0 : i32
    %c0_i32_0 = arith.constant 0 : i32
    %c0_i32_1 = arith.constant 0 : i32
    %c0_i32_2 = arith.constant 0 : i32
    return %c0_i32, %c0_i32_0, %c0_i32_1 : i32, i32, i32
  }
  func.func @transform_12(%arg0: i32) -> (i32, i32, i32) {
    %c0_i32 = arith.constant 0 : i32
    %c0_i32_0 = arith.constant 0 : i32
    %c0_i32_1 = arith.constant 0 : i32
    %c0_i32_2 = arith.constant 0 : i32
    return %c0_i32, %c0_i32_0, %c0_i32_1 : i32, i32, i32
  }
  func.func @transform_13(%arg0: i32) -> (i32, i32) {
    %c0_i32 = arith.constant 0 : i32
    %c0_i32_0 = arith.constant 0 : i32
    %c0_i32_1 = arith.constant 0 : i32
    return %c0_i32, %c0_i32_0 : i32, i32
  }
  func.func @transform_14(%arg0: i32) -> (i32, i32) {
    %c0_i32 = arith.constant 0 : i32
    %c0_i32_0 = arith.constant 0 : i32
    %c0_i32_1 = arith.constant 0 : i32
    return %c0_i32, %c0_i32_0 : i32, i32
  }
  func.func @transform_15(%arg0: i32) -> (i32, i32) {
    %c0_i32 = arith.constant 0 : i32
    %c0_i32_0 = arith.constant 0 : i32
    return %arg0, %c0_i32 : i32, i32
  }
}

module attributes {stable_mosaic.version = 11 : i64} {
  func.func @_resident_kernel(%arg0: i32, %arg1: memref<8x16xbf16, #tpu.memory_space<vmem>>, %arg2: memref<16x32xbf16, #tpu.memory_space<vmem>>, %arg3: memref<1x32xf32, #tpu.memory_space<vmem>>, %arg4: memref<4x32x32xbf16, #tpu.memory_space<vmem>>, %arg5: memref<4x1x32xf32, #tpu.memory_space<vmem>>, %arg6: memref<4x1x32xf32, #tpu.memory_space<vmem>>, %arg7: memref<4x1x32xf32, #tpu.memory_space<vmem>>, %arg8: memref<4x32x32xbf16, #tpu.memory_space<vmem>>, %arg9: memref<4x1x32xf32, #tpu.memory_space<vmem>>, %arg10: memref<4x32x32xbf16, #tpu.memory_space<vmem>>, %arg11: memref<4x1x32xf32, #tpu.memory_space<vmem>>, %arg12: memref<4x1x32xf32, #tpu.memory_space<vmem>>, %arg13: memref<4x1x32xf32, #tpu.memory_space<vmem>>, %arg14: memref<32x128xbf16, #tpu.memory_space<vmem>>, %arg15: memref<1x128xf32, #tpu.memory_space<vmem>>, %arg16: memref<8x128xf32, #tpu.memory_space<vmem>>) attributes {dimension_semantics = [#tpu.dimension_semantics<parallel>], iteration_bounds = array<i64: 2>, scalar_prefetch = 0 : i64, scratch_operands = 0 : i64, tpu.core_type = #tpu.core_type<tc>, window_params = [{transform_indices = @transform_0, window_bounds = array<i64: 8, 16>}, {pipeline_mode = #tpu.pipeline_mode<synchronous>, transform_indices = @transform_1, window_bounds = array<i64: 16, 32>}, {pipeline_mode = #tpu.pipeline_mode<synchronous>, transform_indices = @transform_2, window_bounds = array<i64: 1, 32>}, {pipeline_mode = #tpu.pipeline_mode<synchronous>, transform_indices = @transform_3, window_bounds = array<i64: 4, 32, 32>}, {pipeline_mode = #tpu.pipeline_mode<synchronous>, transform_indices = @transform_4, window_bounds = array<i64: 4, 1, 32>}, {pipeline_mode = #tpu.pipeline_mode<synchronous>, transform_indices = @transform_5, window_bounds = array<i64: 4, 1, 32>}, {pipeline_mode = #tpu.pipeline_mode<synchronous>, transform_indices = @transform_6, window_bounds = array<i64: 4, 1, 32>}, {pipeline_mode = #tpu.pipeline_mode<synchronous>, transform_indices = @transform_7, window_bounds = array<i64: 4, 32, 32>}, {pipeline_mode = #tpu.pipeline_mode<synchronous>, transform_indices = @transform_8, window_bounds = array<i64: 4, 1, 32>}, {pipeline_mode = #tpu.pipeline_mode<synchronous>, transform_indices = @transform_9, window_bounds = array<i64: 4, 32, 32>}, {pipeline_mode = #tpu.pipeline_mode<synchronous>, transform_indices = @transform_10, window_bounds = array<i64: 4, 1, 32>}, {pipeline_mode = #tpu.pipeline_mode<synchronous>, transform_indices = @transform_11, window_bounds = array<i64: 4, 1, 32>}, {pipeline_mode = #tpu.pipeline_mode<synchronous>, transform_indices = @transform_12, window_bounds = array<i64: 4, 1, 32>}, {pipeline_mode = #tpu.pipeline_mode<synchronous>, transform_indices = @transform_13, window_bounds = array<i64: 32, 128>}, {pipeline_mode = #tpu.pipeline_mode<synchronous>, transform_indices = @transform_14, window_bounds = array<i64: 1, 128>}, {transform_indices = @transform_15, window_bounds = array<i64: 8, 128>}]} {
    %c0 = arith.constant 0 : index
    %c0_0 = arith.constant 0 : index
    %0 = vector.load %arg1[%c0, %c0_0] : memref<8x16xbf16, #tpu.memory_space<vmem>>, vector<8x16xbf16>
    %c0_1 = arith.constant 0 : index
    %c0_2 = arith.constant 0 : index
    %1 = vector.load %arg2[%c0_1, %c0_2] : memref<16x32xbf16, #tpu.memory_space<vmem>>, vector<16x32xbf16>
    %cst = arith.constant dense<0.000000e+00> : vector<8x32xf32>
    %2 = tpu.matmul %0, %1, %cst {dimension_numbers = #tpu.dot_dimension_numbers<[1], [0], [0], [1], [0, 0, 1, 1], [], []>} : vector<8x16xbf16>, vector<16x32xbf16>, vector<8x32xf32> -> vector<8x32xf32>
    %c0_3 = arith.constant 0 : index
    %c0_4 = arith.constant 0 : index
    %3 = vector.load %arg3[%c0_3, %c0_4] : memref<1x32xf32, #tpu.memory_space<vmem>>, vector<1x32xf32>
    %4 = vector.broadcast %3 : vector<1x32xf32> to vector<8x32xf32>
    %5 = arith.addf %2, %4 : vector<8x32xf32>
    %c0_5 = arith.constant 0 : index
    %c0_6 = arith.constant 0 : index
    %c0_7 = arith.constant 0 : index
    %6 = vector.load %arg4[%c0_5, %c0_6, %c0_7] : memref<4x32x32xbf16, #tpu.memory_space<vmem>>, vector<1x32x32xbf16>
    %7 = vector.shape_cast %6 : vector<1x32x32xbf16> to vector<32x32xbf16>
    %c0_8 = arith.constant 0 : index
    %c0_9 = arith.constant 0 : index
    %c0_10 = arith.constant 0 : index
    %8 = vector.load %arg5[%c0_8, %c0_9, %c0_10] : memref<4x1x32xf32, #tpu.memory_space<vmem>>, vector<1x1x32xf32>
    %9 = vector.shape_cast %8 : vector<1x1x32xf32> to vector<1x32xf32>
    %c0_11 = arith.constant 0 : index
    %c0_12 = arith.constant 0 : index
    %c0_13 = arith.constant 0 : index
    %10 = vector.load %arg6[%c0_11, %c0_12, %c0_13] : memref<4x1x32xf32, #tpu.memory_space<vmem>>, vector<1x1x32xf32>
    %11 = vector.shape_cast %10 : vector<1x1x32xf32> to vector<1x32xf32>
    %c0_14 = arith.constant 0 : index
    %c0_15 = arith.constant 0 : index
    %c0_16 = arith.constant 0 : index
    %12 = vector.load %arg7[%c0_14, %c0_15, %c0_16] : memref<4x1x32xf32, #tpu.memory_space<vmem>>, vector<1x1x32xf32>
    %13 = vector.shape_cast %12 : vector<1x1x32xf32> to vector<1x32xf32>
    %c0_17 = arith.constant 0 : index
    %c0_18 = arith.constant 0 : index
    %c0_19 = arith.constant 0 : index
    %14 = vector.load %arg8[%c0_17, %c0_18, %c0_19] : memref<4x32x32xbf16, #tpu.memory_space<vmem>>, vector<1x32x32xbf16>
    %15 = vector.shape_cast %14 : vector<1x32x32xbf16> to vector<32x32xbf16>
    %c0_20 = arith.constant 0 : index
    %c0_21 = arith.constant 0 : index
    %c0_22 = arith.constant 0 : index
    %16 = vector.load %arg9[%c0_20, %c0_21, %c0_22] : memref<4x1x32xf32, #tpu.memory_space<vmem>>, vector<1x1x32xf32>
    %17 = vector.shape_cast %16 : vector<1x1x32xf32> to vector<1x32xf32>
    %c0_23 = arith.constant 0 : index
    %c0_24 = arith.constant 0 : index
    %c0_25 = arith.constant 0 : index
    %18 = vector.load %arg10[%c0_23, %c0_24, %c0_25] : memref<4x32x32xbf16, #tpu.memory_space<vmem>>, vector<1x32x32xbf16>
    %19 = vector.shape_cast %18 : vector<1x32x32xbf16> to vector<32x32xbf16>
    %c0_26 = arith.constant 0 : index
    %c0_27 = arith.constant 0 : index
    %c0_28 = arith.constant 0 : index
    %20 = vector.load %arg11[%c0_26, %c0_27, %c0_28] : memref<4x1x32xf32, #tpu.memory_space<vmem>>, vector<1x1x32xf32>
    %21 = vector.shape_cast %20 : vector<1x1x32xf32> to vector<1x32xf32>
    %c0_29 = arith.constant 0 : index
    %c0_30 = arith.constant 0 : index
    %c0_31 = arith.constant 0 : index
    %22 = vector.load %arg12[%c0_29, %c0_30, %c0_31] : memref<4x1x32xf32, #tpu.memory_space<vmem>>, vector<1x1x32xf32>
    %23 = vector.shape_cast %22 : vector<1x1x32xf32> to vector<1x32xf32>
    %c0_32 = arith.constant 0 : index
    %c0_33 = arith.constant 0 : index
    %c0_34 = arith.constant 0 : index
    %24 = vector.load %arg13[%c0_32, %c0_33, %c0_34] : memref<4x1x32xf32, #tpu.memory_space<vmem>>, vector<1x1x32xf32>
    %25 = vector.shape_cast %24 : vector<1x1x32xf32> to vector<1x32xf32>
    %26 = arith.truncf %5 : vector<8x32xf32> to vector<8x32xbf16>
    %cst_35 = arith.constant dense<0.000000e+00> : vector<8x32xf32>
    %27 = tpu.matmul %26, %7, %cst_35 {dimension_numbers = #tpu.dot_dimension_numbers<[1], [0], [0], [1], [0, 0, 1, 1], [], []>} : vector<8x32xbf16>, vector<32x32xbf16>, vector<8x32xf32> -> vector<8x32xf32>
    %28 = vector.broadcast %9 : vector<1x32xf32> to vector<8x32xf32>
    %29 = arith.addf %27, %28 : vector<8x32xf32>
    %30 = arith.addf %5, %29 : vector<8x32xf32>
    %cst_36 = arith.constant dense<0.000000e+00> : vector<8xf32>
    %31 = vector.multi_reduction <add>, %30, %cst_36 [1] : vector<8x32xf32> to vector<8xf32>
    %32 = vector.shape_cast %31 : vector<8xf32> to vector<8x1xf32>
    %cst_37 = arith.constant 3.200000e+01 : f32
    %33 = vector.broadcast %cst_37 : f32 to vector<8x1xf32>
    %34 = arith.divf %32, %33 : vector<8x1xf32>
    %35 = vector.broadcast %34 : vector<8x1xf32> to vector<8x32xf32>
    %36 = arith.subf %30, %35 : vector<8x32xf32>
    %37 = arith.mulf %36, %36 : vector<8x32xf32>
    %cst_38 = arith.constant dense<0.000000e+00> : vector<8xf32>
    %38 = vector.multi_reduction <add>, %37, %cst_38 [1] : vector<8x32xf32> to vector<8xf32>
    %39 = vector.shape_cast %38 : vector<8xf32> to vector<8x1xf32>
    %cst_39 = arith.constant 3.200000e+01 : f32
    %40 = vector.broadcast %cst_39 : f32 to vector<8x1xf32>
    %41 = arith.divf %39, %40 : vector<8x1xf32>
    %cst_40 = arith.constant 9.99999974E-6 : f32
    %42 = vector.broadcast %cst_40 : f32 to vector<8x1xf32>
    %43 = arith.addf %41, %42 : vector<8x1xf32>
    %44 = math.rsqrt %43 : vector<8x1xf32>
    %45 = vector.broadcast %44 : vector<8x1xf32> to vector<8x32xf32>
    %46 = arith.mulf %36, %45 : vector<8x32xf32>
    %47 = vector.broadcast %11 : vector<1x32xf32> to vector<8x32xf32>
    %48 = arith.mulf %46, %47 : vector<8x32xf32>
    %49 = vector.broadcast %13 : vector<1x32xf32> to vector<8x32xf32>
    %50 = arith.addf %48, %49 : vector<8x32xf32>
    %51 = arith.truncf %50 : vector<8x32xf32> to vector<8x32xbf16>
    %cst_41 = arith.constant dense<0.000000e+00> : vector<8x32xf32>
    %52 = tpu.matmul %51, %15, %cst_41 {dimension_numbers = #tpu.dot_dimension_numbers<[1], [0], [0], [1], [0, 0, 1, 1], [], []>} : vector<8x32xbf16>, vector<32x32xbf16>, vector<8x32xf32> -> vector<8x32xf32>
    %53 = vector.broadcast %17 : vector<1x32xf32> to vector<8x32xf32>
    %54 = arith.addf %52, %53 : vector<8x32xf32>
    %cst_42 = arith.constant 0.000000e+00 : f32
    %55 = vector.broadcast %cst_42 : f32 to vector<8x32xf32>
    %56 = arith.maximumf %54, %55 : vector<8x32xf32>
    %57 = arith.truncf %56 : vector<8x32xf32> to vector<8x32xbf16>
    %cst_43 = arith.constant dense<0.000000e+00> : vector<8x32xf32>
    %58 = tpu.matmul %57, %19, %cst_43 {dimension_numbers = #tpu.dot_dimension_numbers<[1], [0], [0], [1], [0, 0, 1, 1], [], []>} : vector<8x32xbf16>, vector<32x32xbf16>, vector<8x32xf32> -> vector<8x32xf32>
    %59 = vector.broadcast %21 : vector<1x32xf32> to vector<8x32xf32>
    %60 = arith.addf %58, %59 : vector<8x32xf32>
    %61 = arith.addf %50, %60 : vector<8x32xf32>
    %cst_44 = arith.constant dense<0.000000e+00> : vector<8xf32>
    %62 = vector.multi_reduction <add>, %61, %cst_44 [1] : vector<8x32xf32> to vector<8xf32>
    %63 = vector.shape_cast %62 : vector<8xf32> to vector<8x1xf32>
    %cst_45 = arith.constant 3.200000e+01 : f32
    %64 = vector.broadcast %cst_45 : f32 to vector<8x1xf32>
    %65 = arith.divf %63, %64 : vector<8x1xf32>
    %66 = vector.broadcast %65 : vector<8x1xf32> to vector<8x32xf32>
    %67 = arith.subf %61, %66 : vector<8x32xf32>
    %68 = arith.mulf %67, %67 : vector<8x32xf32>
    %cst_46 = arith.constant dense<0.000000e+00> : vector<8xf32>
    %69 = vector.multi_reduction <add>, %68, %cst_46 [1] : vector<8x32xf32> to vector<8xf32>
    %70 = vector.shape_cast %69 : vector<8xf32> to vector<8x1xf32>
    %cst_47 = arith.constant 3.200000e+01 : f32
    %71 = vector.broadcast %cst_47 : f32 to vector<8x1xf32>
    %72 = arith.divf %70, %71 : vector<8x1xf32>
    %cst_48 = arith.constant 9.99999974E-6 : f32
    %73 = vector.broadcast %cst_48 : f32 to vector<8x1xf32>
    %74 = arith.addf %72, %73 : vector<8x1xf32>
    %75 = math.rsqrt %74 : vector<8x1xf32>
    %76 = vector.broadcast %75 : vector<8x1xf32> to vector<8x32xf32>
    %77 = arith.mulf %67, %76 : vector<8x32xf32>
    %78 = vector.broadcast %23 : vector<1x32xf32> to vector<8x32xf32>
    %79 = arith.mulf %77, %78 : vector<8x32xf32>
    %80 = vector.broadcast %25 : vector<1x32xf32> to vector<8x32xf32>
    %81 = arith.addf %79, %80 : vector<8x32xf32>
    %c1 = arith.constant 1 : index
    %c0_49 = arith.constant 0 : index
    %c0_50 = arith.constant 0 : index
    %82 = vector.load %arg4[%c1, %c0_49, %c0_50] : memref<4x32x32xbf16, #tpu.memory_space<vmem>>, vector<1x32x32xbf16>
    %83 = vector.shape_cast %82 : vector<1x32x32xbf16> to vector<32x32xbf16>
    %c1_51 = arith.constant 1 : index
    %c0_52 = arith.constant 0 : index
    %c0_53 = arith.constant 0 : index
    %84 = vector.load %arg5[%c1_51, %c0_52, %c0_53] : memref<4x1x32xf32, #tpu.memory_space<vmem>>, vector<1x1x32xf32>
    %85 = vector.shape_cast %84 : vector<1x1x32xf32> to vector<1x32xf32>
    %c1_54 = arith.constant 1 : index
    %c0_55 = arith.constant 0 : index
    %c0_56 = arith.constant 0 : index
    %86 = vector.load %arg6[%c1_54, %c0_55, %c0_56] : memref<4x1x32xf32, #tpu.memory_space<vmem>>, vector<1x1x32xf32>
    %87 = vector.shape_cast %86 : vector<1x1x32xf32> to vector<1x32xf32>
    %c1_57 = arith.constant 1 : index
    %c0_58 = arith.constant 0 : index
    %c0_59 = arith.constant 0 : index
    %88 = vector.load %arg7[%c1_57, %c0_58, %c0_59] : memref<4x1x32xf32, #tpu.memory_space<vmem>>, vector<1x1x32xf32>
    %89 = vector.shape_cast %88 : vector<1x1x32xf32> to vector<1x32xf32>
    %c1_60 = arith.constant 1 : index
    %c0_61 = arith.constant 0 : index
    %c0_62 = arith.constant 0 : index
    %90 = vector.load %arg8[%c1_60, %c0_61, %c0_62] : memref<4x32x32xbf16, #tpu.memory_space<vmem>>, vector<1x32x32xbf16>
    %91 = vector.shape_cast %90 : vector<1x32x32xbf16> to vector<32x32xbf16>
    %c1_63 = arith.constant 1 : index
    %c0_64 = arith.constant 0 : index
    %c0_65 = arith.constant 0 : index
    %92 = vector.load %arg9[%c1_63, %c0_64, %c0_65] : memref<4x1x32xf32, #tpu.memory_space<vmem>>, vector<1x1x32xf32>
    %93 = vector.shape_cast %92 : vector<1x1x32xf32> to vector<1x32xf32>
    %c1_66 = arith.constant 1 : index
    %c0_67 = arith.constant 0 : index
    %c0_68 = arith.constant 0 : index
    %94 = vector.load %arg10[%c1_66, %c0_67, %c0_68] : memref<4x32x32xbf16, #tpu.memory_space<vmem>>, vector<1x32x32xbf16>
    %95 = vector.shape_cast %94 : vector<1x32x32xbf16> to vector<32x32xbf16>
    %c1_69 = arith.constant 1 : index
    %c0_70 = arith.constant 0 : index
    %c0_71 = arith.constant 0 : index
    %96 = vector.load %arg11[%c1_69, %c0_70, %c0_71] : memref<4x1x32xf32, #tpu.memory_space<vmem>>, vector<1x1x32xf32>
    %97 = vector.shape_cast %96 : vector<1x1x32xf32> to vector<1x32xf32>
    %c1_72 = arith.constant 1 : index
    %c0_73 = arith.constant 0 : index
    %c0_74 = arith.constant 0 : index
    %98 = vector.load %arg12[%c1_72, %c0_73, %c0_74] : memref<4x1x32xf32, #tpu.memory_space<vmem>>, vector<1x1x32xf32>
    %99 = vector.shape_cast %98 : vector<1x1x32xf32> to vector<1x32xf32>
    %c1_75 = arith.constant 1 : index
    %c0_76 = arith.constant 0 : index
    %c0_77 = arith.constant 0 : index
    %100 = vector.load %arg13[%c1_75, %c0_76, %c0_77] : memref<4x1x32xf32, #tpu.memory_space<vmem>>, vector<1x1x32xf32>
    %101 = vector.shape_cast %100 : vector<1x1x32xf32> to vector<1x32xf32>
    %102 = arith.truncf %81 : vector<8x32xf32> to vector<8x32xbf16>
    %cst_78 = arith.constant dense<0.000000e+00> : vector<8x32xf32>
    %103 = tpu.matmul %102, %83, %cst_78 {dimension_numbers = #tpu.dot_dimension_numbers<[1], [0], [0], [1], [0, 0, 1, 1], [], []>} : vector<8x32xbf16>, vector<32x32xbf16>, vector<8x32xf32> -> vector<8x32xf32>
    %104 = vector.broadcast %85 : vector<1x32xf32> to vector<8x32xf32>
    %105 = arith.addf %103, %104 : vector<8x32xf32>
    %106 = arith.addf %81, %105 : vector<8x32xf32>
    %cst_79 = arith.constant dense<0.000000e+00> : vector<8xf32>
    %107 = vector.multi_reduction <add>, %106, %cst_79 [1] : vector<8x32xf32> to vector<8xf32>
    %108 = vector.shape_cast %107 : vector<8xf32> to vector<8x1xf32>
    %cst_80 = arith.constant 3.200000e+01 : f32
    %109 = vector.broadcast %cst_80 : f32 to vector<8x1xf32>
    %110 = arith.divf %108, %109 : vector<8x1xf32>
    %111 = vector.broadcast %110 : vector<8x1xf32> to vector<8x32xf32>
    %112 = arith.subf %106, %111 : vector<8x32xf32>
    %113 = arith.mulf %112, %112 : vector<8x32xf32>
    %cst_81 = arith.constant dense<0.000000e+00> : vector<8xf32>
    %114 = vector.multi_reduction <add>, %113, %cst_81 [1] : vector<8x32xf32> to vector<8xf32>
    %115 = vector.shape_cast %114 : vector<8xf32> to vector<8x1xf32>
    %cst_82 = arith.constant 3.200000e+01 : f32
    %116 = vector.broadcast %cst_82 : f32 to vector<8x1xf32>
    %117 = arith.divf %115, %116 : vector<8x1xf32>
    %cst_83 = arith.constant 9.99999974E-6 : f32
    %118 = vector.broadcast %cst_83 : f32 to vector<8x1xf32>
    %119 = arith.addf %117, %118 : vector<8x1xf32>
    %120 = math.rsqrt %119 : vector<8x1xf32>
    %121 = vector.broadcast %120 : vector<8x1xf32> to vector<8x32xf32>
    %122 = arith.mulf %112, %121 : vector<8x32xf32>
    %123 = vector.broadcast %87 : vector<1x32xf32> to vector<8x32xf32>
    %124 = arith.mulf %122, %123 : vector<8x32xf32>
    %125 = vector.broadcast %89 : vector<1x32xf32> to vector<8x32xf32>
    %126 = arith.addf %124, %125 : vector<8x32xf32>
    %127 = arith.truncf %126 : vector<8x32xf32> to vector<8x32xbf16>
    %cst_84 = arith.constant dense<0.000000e+00> : vector<8x32xf32>
    %128 = tpu.matmul %127, %91, %cst_84 {dimension_numbers = #tpu.dot_dimension_numbers<[1], [0], [0], [1], [0, 0, 1, 1], [], []>} : vector<8x32xbf16>, vector<32x32xbf16>, vector<8x32xf32> -> vector<8x32xf32>
    %129 = vector.broadcast %93 : vector<1x32xf32> to vector<8x32xf32>
    %130 = arith.addf %128, %129 : vector<8x32xf32>
    %cst_85 = arith.constant 0.000000e+00 : f32
    %131 = vector.broadcast %cst_85 : f32 to vector<8x32xf32>
    %132 = arith.maximumf %130, %131 : vector<8x32xf32>
    %133 = arith.truncf %132 : vector<8x32xf32> to vector<8x32xbf16>
    %cst_86 = arith.constant dense<0.000000e+00> : vector<8x32xf32>
    %134 = tpu.matmul %133, %95, %cst_86 {dimension_numbers = #tpu.dot_dimension_numbers<[1], [0], [0], [1], [0, 0, 1, 1], [], []>} : vector<8x32xbf16>, vector<32x32xbf16>, vector<8x32xf32> -> vector<8x32xf32>
    %135 = vector.broadcast %97 : vector<1x32xf32> to vector<8x32xf32>
    %136 = arith.addf %134, %135 : vector<8x32xf32>
    %137 = arith.addf %126, %136 : vector<8x32xf32>
    %cst_87 = arith.constant dense<0.000000e+00> : vector<8xf32>
    %138 = vector.multi_reduction <add>, %137, %cst_87 [1] : vector<8x32xf32> to vector<8xf32>
    %139 = vector.shape_cast %138 : vector<8xf32> to vector<8x1xf32>
    %cst_88 = arith.constant 3.200000e+01 : f32
    %140 = vector.broadcast %cst_88 : f32 to vector<8x1xf32>
    %141 = arith.divf %139, %140 : vector<8x1xf32>
    %142 = vector.broadcast %141 : vector<8x1xf32> to vector<8x32xf32>
    %143 = arith.subf %137, %142 : vector<8x32xf32>
    %144 = arith.mulf %143, %143 : vector<8x32xf32>
    %cst_89 = arith.constant dense<0.000000e+00> : vector<8xf32>
    %145 = vector.multi_reduction <add>, %144, %cst_89 [1] : vector<8x32xf32> to vector<8xf32>
    %146 = vector.shape_cast %145 : vector<8xf32> to vector<8x1xf32>
    %cst_90 = arith.constant 3.200000e+01 : f32
    %147 = vector.broadcast %cst_90 : f32 to vector<8x1xf32>
    %148 = arith.divf %146, %147 : vector<8x1xf32>
    %cst_91 = arith.constant 9.99999974E-6 : f32
    %149 = vector.broadcast %cst_91 : f32 to vector<8x1xf32>
    %150 = arith.addf %148, %149 : vector<8x1xf32>
    %151 = math.rsqrt %150 : vector<8x1xf32>
    %152 = vector.broadcast %151 : vector<8x1xf32> to vector<8x32xf32>
    %153 = arith.mulf %143, %152 : vector<8x32xf32>
    %154 = vector.broadcast %99 : vector<1x32xf32> to vector<8x32xf32>
    %155 = arith.mulf %153, %154 : vector<8x32xf32>
    %156 = vector.broadcast %101 : vector<1x32xf32> to vector<8x32xf32>
    %157 = arith.addf %155, %156 : vector<8x32xf32>
    %c2 = arith.constant 2 : index
    %c0_92 = arith.constant 0 : index
    %c0_93 = arith.constant 0 : index
    %158 = vector.load %arg4[%c2, %c0_92, %c0_93] : memref<4x32x32xbf16, #tpu.memory_space<vmem>>, vector<1x32x32xbf16>
    %159 = vector.shape_cast %158 : vector<1x32x32xbf16> to vector<32x32xbf16>
    %c2_94 = arith.constant 2 : index
    %c0_95 = arith.constant 0 : index
    %c0_96 = arith.constant 0 : index
    %160 = vector.load %arg5[%c2_94, %c0_95, %c0_96] : memref<4x1x32xf32, #tpu.memory_space<vmem>>, vector<1x1x32xf32>
    %161 = vector.shape_cast %160 : vector<1x1x32xf32> to vector<1x32xf32>
    %c2_97 = arith.constant 2 : index
    %c0_98 = arith.constant 0 : index
    %c0_99 = arith.constant 0 : index
    %162 = vector.load %arg6[%c2_97, %c0_98, %c0_99] : memref<4x1x32xf32, #tpu.memory_space<vmem>>, vector<1x1x32xf32>
    %163 = vector.shape_cast %162 : vector<1x1x32xf32> to vector<1x32xf32>
    %c2_100 = arith.constant 2 : index
    %c0_101 = arith.constant 0 : index
    %c0_102 = arith.constant 0 : index
    %164 = vector.load %arg7[%c2_100, %c0_101, %c0_102] : memref<4x1x32xf32, #tpu.memory_space<vmem>>, vector<1x1x32xf32>
    %165 = vector.shape_cast %164 : vector<1x1x32xf32> to vector<1x32xf32>
    %c2_103 = arith.constant 2 : index
    %c0_104 = arith.constant 0 : index
    %c0_105 = arith.constant 0 : index
    %166 = vector.load %arg8[%c2_103, %c0_104, %c0_105] : memref<4x32x32xbf16, #tpu.memory_space<vmem>>, vector<1x32x32xbf16>
    %167 = vector.shape_cast %166 : vector<1x32x32xbf16> to vector<32x32xbf16>
    %c2_106 = arith.constant 2 : index
    %c0_107 = arith.constant 0 : index
    %c0_108 = arith.constant 0 : index
    %168 = vector.load %arg9[%c2_106, %c0_107, %c0_108] : memref<4x1x32xf32, #tpu.memory_space<vmem>>, vector<1x1x32xf32>
    %169 = vector.shape_cast %168 : vector<1x1x32xf32> to vector<1x32xf32>
    %c2_109 = arith.constant 2 : index
    %c0_110 = arith.constant 0 : index
    %c0_111 = arith.constant 0 : index
    %170 = vector.load %arg10[%c2_109, %c0_110, %c0_111] : memref<4x32x32xbf16, #tpu.memory_space<vmem>>, vector<1x32x32xbf16>
    %171 = vector.shape_cast %170 : vector<1x32x32xbf16> to vector<32x32xbf16>
    %c2_112 = arith.constant 2 : index
    %c0_113 = arith.constant 0 : index
    %c0_114 = arith.constant 0 : index
    %172 = vector.load %arg11[%c2_112, %c0_113, %c0_114] : memref<4x1x32xf32, #tpu.memory_space<vmem>>, vector<1x1x32xf32>
    %173 = vector.shape_cast %172 : vector<1x1x32xf32> to vector<1x32xf32>
    %c2_115 = arith.constant 2 : index
    %c0_116 = arith.constant 0 : index
    %c0_117 = arith.constant 0 : index
    %174 = vector.load %arg12[%c2_115, %c0_116, %c0_117] : memref<4x1x32xf32, #tpu.memory_space<vmem>>, vector<1x1x32xf32>
    %175 = vector.shape_cast %174 : vector<1x1x32xf32> to vector<1x32xf32>
    %c2_118 = arith.constant 2 : index
    %c0_119 = arith.constant 0 : index
    %c0_120 = arith.constant 0 : index
    %176 = vector.load %arg13[%c2_118, %c0_119, %c0_120] : memref<4x1x32xf32, #tpu.memory_space<vmem>>, vector<1x1x32xf32>
    %177 = vector.shape_cast %176 : vector<1x1x32xf32> to vector<1x32xf32>
    %178 = arith.truncf %157 : vector<8x32xf32> to vector<8x32xbf16>
    %cst_121 = arith.constant dense<0.000000e+00> : vector<8x32xf32>
    %179 = tpu.matmul %178, %159, %cst_121 {dimension_numbers = #tpu.dot_dimension_numbers<[1], [0], [0], [1], [0, 0, 1, 1], [], []>} : vector<8x32xbf16>, vector<32x32xbf16>, vector<8x32xf32> -> vector<8x32xf32>
    %180 = vector.broadcast %161 : vector<1x32xf32> to vector<8x32xf32>
    %181 = arith.addf %179, %180 : vector<8x32xf32>
    %182 = arith.addf %157, %181 : vector<8x32xf32>
    %cst_122 = arith.constant dense<0.000000e+00> : vector<8xf32>
    %183 = vector.multi_reduction <add>, %182, %cst_122 [1] : vector<8x32xf32> to vector<8xf32>
    %184 = vector.shape_cast %183 : vector<8xf32> to vector<8x1xf32>
    %cst_123 = arith.constant 3.200000e+01 : f32
    %185 = vector.broadcast %cst_123 : f32 to vector<8x1xf32>
    %186 = arith.divf %184, %185 : vector<8x1xf32>
    %187 = vector.broadcast %186 : vector<8x1xf32> to vector<8x32xf32>
    %188 = arith.subf %182, %187 : vector<8x32xf32>
    %189 = arith.mulf %188, %188 : vector<8x32xf32>
    %cst_124 = arith.constant dense<0.000000e+00> : vector<8xf32>
    %190 = vector.multi_reduction <add>, %189, %cst_124 [1] : vector<8x32xf32> to vector<8xf32>
    %191 = vector.shape_cast %190 : vector<8xf32> to vector<8x1xf32>
    %cst_125 = arith.constant 3.200000e+01 : f32
    %192 = vector.broadcast %cst_125 : f32 to vector<8x1xf32>
    %193 = arith.divf %191, %192 : vector<8x1xf32>
    %cst_126 = arith.constant 9.99999974E-6 : f32
    %194 = vector.broadcast %cst_126 : f32 to vector<8x1xf32>
    %195 = arith.addf %193, %194 : vector<8x1xf32>
    %196 = math.rsqrt %195 : vector<8x1xf32>
    %197 = vector.broadcast %196 : vector<8x1xf32> to vector<8x32xf32>
    %198 = arith.mulf %188, %197 : vector<8x32xf32>
    %199 = vector.broadcast %163 : vector<1x32xf32> to vector<8x32xf32>
    %200 = arith.mulf %198, %199 : vector<8x32xf32>
    %201 = vector.broadcast %165 : vector<1x32xf32> to vector<8x32xf32>
    %202 = arith.addf %200, %201 : vector<8x32xf32>
    %203 = arith.truncf %202 : vector<8x32xf32> to vector<8x32xbf16>
    %cst_127 = arith.constant dense<0.000000e+00> : vector<8x32xf32>
    %204 = tpu.matmul %203, %167, %cst_127 {dimension_numbers = #tpu.dot_dimension_numbers<[1], [0], [0], [1], [0, 0, 1, 1], [], []>} : vector<8x32xbf16>, vector<32x32xbf16>, vector<8x32xf32> -> vector<8x32xf32>
    %205 = vector.broadcast %169 : vector<1x32xf32> to vector<8x32xf32>
    %206 = arith.addf %204, %205 : vector<8x32xf32>
    %cst_128 = arith.constant 0.000000e+00 : f32
    %207 = vector.broadcast %cst_128 : f32 to vector<8x32xf32>
    %208 = arith.maximumf %206, %207 : vector<8x32xf32>
    %209 = arith.truncf %208 : vector<8x32xf32> to vector<8x32xbf16>
    %cst_129 = arith.constant dense<0.000000e+00> : vector<8x32xf32>
    %210 = tpu.matmul %209, %171, %cst_129 {dimension_numbers = #tpu.dot_dimension_numbers<[1], [0], [0], [1], [0, 0, 1, 1], [], []>} : vector<8x32xbf16>, vector<32x32xbf16>, vector<8x32xf32> -> vector<8x32xf32>
    %211 = vector.broadcast %173 : vector<1x32xf32> to vector<8x32xf32>
    %212 = arith.addf %210, %211 : vector<8x32xf32>
    %213 = arith.addf %202, %212 : vector<8x32xf32>
    %cst_130 = arith.constant dense<0.000000e+00> : vector<8xf32>
    %214 = vector.multi_reduction <add>, %213, %cst_130 [1] : vector<8x32xf32> to vector<8xf32>
    %215 = vector.shape_cast %214 : vector<8xf32> to vector<8x1xf32>
    %cst_131 = arith.constant 3.200000e+01 : f32
    %216 = vector.broadcast %cst_131 : f32 to vector<8x1xf32>
    %217 = arith.divf %215, %216 : vector<8x1xf32>
    %218 = vector.broadcast %217 : vector<8x1xf32> to vector<8x32xf32>
    %219 = arith.subf %213, %218 : vector<8x32xf32>
    %220 = arith.mulf %219, %219 : vector<8x32xf32>
    %cst_132 = arith.constant dense<0.000000e+00> : vector<8xf32>
    %221 = vector.multi_reduction <add>, %220, %cst_132 [1] : vector<8x32xf32> to vector<8xf32>
    %222 = vector.shape_cast %221 : vector<8xf32> to vector<8x1xf32>
    %cst_133 = arith.constant 3.200000e+01 : f32
    %223 = vector.broadcast %cst_133 : f32 to vector<8x1xf32>
    %224 = arith.divf %222, %223 : vector<8x1xf32>
    %cst_134 = arith.constant 9.99999974E-6 : f32
    %225 = vector.broadcast %cst_134 : f32 to vector<8x1xf32>
    %226 = arith.addf %224, %225 : vector<8x1xf32>
    %227 = math.rsqrt %226 : vector<8x1xf32>
    %228 = vector.broadcast %227 : vector<8x1xf32> to vector<8x32xf32>
    %229 = arith.mulf %219, %228 : vector<8x32xf32>
    %230 = vector.broadcast %175 : vector<1x32xf32> to vector<8x32xf32>
    %231 = arith.mulf %229, %230 : vector<8x32xf32>
    %232 = vector.broadcast %177 : vector<1x32xf32> to vector<8x32xf32>
    %233 = arith.addf %231, %232 : vector<8x32xf32>
    %c3 = arith.constant 3 : index
    %c0_135 = arith.constant 0 : index
    %c0_136 = arith.constant 0 : index
    %234 = vector.load %arg4[%c3, %c0_135, %c0_136] : memref<4x32x32xbf16, #tpu.memory_space<vmem>>, vector<1x32x32xbf16>
    %235 = vector.shape_cast %234 : vector<1x32x32xbf16> to vector<32x32xbf16>
    %c3_137 = arith.constant 3 : index
    %c0_138 = arith.constant 0 : index
    %c0_139 = arith.constant 0 : index
    %236 = vector.load %arg5[%c3_137, %c0_138, %c0_139] : memref<4x1x32xf32, #tpu.memory_space<vmem>>, vector<1x1x32xf32>
    %237 = vector.shape_cast %236 : vector<1x1x32xf32> to vector<1x32xf32>
    %c3_140 = arith.constant 3 : index
    %c0_141 = arith.constant 0 : index
    %c0_142 = arith.constant 0 : index
    %238 = vector.load %arg6[%c3_140, %c0_141, %c0_142] : memref<4x1x32xf32, #tpu.memory_space<vmem>>, vector<1x1x32xf32>
    %239 = vector.shape_cast %238 : vector<1x1x32xf32> to vector<1x32xf32>
    %c3_143 = arith.constant 3 : index
    %c0_144 = arith.constant 0 : index
    %c0_145 = arith.constant 0 : index
    %240 = vector.load %arg7[%c3_143, %c0_144, %c0_145] : memref<4x1x32xf32, #tpu.memory_space<vmem>>, vector<1x1x32xf32>
    %241 = vector.shape_cast %240 : vector<1x1x32xf32> to vector<1x32xf32>
    %c3_146 = arith.constant 3 : index
    %c0_147 = arith.constant 0 : index
    %c0_148 = arith.constant 0 : index
    %242 = vector.load %arg8[%c3_146, %c0_147, %c0_148] : memref<4x32x32xbf16, #tpu.memory_space<vmem>>, vector<1x32x32xbf16>
    %243 = vector.shape_cast %242 : vector<1x32x32xbf16> to vector<32x32xbf16>
    %c3_149 = arith.constant 3 : index
    %c0_150 = arith.constant 0 : index
    %c0_151 = arith.constant 0 : index
    %244 = vector.load %arg9[%c3_149, %c0_150, %c0_151] : memref<4x1x32xf32, #tpu.memory_space<vmem>>, vector<1x1x32xf32>
    %245 = vector.shape_cast %244 : vector<1x1x32xf32> to vector<1x32xf32>
    %c3_152 = arith.constant 3 : index
    %c0_153 = arith.constant 0 : index
    %c0_154 = arith.constant 0 : index
    %246 = vector.load %arg10[%c3_152, %c0_153, %c0_154] : memref<4x32x32xbf16, #tpu.memory_space<vmem>>, vector<1x32x32xbf16>
    %247 = vector.shape_cast %246 : vector<1x32x32xbf16> to vector<32x32xbf16>
    %c3_155 = arith.constant 3 : index
    %c0_156 = arith.constant 0 : index
    %c0_157 = arith.constant 0 : index
    %248 = vector.load %arg11[%c3_155, %c0_156, %c0_157] : memref<4x1x32xf32, #tpu.memory_space<vmem>>, vector<1x1x32xf32>
    %249 = vector.shape_cast %248 : vector<1x1x32xf32> to vector<1x32xf32>
    %c3_158 = arith.constant 3 : index
    %c0_159 = arith.constant 0 : index
    %c0_160 = arith.constant 0 : index
    %250 = vector.load %arg12[%c3_158, %c0_159, %c0_160] : memref<4x1x32xf32, #tpu.memory_space<vmem>>, vector<1x1x32xf32>
    %251 = vector.shape_cast %250 : vector<1x1x32xf32> to vector<1x32xf32>
    %c3_161 = arith.constant 3 : index
    %c0_162 = arith.constant 0 : index
    %c0_163 = arith.constant 0 : index
    %252 = vector.load %arg13[%c3_161, %c0_162, %c0_163] : memref<4x1x32xf32, #tpu.memory_space<vmem>>, vector<1x1x32xf32>
    %253 = vector.shape_cast %252 : vector<1x1x32xf32> to vector<1x32xf32>
    %254 = arith.truncf %233 : vector<8x32xf32> to vector<8x32xbf16>
    %cst_164 = arith.constant dense<0.000000e+00> : vector<8x32xf32>
    %255 = tpu.matmul %254, %235, %cst_164 {dimension_numbers = #tpu.dot_dimension_numbers<[1], [0], [0], [1], [0, 0, 1, 1], [], []>} : vector<8x32xbf16>, vector<32x32xbf16>, vector<8x32xf32> -> vector<8x32xf32>
    %256 = vector.broadcast %237 : vector<1x32xf32> to vector<8x32xf32>
    %257 = arith.addf %255, %256 : vector<8x32xf32>
    %258 = arith.addf %233, %257 : vector<8x32xf32>
    %cst_165 = arith.constant dense<0.000000e+00> : vector<8xf32>
    %259 = vector.multi_reduction <add>, %258, %cst_165 [1] : vector<8x32xf32> to vector<8xf32>
    %260 = vector.shape_cast %259 : vector<8xf32> to vector<8x1xf32>
    %cst_166 = arith.constant 3.200000e+01 : f32
    %261 = vector.broadcast %cst_166 : f32 to vector<8x1xf32>
    %262 = arith.divf %260, %261 : vector<8x1xf32>
    %263 = vector.broadcast %262 : vector<8x1xf32> to vector<8x32xf32>
    %264 = arith.subf %258, %263 : vector<8x32xf32>
    %265 = arith.mulf %264, %264 : vector<8x32xf32>
    %cst_167 = arith.constant dense<0.000000e+00> : vector<8xf32>
    %266 = vector.multi_reduction <add>, %265, %cst_167 [1] : vector<8x32xf32> to vector<8xf32>
    %267 = vector.shape_cast %266 : vector<8xf32> to vector<8x1xf32>
    %cst_168 = arith.constant 3.200000e+01 : f32
    %268 = vector.broadcast %cst_168 : f32 to vector<8x1xf32>
    %269 = arith.divf %267, %268 : vector<8x1xf32>
    %cst_169 = arith.constant 9.99999974E-6 : f32
    %270 = vector.broadcast %cst_169 : f32 to vector<8x1xf32>
    %271 = arith.addf %269, %270 : vector<8x1xf32>
    %272 = math.rsqrt %271 : vector<8x1xf32>
    %273 = vector.broadcast %272 : vector<8x1xf32> to vector<8x32xf32>
    %274 = arith.mulf %264, %273 : vector<8x32xf32>
    %275 = vector.broadcast %239 : vector<1x32xf32> to vector<8x32xf32>
    %276 = arith.mulf %274, %275 : vector<8x32xf32>
    %277 = vector.broadcast %241 : vector<1x32xf32> to vector<8x32xf32>
    %278 = arith.addf %276, %277 : vector<8x32xf32>
    %279 = arith.truncf %278 : vector<8x32xf32> to vector<8x32xbf16>
    %cst_170 = arith.constant dense<0.000000e+00> : vector<8x32xf32>
    %280 = tpu.matmul %279, %243, %cst_170 {dimension_numbers = #tpu.dot_dimension_numbers<[1], [0], [0], [1], [0, 0, 1, 1], [], []>} : vector<8x32xbf16>, vector<32x32xbf16>, vector<8x32xf32> -> vector<8x32xf32>
    %281 = vector.broadcast %245 : vector<1x32xf32> to vector<8x32xf32>
    %282 = arith.addf %280, %281 : vector<8x32xf32>
    %cst_171 = arith.constant 0.000000e+00 : f32
    %283 = vector.broadcast %cst_171 : f32 to vector<8x32xf32>
    %284 = arith.maximumf %282, %283 : vector<8x32xf32>
    %285 = arith.truncf %284 : vector<8x32xf32> to vector<8x32xbf16>
    %cst_172 = arith.constant dense<0.000000e+00> : vector<8x32xf32>
    %286 = tpu.matmul %285, %247, %cst_172 {dimension_numbers = #tpu.dot_dimension_numbers<[1], [0], [0], [1], [0, 0, 1, 1], [], []>} : vector<8x32xbf16>, vector<32x32xbf16>, vector<8x32xf32> -> vector<8x32xf32>
    %287 = vector.broadcast %249 : vector<1x32xf32> to vector<8x32xf32>
    %288 = arith.addf %286, %287 : vector<8x32xf32>
    %289 = arith.addf %278, %288 : vector<8x32xf32>
    %cst_173 = arith.constant dense<0.000000e+00> : vector<8xf32>
    %290 = vector.multi_reduction <add>, %289, %cst_173 [1] : vector<8x32xf32> to vector<8xf32>
    %291 = vector.shape_cast %290 : vector<8xf32> to vector<8x1xf32>
    %cst_174 = arith.constant 3.200000e+01 : f32
    %292 = vector.broadcast %cst_174 : f32 to vector<8x1xf32>
    %293 = arith.divf %291, %292 : vector<8x1xf32>
    %294 = vector.broadcast %293 : vector<8x1xf32> to vector<8x32xf32>
    %295 = arith.subf %289, %294 : vector<8x32xf32>
    %296 = arith.mulf %295, %295 : vector<8x32xf32>
    %cst_175 = arith.constant dense<0.000000e+00> : vector<8xf32>
    %297 = vector.multi_reduction <add>, %296, %cst_175 [1] : vector<8x32xf32> to vector<8xf32>
    %298 = vector.shape_cast %297 : vector<8xf32> to vector<8x1xf32>
    %cst_176 = arith.constant 3.200000e+01 : f32
    %299 = vector.broadcast %cst_176 : f32 to vector<8x1xf32>
    %300 = arith.divf %298, %299 : vector<8x1xf32>
    %cst_177 = arith.constant 9.99999974E-6 : f32
    %301 = vector.broadcast %cst_177 : f32 to vector<8x1xf32>
    %302 = arith.addf %300, %301 : vector<8x1xf32>
    %303 = math.rsqrt %302 : vector<8x1xf32>
    %304 = vector.broadcast %303 : vector<8x1xf32> to vector<8x32xf32>
    %305 = arith.mulf %295, %304 : vector<8x32xf32>
    %306 = vector.broadcast %251 : vector<1x32xf32> to vector<8x32xf32>
    %307 = arith.mulf %305, %306 : vector<8x32xf32>
    %308 = vector.broadcast %253 : vector<1x32xf32> to vector<8x32xf32>
    %309 = arith.addf %307, %308 : vector<8x32xf32>
    %310 = arith.truncf %309 : vector<8x32xf32> to vector<8x32xbf16>
    %c0_178 = arith.constant 0 : index
    %c0_179 = arith.constant 0 : index
    %311 = vector.load %arg14[%c0_178, %c0_179] : memref<32x128xbf16, #tpu.memory_space<vmem>>, vector<32x128xbf16>
    %cst_180 = arith.constant dense<0.000000e+00> : vector<8x128xf32>
    %312 = tpu.matmul %310, %311, %cst_180 {dimension_numbers = #tpu.dot_dimension_numbers<[1], [0], [0], [1], [0, 0, 1, 1], [], []>} : vector<8x32xbf16>, vector<32x128xbf16>, vector<8x128xf32> -> vector<8x128xf32>
    %c0_181 = arith.constant 0 : index
    %c0_182 = arith.constant 0 : index
    %313 = vector.load %arg15[%c0_181, %c0_182] : memref<1x128xf32, #tpu.memory_space<vmem>>, vector<1x128xf32>
    %314 = vector.broadcast %313 : vector<1x128xf32> to vector<8x128xf32>
    %315 = arith.addf %312, %314 : vector<8x128xf32>
    %c0_183 = arith.constant 0 : index
    %c0_184 = arith.constant 0 : index
    %316 = vector.load %arg16[%c0_183, %c0_184] : memref<8x128xf32, #tpu.memory_space<vmem>>, vector<8x128xf32>
    tpu.vector_store %arg16[%c0_183, %c0_184], %315 {strides = array<i32>} : memref<8x128xf32, #tpu.memory_space<vmem>>, vector<8x128xf32>,
    return
  }
  func.func @transform_0(%arg0: i32) -> (i32, i32) {
    %c0_i32 = arith.constant 0 : i32
    %c0_i32_0 = arith.constant 0 : i32
    return %arg0, %c0_i32 : i32, i32
  }
  func.func @transform_1(%arg0: i32) -> (i32, i32) {
    %c0_i32 = arith.constant 0 : i32
    %c0_i32_0 = arith.constant 0 : i32
    %c0_i32_1 = arith.constant 0 : i32
    return %c0_i32, %c0_i32_0 : i32, i32
  }
  func.func @transform_2(%arg0: i32) -> (i32, i32) {
    %c0_i32 = arith.constant 0 : i32
    %c0_i32_0 = arith.constant 0 : i32
    %c0_i32_1 = arith.constant 0 : i32
    return %c0_i32, %c0_i32_0 : i32, i32
  }
  func.func @transform_3(%arg0: i32) -> (i32, i32, i32) {
    %c0_i32 = arith.constant 0 : i32
    %c0_i32_0 = arith.constant 0 : i32
    %c0_i32_1 = arith.constant 0 : i32
    %c0_i32_2 = arith.constant 0 : i32
    return %c0_i32, %c0_i32_0, %c0_i32_1 : i32, i32, i32
  }
  func.func @transform_4(%arg0: i32) -> (i32, i32, i32) {
    %c0_i32 = arith.constant 0 : i32
    %c0_i32_0 = arith.constant 0 : i32
    %c0_i32_1 = arith.constant 0 : i32
    %c0_i32_2 = arith.constant 0 : i32
    return %c0_i32, %c0_i32_0, %c0_i32_1 : i32, i32, i32
  }
  func.func @transform_5(%arg0: i32) -> (i32, i32, i32) {
    %c0_i32 = arith.constant 0 : i32
    %c0_i32_0 = arith.constant 0 : i32
    %c0_i32_1 = arith.constant 0 : i32
    %c0_i32_2 = arith.constant 0 : i32
    return %c0_i32, %c0_i32_0, %c0_i32_1 : i32, i32, i32
  }
  func.func @transform_6(%arg0: i32) -> (i32, i32, i32) {
    %c0_i32 = arith.constant 0 : i32
    %c0_i32_0 = arith.constant 0 : i32
    %c0_i32_1 = arith.constant 0 : i32
    %c0_i32_2 = arith.constant 0 : i32
    return %c0_i32, %c0_i32_0, %c0_i32_1 : i32, i32, i32
  }
  func.func @transform_7(%arg0: i32) -> (i32, i32, i32) {
    %c0_i32 = arith.constant 0 : i32
    %c0_i32_0 = arith.constant 0 : i32
    %c0_i32_1 = arith.constant 0 : i32
    %c0_i32_2 = arith.constant 0 : i32
    return %c0_i32, %c0_i32_0, %c0_i32_1 : i32, i32, i32
  }
  func.func @transform_8(%arg0: i32) -> (i32, i32, i32) {
    %c0_i32 = arith.constant 0 : i32
    %c0_i32_0 = arith.constant 0 : i32
    %c0_i32_1 = arith.constant 0 : i32
    %c0_i32_2 = arith.constant 0 : i32
    return %c0_i32, %c0_i32_0, %c0_i32_1 : i32, i32, i32
  }
  func.func @transform_9(%arg0: i32) -> (i32, i32, i32) {
    %c0_i32 = arith.constant 0 : i32
    %c0_i32_0 = arith.constant 0 : i32
    %c0_i32_1 = arith.constant 0 : i32
    %c0_i32_2 = arith.constant 0 : i32
    return %c0_i32, %c0_i32_0, %c0_i32_1 : i32, i32, i32
  }
  func.func @transform_10(%arg0: i32) -> (i32, i32, i32) {
    %c0_i32 = arith.constant 0 : i32
    %c0_i32_0 = arith.constant 0 : i32
    %c0_i32_1 = arith.constant 0 : i32
    %c0_i32_2 = arith.constant 0 : i32
    return %c0_i32, %c0_i32_0, %c0_i32_1 : i32, i32, i32
  }
  func.func @transform_11(%arg0: i32) -> (i32, i32, i32) {
    %c0_i32 = arith.constant 0 : i32
    %c0_i32_0 = arith.constant 0 : i32
    %c0_i32_1 = arith.constant 0 : i32
    %c0_i32_2 = arith.constant 0 : i32
    return %c0_i32, %c0_i32_0, %c0_i32_1 : i32, i32, i32
  }
  func.func @transform_12(%arg0: i32) -> (i32, i32, i32) {
    %c0_i32 = arith.constant 0 : i32
    %c0_i32_0 = arith.constant 0 : i32
    %c0_i32_1 = arith.constant 0 : i32
    %c0_i32_2 = arith.constant 0 : i32
    return %c0_i32, %c0_i32_0, %c0_i32_1 : i32, i32, i32
  }
  func.func @transform_13(%arg0: i32) -> (i32, i32) {
    %c0_i32 = arith.constant 0 : i32
    %c0_i32_0 = arith.constant 0 : i32
    %c0_i32_1 = arith.constant 0 : i32
    return %c0_i32, %c0_i32_0 : i32, i32
  }
  func.func @transform_14(%arg0: i32) -> (i32, i32) {
    %c0_i32 = arith.constant 0 : i32
    %c0_i32_0 = arith.constant 0 : i32
    %c0_i32_1 = arith.constant 0 : i32
    return %c0_i32, %c0_i32_0 : i32, i32
  }
  func.func @transform_15(%arg0: i32) -> (i32, i32) {
    %c0_i32 = arith.constant 0 : i32
    %c0_i32_0 = arith.constant 0 : i32
    return %arg0, %c0_i32 : i32, i32
  }
}

</mosaic_0001>

<bundles_post_ra>
// kernel: tpu_custom_call.1
= control target key start
LH: loop header
LB: loop body
LE: loop exit
PB: predicated region body
PF: predicated region fallthrough
CT: control target
= control target key end

     0   :  { %s2966_s0 = inlined_call_operand.hbm [shape: bf16[16,16], index: 0, kind: input, shape index: {}]   ;;  %s2967_s1 = inlined_call_operand.hbm [shape: bf16[16,32], index: 1, kind: input, shape index: {}]   ;;  %s2968_s2 = inlined_call_operand.hbm [shape: f32[1,32], index: 2, kind: input, shape index: {}]   ;;  %s2969_s3 = inlined_call_operand.hbm [shape: bf16[4,32,32], index: 3, kind: input, shape index: {}]   ;;  %s2970_s4 = inlined_call_operand.hbm [shape: f32[4,1,32], index: 4, kind: input, shape index: {}]   ;;  %s2971_s5 = inlined_call_operand.vmem [shape: f32[4,1,32], index: 5, kind: input, shape index: {}]   ;;  %s2972_s6 = inlined_call_operand.hbm [shape: f32[4,1,32], index: 6, kind: input, shape index: {}]   ;;  %s2973_s7 = inlined_call_operand.hbm [shape: bf16[4,32,32], index: 7, kind: input, shape index: {}]   ;;  %s2974_s8 = inlined_call_operand.hbm [shape: f32[4,1,32], index: 8, kind: input, shape index: {}]   ;;  %s2975_s9 = inlined_call_operand.hbm [shape: bf16[4,32,32], index: 9, kind: input, shape index: {}]   ;;  %s2976_s10 = inlined_call_operand.vmem [shape: f32[4,1,32], index: 10, kind: input, shape index: {}]   ;;  %s2977_s11 = inlined_call_operand.hbm [shape: f32[4,1,32], index: 11, kind: input, shape index: {}]   ;;  %s2978_s12 = inlined_call_operand.hbm [shape: f32[4,1,32], index: 12, kind: input, shape index: {}]   ;;  %s2979_s13 = inlined_call_operand.hbm [shape: bf16[32,128], index: 13, kind: input, shape index: {}]   ;;  %s2980_s14 = inlined_call_operand.vmem [shape: f32[1,128], index: 14, kind: input, shape index: {}]   ;;  %s2981_s15 = inlined_call_operand.hbm [shape: f32[16,128], index: 15, kind: output, shape index: {}]  }
   0x1   :  { %2990 = sst [smem:[#allocation31_spill]] %s2966_s0 }
   0x2   :  { %2991 = sst [smem:[#allocation32_spill]] %s2967_s1 }
   0x3   :  { %2992 = sst [smem:[#allocation33_spill]] %s2968_s2 }
   0x4   :  { %2993 = sst [smem:[#allocation34_spill]] %s2969_s3 }
   0x5   :  { %2994 = sst [smem:[#allocation35_spill]] %s2970_s4 }
   0x6   :  { %2995 = sst [smem:[#allocation36_spill]] %s2971_s5 }
   0x7   :  { %2996 = sst [smem:[#allocation37_spill]] %s2972_s6 }
   0x8   :  { %2997 = sst [smem:[#allocation38_spill]] %s2976_s10 }
   0x9   :  { %2998 = sst [smem:[#allocation39_spill]] %s2980_s14 }
   0xa   :  { %2999 = sst [smem:[#allocation40_spill]] %s2981_s15 }
   0xb   :  { %20 = vsyncpa [#allocation3], 0 }
   0xc   :  { %22 = vsyncpa [#allocation3 + $0x1], 0 }
   0xd   :  { %23 = vsyncpa [#allocation6], 0 }
   0xe   :  { %24 = vsyncpa [#allocation9], 0 }
   0xf   :  { %25 = vsyncpa [#allocation12], 0 }
  0x10   :  { %26 = vsyncpa [#allocation15], 0 }
  0x11   :  { %27 = vsyncpa [#allocation18], 0 }
  0x12   :  { %28 = vsyncpa [#allocation21], 0 }
  0x13   :  { %29 = vsyncpa [#allocation4], 0 }
  0x14   :  { %31 = vsyncpa [#allocation4 + $0x1], 0  ;;  %s2649_s18 = smov 0   ;;  %s2651_s19 = smov 0  }
  0x15   :  { %s2653_s20 = smov 0   ;;  %s2655_s21 = smov 0  }
  0x16 LB: > { %s3000_s1 = sld [smem:[#allocation32_spill]]  ;;  %s2673_s25 = sadd.s32 4294967295, %s2551_s21   ;;  %s2551_s21 = sphi %s2655_s21, %s3022_s21   ;;  %s2547_s20 = sphi %s2653_s20, %s3021_s20   ;;  %s2543_s19 = sphi %s2651_s19, %s3020_s19   ;;  %s2539_s18 = sphi %s2649_s18, %s3019_s18  }
  0x17   : > { %p1703_p0 = scmp.ge.s32.totalorder %s2551_s21, 1  ;;  %p58_p1 = scmp.eq.s32.totalorder %s2673_s25, 0 }
  0x18   : > { %p388_p2 = scmp.lt.s32.totalorder %s2551_s21, 3  ;;  %s2553_s27 = smov [#allocation5]  }
  0x19   : > { %s401_s28 = sshll.u32 %s2553_s27, 4  ;;  %s3002_s3 = sld [smem:[#allocation34_spill]]  ;;  %s402_s28 = int_to_ptr.vmem [resolvable:$true] %s401_s28 }
  0x1a   : > { %p2678_p3 = pnand %p1703_p0, %p388_p2  ;;  %s2554_s22 = smov [#allocation8]  }
  0x1b   : > { %s427_s23 = sshll.u32 %s2554_s22, 4  ;;  %s2985_s27 = smov 64   ;;  %s428_s23 = int_to_ptr.vmem [resolvable:$true] %s427_s23 }
  0x1c   : > { %s399_s24 = sshll.u32 %s3000_s1, 4  ;;  %p1939_p4 = pneg %p2678_p3  ;;  %s400_s24 = int_to_ptr.hbm [resolvable:$true] %s399_s24 }
  0x1d   : > { %s2987_s1 = smov 4   ;;  %s3004_s6 = sld [smem:[#allocation37_spill]] }
  0x1e   : > { %p2690_p6 = pnand %p1939_p4, %p58_p1  ;;  %s2557_s22 = smov [#allocation11]  }
  0x1f   : > { %s425_s16 = sshll.u32 %s3002_s3, 4  ;;  %s458_s14 = sshll.u32 %s2557_s22, 4  ;;  %s426_s16 = int_to_ptr.hbm [resolvable:$true] %s425_s16  ;;  %s459_s14 = int_to_ptr.vmem [resolvable:$true] %s458_s14 }
  0x20   : > { %1942 = dma.hbm_to_vmem [thread:$0]  (!%p2690_p6), %s400_s24, 128, %s402_s28, [#allocation6], %s2985_s27, %s2985_s27, %s2987_s1  }
  0x21   : > { %1948 = dma.hbm_to_vmem [thread:$0]  (!%p2690_p6), %s426_s16, 1024, %s428_s23, [#allocation9], %s2985_s27, %s2985_s27, %s2987_s1  }
  0x22   : > { %s484_s5 = sshll.u32 %s2974_s8, 4  ;;  %s2558_s24 = smov 16   ;;  %s485_s5 = int_to_ptr.hbm [resolvable:$true] %s484_s5 }
  0x23   : > { %s456_s3 = sshll.u32 %s3004_s6, 4  ;;  %s2559_s28 = smov 1   ;;  %s457_s3 = int_to_ptr.hbm [resolvable:$true] %s456_s3 }
  0x24   : > { %1954 = dma.hbm_to_vmem [thread:$0]  (!%p2690_p6), %s457_s3, 64, %s459_s14, [#allocation12], %s2558_s24, %s2558_s24, %s2559_s28  }
  0x25   : > { %s2560_s16 = smov [#allocation14]   ;;  %s515_s22 = sshll.u32 %s2977_s11, 4  ;;  %s516_s22 = int_to_ptr.hbm [resolvable:$true] %s515_s22 }
  0x26   : > { %s486_s23 = sshll.u32 %s2560_s16, 4  ;;  %s3005_s2 = sld [smem:[#allocation33_spill]]  ;;  %s487_s23 = int_to_ptr.vmem [resolvable:$true] %s486_s23 }
  0x27   : > { %1960 = dma.hbm_to_vmem [thread:$0]  (!%p2690_p6), %s485_s5, 64, %s487_s23, [#allocation15], %s2558_s24, %s2558_s24, %s2559_s28  }
  0x28   : > { %s2561_s3 = smov [#allocation17]   ;;  %s2562_s16 = smov [#allocation7]  }
  0x29   : > { %s517_s14 = sshll.u32 %s2561_s3, 4  ;;  %s416_s29 = sshll.u32 %s2562_s16, 4  ;;  %s518_s14 = int_to_ptr.vmem [resolvable:$true] %s517_s14  ;;  %s417_s29 = int_to_ptr.vmem [resolvable:$true] %s416_s29 }
  0x2a   : > { %1966 = dma.hbm_to_vmem [thread:$0]  (!%p2690_p6), %s516_s22, 64, %s518_s14, [#allocation18], %s2558_s24, %s2558_s24, %s2559_s28  }
  0x2b   : > { %s3006_s4 = sld [smem:[#allocation35_spill]]  ;;  %s470_s15 = sshll.u32 %s2973_s7, 4  ;;  %s471_s15 = int_to_ptr.hbm [resolvable:$true] %s470_s15 }
  0x2c   : > { %s414_s27 = sshll.u32 %s3005_s2, 4  ;;  %s2563_s3 = smov [#allocation10]   ;;  %s415_s27 = int_to_ptr.hbm [resolvable:$true] %s414_s27 }
  0x2d   : > { %1945 = dma.hbm_to_vmem [thread:$0]  (!%p2690_p6), %s415_s27, 16, %s417_s29, [#allocation6]  }
  0x2e   : > { %s441_s2 = sshll.u32 %s2563_s3, 4  ;;  %s2564_s1 = smov [#allocation13]   ;;  %s442_s2 = int_to_ptr.vmem [resolvable:$true] %s441_s2 }
  0x2f   : > { %s472_s22 = sshll.u32 %s2564_s1, 4  ;;  %s498_s27 = sshll.u32 %s2975_s9, 4  ;;  %s473_s22 = int_to_ptr.vmem [resolvable:$true] %s472_s22  ;;  %s499_s27 = int_to_ptr.hbm [resolvable:$true] %s498_s27 }
  0x30   : > { %s3007_s29 = smov 4   ;;  %s3008_s30 = smov 64  }
  0x31   : > { %s439_s5 = sshll.u32 %s3006_s4, 4  ;;  %s529_s3 = sshll.u32 %s2978_s12, 4  ;;  %s440_s5 = int_to_ptr.hbm [resolvable:$true] %s439_s5  ;;  %s530_s3 = int_to_ptr.hbm [resolvable:$true] %s529_s3 }
  0x32   : > { %1951 = dma.hbm_to_vmem [thread:$0]  (!%p2690_p6), %s440_s5, 64, %s442_s2, [#allocation9], %s2558_s24, %s2558_s24, %s2559_s28  }
  0x33   : > { %1957 = dma.hbm_to_vmem [thread:$0]  (!%p2690_p6), %s471_s15, 1024, %s473_s22, [#allocation12], %s3008_s30, %s3008_s30, %s3007_s29  }
  0x34   : > { %s2565_s2 = smov [#allocation16]   ;;  %s2566_s15 = smov [#allocation19]  }
  0x35   : > { %s500_s5 = sshll.u32 %s2565_s2, 4  ;;  %s531_s1 = sshll.u32 %s2566_s15, 4  ;;  %s501_s5 = int_to_ptr.vmem [resolvable:$true] %s500_s5  ;;  %s532_s1 = int_to_ptr.vmem [resolvable:$true] %s531_s1 }
  0x36   : > { %1963 = dma.hbm_to_vmem [thread:$0]  (!%p2690_p6), %s499_s27, 1024, %s501_s5, [#allocation15], %s3008_s30, %s3008_s30, %s3007_s29  }
  0x37   : > { %s543_s16 = sshll.u32 %s2979_s13, 4  ;;  %s2567_s27 = smov [#allocation20]   ;;  %s544_s16 = int_to_ptr.hbm [resolvable:$true] %s543_s16 }
  0x38   : > { %1969 = dma.hbm_to_vmem [thread:$0]  (!%p2690_p6), %s530_s3, 64, %s532_s1, [#allocation18], %s2558_s24, %s2558_s24, %s2559_s28  }
  0x39   : > { %s545_s23 = sshll.u32 %s2567_s27, 4  ;;  %s1702_s10 = sadd.s32 4294967294, %s2551_s21   ;;  %s546_s23 = int_to_ptr.vmem [resolvable:$true] %s545_s23 }
  0x3a   : > { %1972 = dma.hbm_to_vmem [thread:$0]  (!%p2690_p6), %s544_s16, 256, %s546_s23, [#allocation21], %s3008_s30, %s3008_s30, %s3007_s29  }
  0x3b   : > { %s2775_s2 = sadd.s32 1, %s2551_s21   ;;  %s44_s5 = sadd.s32 1, %s2547_s20 }
  0x3c   : > { %s41_s15 = ssub.s32 %s2551_s21, %s2775_s2  ;;  %p51_p7 = scmp.ne.s32.totalorder %s2547_s20, %s2543_s19 }
  0x3d   : > { %p42_p8 = scmp.eq.s32.totalorder %s41_s15, 0  ;;  %p52_p9 = scmp.eq.s32.totalorder %s2551_s21, 0 }
  0x3e   : > { %p57_p10 = scmp.ne.s32.totalorder %s2543_s19, %s2539_s18  ;;  %p375_p11 = scmp.eq.s32.totalorder %s2673_s25, 1 }
  0x3f   : > { %s2787_s24 = scalar_select %p42_p8, %s2547_s20, %s44_s5  }
  0x40   : > { %p2791_p12 = por %p58_p1, %p57_p10  ;;  %p2795_p13 = por %p375_p11, %p51_p7 }
  0x41   : > { %p381_p0 = scmp.eq.s32.totalorder %s1702_s10, 1  ;;  %p53_p2 = por %p52_p9, %p51_p7 }
  0x42   : > { %s562_s29 = sand.u32 1, %s2547_s20   ;;  %p1992_p6 = scmp.lt.s32.totalorder %s2551_s21, 2 }
  0x43   : > { %p2800_p4 = por %p381_p0, %p57_p10  ;;  %s1716_s3 = sshll.u32 %s562_s29, 2 }
  0x44   : > { %s1717_s1 = sshll.u32 %s2551_s21, 2  ;;  %s3012_s0 = sld [smem:[#allocation31_spill]] }
  0x45   : > { %s566_s23 = scalar_lea.vmem [#allocation2], %s1716_s3  ;;  %p2809_p8 = pnand %p1992_p6, %p53_p2 }
  0x46   : > { %s574_s5 = sshll.u32 %s566_s23, 4  ;;  %s563_s15 = scalar_lea.sflag [#allocation3], %s562_s29  ;;  %s575_s5 = int_to_ptr.vmem [resolvable:$true] %s574_s5 }
  0x47   : > { %p2435_p9 = pneg %p2809_p8 }
  0x4a   : > { %s570_s16 = scalar_lea.hbm %s3012_s0, %s1717_s1  ;;  %s2438_s3 = scalar_lea.hbm %s3012_s0, 8 }
  0x4b   : > { %s572_s27 = sshll.u32 %s570_s16, 4  ;;  %s573_s27 = int_to_ptr.hbm [resolvable:$true] %s572_s27 }
  0x4c   : > { %s2431_s4 = sshra.s32 %s573_s27, 4  ;;  %s2432_s4 = int_to_ptr.hbm [resolvable:$true] %s2431_s4 }
  0x4d   : > { %s2433_s6 = scalar_lea.hbm %s2432_s4, 4  ;;  %p2439_p0 = scmp.lt.s32.totalorder %s2432_s4, %s3012_s0 }
  0x4e   : > { %p2434_p7 = scmp.ne.s32.totalorder %s2432_s4, %s2433_s6  ;;  %p2440_p2 = scmp.lt.s32.totalorder %s2438_s3, %s2433_s6 }
  0x50   : > { %p2436_p10 = pnand %p2435_p9, %p2434_p7  ;;  %p2441_p6 = por %p2440_p2, %p2439_p0 }
  0x52   : > { %p2437_p11 = pneg %p2436_p10 }
  0x54   : > { %p2442_p5 = pnand %p2441_p6, %p2437_p11 }
  0x56   : > { %2445 = shalt.err (!%p2442_p5)
}
  0x57   : > { %1976 = dma.hbm_to_vmem [thread:$0]  (!%p2809_p8), %s573_s27, 64, %s575_s5, %s563_s15  }
  0x58   : > { %583 = sbr.rel (%p2678_p3) target bundleno = 4138 (0x102a), region = 80  ;;  %s2826_s29 = sand.u32 (!%p2678_p3), 1, %s2543_s19  }
  0x59   : > { %s1719_s23 = sshll.u32 (!%p2678_p3), %s2826_s29, 2  ;;  %s586_s1 = scalar_lea.sflag (!%p2678_p3), [#allocation3], %s2826_s29 }
  0x5a   : > { %s589_s22 = scalar_lea.vmem (!%p2678_p3), [#allocation2], %s1719_s23 }
  0x5d   : > { %2506 = dma.done.wait (%p2791_p12), %s586_s1, 64  }
  0x5e   : > { %2508 = vsyncadd (%p2791_p12), %s586_s1, 4294967232 }
  0x5f   : > { %2510 = dma.done.wait (%p58_p1), [#allocation6], 144  }
  0x60   : > { %2512 = vsyncadd (%p58_p1), [#allocation6], 4294967152 }
  0x61   : > { %2514 = dma.done.wait (%p58_p1), [#allocation9], 1088  }
  0x62   : > { %2516 = vsyncadd (%p58_p1), [#allocation9], 4294966208 }
  0x63   : > { %2518 = dma.done.wait (%p58_p1), [#allocation12], 1088  }
  0x64   : > { %2520 = vsyncadd (%p58_p1), [#allocation12], 4294966208 }
  0x65   : > { %2522 = dma.done.wait (%p58_p1), [#allocation15], 1088  }
  0x66   : > { %2524 = vsyncadd (%p58_p1), [#allocation15], 4294966208 }
  0x67   : > { %2526 = dma.done.wait (%p58_p1), [#allocation18], 128  }
  0x68   : > { %2528 = vsyncadd (%p58_p1), [#allocation18], 4294967168 }
  0x69   : > { %2530 = dma.done.wait (%p58_p1), [#allocation21], 256  }
  0x6a   : > { %2532 = vsyncadd (%p58_p1), [#allocation21], 4294967040  ;;  %v1864_v0 = vld [vmem:[#allocation5] sm:$0xff]  ;;  %vm706_vm0 = vcmask 130048   ;;  %v1866_v1 = vld [vmem:[#allocation8 + $0x8] sm:$0xff]  ;;  %vm758_vm1 = vcmask 261120  }
  0x6b   : > { %v693_v2 = vld [vmem:[%s589_s22] sm:$0xf]  ;;  %717 = vmatpush.bf16.msra.mxu0 %v1864_v0  ;;  %768 = vmatpush.bf16.msra.mxu1 %v1866_v1  ;;  %v1865_v3 = vld [vmem:[#allocation8] sm:$0xff]  ;;  %v2053_v4 = vld [vmem:[#allocation7] ss:$0 sm:$0xff]  ;;  %v2568_v15 = vmov 32.0  }
  0x6c   : > { %v2054_v9 = vld [vmem:[#allocation10] ss:$0 sm:$0xff]  ;;  %2083 = vrcp.f32 %v2568_v15  ;;  %v1868_v27 = vld [vmem:[#allocation13 + $0x8] sm:$0xff]  ;;  %v1867_v28 = vld [vmem:[#allocation13] sm:$0xff]  ;;  %s3014_s26 = sld [smem:[#allocation36_spill]]  ;;  %s1861_s10 = sshll.u32 %s2673_s25, 3 }
  0x6d   : > { %838 = vmatpush.bf16.msra.mxu2 %v1868_v27  ;;  %v2056_v41 = vld [vmem:[#allocation11] ss:$0 sm:$0xff]  ;;  %v1870_v45 = vld [vmem:[#allocation16 + $0x8] sm:$0xff]  ;;  %v1869_v46 = vld [vmem:[#allocation16] sm:$0xff]  ;;  %s3015_s5 = sld [smem:[#allocation38_spill]]  ;;  %s1731_s15 = sshll.u32 %s2826_s29, 3 }
  0x6e   : > { %1736 = vmatmul.msk.bf16.vlgmr.msra.gmra.mxu0 %vm706_vm0, %v693_v2  ;;  %871 = vmatpush.bf16.msra.mxu3 %v1870_v45  ;;  %v2057_v47 = vld [vmem:[#allocation14] ss:$0 sm:$0xff]  ;;  %v1872_v0 = vld [vmem:[#allocation8 + $0x18] sm:$0xff]  ;;  %v1871_v1 = vld [vmem:[#allocation8 + $0x10] sm:$0xff]  ;;  %s3016_s16 = sld [smem:[#allocation40_spill]]  ;;  %s691_s6 = scalar_lea.vmem [#allocation22], %s1731_s15 }
  0x6f   : > { %769 = vmatpush.bf16.msra.mxu1 %v1865_v3  ;;  %963 = vmatpush.bf16.msrb.mxu0 %v1872_v0  ;;  %s3017_s4 = sld [smem:[#allocation39_spill]]  ;;  %s1524_s17 = sshll.u32 %s691_s6, 4  ;;  %s1525_s17 = int_to_ptr.vmem [resolvable:$true] %s1524_s17 }
  0x70   : > { %s1512_s0 = scalar_lea.sflag [#allocation4], %s2826_s29 }
  0x71   : > { %839 = vmatpush.bf16.msra.mxu2 %v1867_v28 }
  0x72   : > { %v2084_v16 = vpop.eup %2083  ;;  %v2055_v38 = vld [vmem:[%s3014_s26] ss:$0 sm:$0xff]  ;;  %872 = vmatpush.bf16.msra.mxu3 %v1869_v46  ;;  %v2063_v46 = vld [vmem:[#allocation11 + $0x1] ss:$0 sm:$0xff] }
  0x73   : > { %v780_v17 = vmul.f32 32.0, %v2084_v16  ;;  %vm784_vm2 = vweird.f32 %v2084_v16  ;;  %v2058_v53 = vld [vmem:[%s3015_s5] ss:$0 sm:$0xff]  ;;  %964 = vmatpush.bf16.msrb.mxu0 %v1871_v1 }
  0x74   : > { %s1522_s23 = scalar_lea.hbm %s3016_s16, %s1861_s10  ;;  %s2481_s14 = scalar_lea.hbm %s3016_s16, 16 }
  0x75   : > { %v781_v18 = vsub.f32 1.0, %v780_v17  ;;  %s1526_s27 = sshll.u32 %s1522_s23, 4  ;;  %s1527_s27 = int_to_ptr.hbm [resolvable:$true] %s1526_s27 }
  0x76   : > { %s2475_s25 = sshra.s32 %s1527_s27, 4  ;;  %s2476_s25 = int_to_ptr.hbm [resolvable:$true] %s2475_s25 }
  0x77   : > { %v782_v19 = vmul.f32 %v2084_v16, %v781_v18  ;;  %v2061_v18 = vld [vmem:[#allocation10 + $0x1] ss:$0 sm:$0xff]  ;;  %p2482_p12 = scmp.lt.s32.totalorder %s2476_s25, %s3016_s16 }
  0x79   : > { %v783_v20 = vadd.f32 %v2084_v16, %v782_v19 }
  0x7b   : > { %v2860_v21 = vsel %vm784_vm2, %v2084_v16, %v783_v20 }
  0xeb   : > { %v719_v5 = vpop.f32.mrf.mxu0 }
  0xec   : > { %v720_v6 = vadd.f32 %v2053_v4, %v719_v5 }
  0xee   : > { %v742_v7 = vpack.c.bf16 %v720_v6, %v720_v6 }
  0xf0   : > { %1745 = vmatmul.msk.bf16.vlgmr.msra.gmra.mxu1 %vm758_vm1, %v742_v7 }
  0xf3   : > { %v721_v8 = vpop.f32.mrf.mxu0 }
 0x16d   : > { %v771_v10 = vpop.f32.mrf.mxu1 }
 0x16e   : > { %v772_v11 = vadd.f32 %v2054_v9, %v771_v10 }
 0x170   : > { %v775_v12 = vadd.f32 %v772_v11, %v720_v6  ;;  %v2059_v11 = vld [vmem:[#allocation17] ss:$0 sm:$0xff] }
 0x172   : > { %v776_v13 = vsel %vm758_vm1, %v775_v12, 0.0 }
 0x173   : > { %777 = vadd.xlane.f32.xlu0 %v776_v13 }
 0x175   : > { %v773_v14 = vpop.f32.mrf.mxu1 }
 0x176   : > { %v2060_v14 = vld [vmem:[#allocation19] ss:$0 sm:$0xff] }
 0x1e6   : > { %v778_v22 = vpop.xlane.xlu0 %777 }
 0x1e7   : > { %v786_v23 = vmul.f32 %v2860_v21, %v778_v22 }
 0x1e9   : > { %v787_v24 = vsub.f32 %v775_v12, %v786_v23 }
 0x1eb   : > { %v788_v25 = vmul.f32 %v787_v24, %v787_v24 }
 0x1ed   : > { %v789_v26 = vsel %vm758_vm1, %v788_v25, 0.0 }
 0x1ee   : > { %790 = vadd.xlane.f32.xlu0 %v789_v26 }
 0x261   : > { %v791_v29 = vpop.xlane.xlu0 %790 }
 0x262   : > { %v792_v30 = vmul.f32 %v791_v29, %v2860_v21 }
 0x264   : > { %v793_v31 = vadd.f32 1e-05, %v792_v30  ;;  %v1874_v30 = vld [vmem:[#allocation13 + $0x18] sm:$0xff] }
 0x265   : > { %1026 = vmatpush.bf16.msrb.mxu1 %v1874_v30 }
 0x266   : > { %2085 = vrsqrt.f32 %v793_v31  ;;  %vm800_vm4 = vweird.f32 %v793_v31 }
 0x26c   : > { %v2086_v32 = vpop.eup %2085 }
 0x26d   : > { %v795_v33 = vmul.f32 %v2086_v32, %v793_v31  ;;  %vm801_vm3 = vweird.f32 %v2086_v32  ;;  %v1873_v31 = vld [vmem:[#allocation13 + $0x10] sm:$0xff] }
 0x26e   : > { %vm802_vm5 = vmor %vm800_vm4, %vm801_vm3  ;;  %1027 = vmatpush.bf16.msrb.mxu1 %v1873_v31 }
 0x26f   : > { %v796_v34 = vmul.f32 %v2086_v32, %v795_v33 }
 0x271   : > { %v797_v35 = vmul.f32 0.5, %v796_v34 }
 0x273   : > { %v798_v36 = vsub.f32 1.5, %v797_v35  ;;  %v1875_v35 = vld [vmem:[#allocation16 + $0x10] sm:$0xff] }
 0x275   : > { %v799_v37 = vmul.f32 %v2086_v32, %v798_v36 }
 0x277   : > { %v803_v39 = vsel %vm802_vm5, %v2086_v32, %v799_v37  ;;  %v1876_v32 = vld [vmem:[#allocation16 + $0x18] sm:$0xff] }
 0x278   : > { %v804_v40 = vmul.f32 %v803_v39, %v787_v24  ;;  %1059 = vmatpush.bf16.msrb.mxu2 %v1876_v32 }
 0x27a   : > { %v808_v42 = vmul.f32 %v2055_v38, %v804_v40 }
 0x27c   : > { %v812_v43 = vadd.f32 %v2056_v41, %v808_v42  ;;  %1060 = vmatpush.bf16.msrb.mxu2 %v1875_v35  ;;  %v1882_v35 = vld [vmem:[#allocation16 + $0x28] sm:$0xff] }
 0x27d   : > { %1247 = vmatpush.bf16.msra.mxu1 %v1882_v35 }
 0x27e   : > { %v813_v44 = vpack.c.bf16 %v812_v43, %v812_v43 }
 0x280   : > { %1754 = vmatmul.msk.bf16.vlgmr.msra.gmra.mxu2 %vm758_vm1, %v813_v44 }
 0x303   : > { %v841_v48 = vpop.f32.mrf.mxu2 }
 0x304   : > { %v842_v49 = vadd.f32 %v2057_v47, %v841_v48 }
 0x306   : > { %v845_v50 = vmax.f32 %v842_v49, 0.0 }
 0x308   : > { %v846_v51 = vpack.c.bf16 %v845_v50, %v845_v50  ;;  %v2064_v50 = vld [vmem:[#allocation14 + $0x1] ss:$0 sm:$0xff] }
 0x30a   : > { %1763 = vmatmul.msk.bf16.vlgmr.msra.gmra.mxu3 %vm758_vm1, %v846_v51 }
 0x30b   : > { %v843_v52 = vpop.f32.mrf.mxu2 }
 0x38d   : > { %v874_v54 = vpop.f32.mrf.mxu3 }
 0x38e   : > { %v875_v55 = vadd.f32 %v2058_v53, %v874_v54 }
 0x390   : > { %v878_v56 = vadd.f32 %v875_v55, %v812_v43  ;;  %v2062_v43 = vld [vmem:[%s3014_s26 + $0x1] ss:$0 sm:$0xff] }
 0x392   : > { %v879_v57 = vsel %vm758_vm1, %v878_v56, 0.0 }
 0x393   : > { %880 = vadd.xlane.f32.xlu1 %v879_v57 }
 0x395   : > { %v876_v58 = vpop.f32.mrf.mxu3 }
 0x406   : > { %v881_v59 = vpop.xlane.xlu1 %880 }
 0x407   : > { %v882_v60 = vmul.f32 %v881_v59, %v2860_v21 }
 0x409   : > { %v883_v61 = vsub.f32 %v878_v56, %v882_v60  ;;  %v2065_v56 = vld [vmem:[%s3015_s5 + $0x1] ss:$0 sm:$0xff] }
 0x40b   : > { %v884_v62 = vmul.f32 %v883_v61, %v883_v61 }
 0x40d   : > { %v885_v63 = vsel %vm758_vm1, %v884_v62, 0.0 }
 0x40e   : > { %886 = vadd.xlane.f32.xlu1 %v885_v63 }
 0x481   : > { %v887_v2 = vpop.xlane.xlu1 %886 }
 0x482   : > { %v888_v3 = vmul.f32 %v887_v2, %v2860_v21 }
 0x484   : > { %v889_v4 = vadd.f32 1e-05, %v888_v3  ;;  %v1878_v3 = vld [vmem:[#allocation8 + $0x28] sm:$0xff] }
 0x485   : > { %1151 = vmatpush.bf16.msrb.mxu3 %v1878_v3 }
 0x486   : > { %2087 = vrsqrt.f32 %v889_v4  ;;  %vm896_vm7 = vweird.f32 %v889_v4 }
 0x48c   : > { %v2088_v5 = vpop.eup %2087 }
 0x48d   : > { %v891_v6 = vmul.f32 %v2088_v5, %v889_v4  ;;  %vm897_vm6 = vweird.f32 %v2088_v5  ;;  %v1877_v4 = vld [vmem:[#allocation8 + $0x20] sm:$0xff] }
 0x48e   : > { %vm898_vm8 = vmor %vm896_vm7, %vm897_vm6  ;;  %1152 = vmatpush.bf16.msrb.mxu3 %v1877_v4 }
 0x48f   : > { %v892_v7 = vmul.f32 %v2088_v5, %v891_v6 }
 0x491   : > { %v893_v8 = vmul.f32 0.5, %v892_v7 }
 0x493   : > { %v894_v9 = vsub.f32 1.5, %v893_v8 }
 0x495   : > { %v895_v10 = vmul.f32 %v2088_v5, %v894_v9 }
 0x497   : > { %v899_v12 = vsel %vm898_vm8, %v2088_v5, %v895_v10 }
 0x498   : > { %v900_v13 = vmul.f32 %v899_v12, %v883_v61 }
 0x49a   : > { %v904_v15 = vmul.f32 %v2059_v11, %v900_v13 }
 0x49c   : > { %v908_v16 = vadd.f32 %v2060_v14, %v904_v15  ;;  %v2066_v14 = vld [vmem:[#allocation17 + $0x1] ss:$0 sm:$0xff] }
 0x49e   : > { %v938_v17 = vpack.c.bf16 %v908_v16, %v908_v16 }
 0x4a0   : > { %1774 = vmatmul.msk.bf16.vlgmr.msrb.gmra.mxu0 %vm758_vm1, %v938_v17  ;;  %v2067_v17 = vld [vmem:[#allocation19 + $0x1] ss:$0 sm:$0xff] }
 0x51d   : > { %v966_v19 = vpop.f32.mrf.mxu0 }
 0x51e   : > { %v967_v20 = vadd.f32 %v2061_v18, %v966_v19 }
 0x520   : > { %v970_v22 = vadd.f32 %v967_v20, %v908_v16 }
 0x522   : > { %v971_v23 = vsel %vm758_vm1, %v970_v22, 0.0 }
 0x523   : > { %972 = vadd.xlane.f32.xlu2 %v971_v23 }
 0x525   : > { %v968_v24 = vpop.f32.mrf.mxu0 }
 0x596   : > { %v973_v25 = vpop.xlane.xlu2 %972 }
 0x597   : > { %v974_v26 = vmul.f32 %v973_v25, %v2860_v21 }
 0x599   : > { %v975_v27 = vsub.f32 %v970_v22, %v974_v26  ;;  %v2068_v22 = vld [vmem:[#allocation10 + $0x2] ss:$0 sm:$0xff] }
 0x59b   : > { %v976_v28 = vmul.f32 %v975_v27, %v975_v27 }
 0x59d   : > { %v977_v29 = vsel %vm758_vm1, %v976_v28, 0.0 }
 0x59e   : > { %978 = vadd.xlane.f32.xlu2 %v977_v29 }
 0x611   : > { %v979_v33 = vpop.xlane.xlu2 %978 }
 0x612   : > { %v980_v34 = vmul.f32 %v979_v33, %v2860_v21  ;;  %v1880_v33 = vld [vmem:[#allocation13 + $0x28] sm:$0xff] }
 0x613   : > { %1214 = vmatpush.bf16.msra.mxu0 %v1880_v33 }
 0x614   : > { %v981_v36 = vadd.f32 1e-05, %v980_v34  ;;  %v1879_v34 = vld [vmem:[#allocation13 + $0x20] sm:$0xff] }
 0x616   : > { %2089 = vrsqrt.f32 %v981_v36  ;;  %vm988_vm10 = vweird.f32 %v981_v36 }
 0x617   : > { %1215 = vmatpush.bf16.msra.mxu0 %v1879_v34 }
 0x61c   : > { %v2090_v37 = vpop.eup %2089 }
 0x61d   : > { %v983_v38 = vmul.f32 %v2090_v37, %v981_v36  ;;  %vm989_vm9 = vweird.f32 %v2090_v37 }
 0x61e   : > { %vm990_vm11 = vmor %vm988_vm10, %vm989_vm9 }
 0x61f   : > { %v984_v39 = vmul.f32 %v2090_v37, %v983_v38  ;;  %v1881_v38 = vld [vmem:[#allocation16 + $0x20] sm:$0xff] }
 0x620   : > { %1248 = vmatpush.bf16.msra.mxu1 %v1881_v38  ;;  %v1888_v38 = vld [vmem:[#allocation16 + $0x38] sm:$0xff] }
 0x621   : > { %v985_v40 = vmul.f32 0.5, %v984_v39  ;;  %1435 = vmatpush.bf16.msrb.mxu0 %v1888_v38 }
 0x623   : > { %v986_v41 = vsub.f32 1.5, %v985_v40 }
 0x625   : > { %v987_v42 = vmul.f32 %v2090_v37, %v986_v41 }
 0x627   : > { %v991_v44 = vsel %vm990_vm11, %v2090_v37, %v987_v42 }
 0x628   : > { %v992_v45 = vmul.f32 %v991_v44, %v975_v27 }
 0x62a   : > { %v996_v47 = vmul.f32 %v2062_v43, %v992_v45 }
 0x62c   : > { %v1000_v48 = vadd.f32 %v2063_v46, %v996_v47  ;;  %v2069_v46 = vld [vmem:[%s3014_s26 + $0x2] ss:$0 sm:$0xff] }
 0x62e   : > { %v1001_v49 = vpack.c.bf16 %v1000_v48, %v1000_v48 }
 0x630   : > { %1783 = vmatmul.msk.bf16.vlgmr.msrb.gmra.mxu1 %vm758_vm1, %v1001_v49 }
 0x6ad   : > { %v1029_v51 = vpop.f32.mrf.mxu1 }
 0x6ae   : > { %v1030_v52 = vadd.f32 %v2064_v50, %v1029_v51 }
 0x6b0   : > { %v1033_v53 = vmax.f32 %v1030_v52, 0.0 }
 0x6b2   : > { %v1034_v54 = vpack.c.bf16 %v1033_v53, %v1033_v53  ;;  %v2071_v53 = vld [vmem:[#allocation14 + $0x2] ss:$0 sm:$0xff] }
 0x6b4   : > { %1792 = vmatmul.msk.bf16.vlgmr.msrb.gmra.mxu2 %vm758_vm1, %v1034_v54 }
 0x6b5   : > { %v1031_v55 = vpop.f32.mrf.mxu1 }
 0x737   : > { %v1062_v57 = vpop.f32.mrf.mxu2 }
 0x738   : > { %v1063_v58 = vadd.f32 %v2065_v56, %v1062_v57 }
 0x73a   : > { %v1066_v59 = vadd.f32 %v1063_v58, %v1000_v48  ;;  %v2070_v48 = vld [vmem:[#allocation11 + $0x2] ss:$0 sm:$0xff] }
 0x73c   : > { %v1067_v60 = vsel %vm758_vm1, %v1066_v59, 0.0 }
 0x73d   : > { %1068 = vadd.xlane.f32.xlu0 %v1067_v60 }
 0x73f   : > { %v1064_v61 = vpop.f32.mrf.mxu2 }
 0x7b0   : > { %v1069_v62 = vpop.xlane.xlu0 %1068 }
 0x7b1   : > { %v1070_v63 = vmul.f32 %v1069_v62, %v2860_v21 }
 0x7b3   : > { %v1071_v0 = vsub.f32 %v1066_v59, %v1070_v63  ;;  %v2072_v59 = vld [vmem:[%s3015_s5 + $0x2] ss:$0 sm:$0xff] }
 0x7b5   : > { %v1072_v1 = vmul.f32 %v1071_v0, %v1071_v0 }
 0x7b7   : > { %v1073_v2 = vsel %vm758_vm1, %v1072_v1, 0.0 }
 0x7b8   : > { %1074 = vadd.xlane.f32.xlu1 %v1073_v2 }
 0x82b   : > { %v1075_v5 = vpop.xlane.xlu1 %1074 }
 0x82c   : > { %v1076_v6 = vmul.f32 %v1075_v5, %v2860_v21 }
 0x82e   : > { %v1077_v7 = vadd.f32 1e-05, %v1076_v6  ;;  %v1884_v6 = vld [vmem:[#allocation8 + $0x38] sm:$0xff] }
 0x82f   : > { %1339 = vmatpush.bf16.msra.mxu2 %v1884_v6 }
 0x830   : > { %2091 = vrsqrt.f32 %v1077_v7  ;;  %vm1084_vm13 = vweird.f32 %v1077_v7 }
 0x836   : > { %v2092_v8 = vpop.eup %2091 }
 0x837   : > { %v1079_v9 = vmul.f32 %v2092_v8, %v1077_v7  ;;  %vm1085_vm12 = vweird.f32 %v2092_v8  ;;  %v1883_v7 = vld [vmem:[#allocation8 + $0x30] sm:$0xff] }
 0x838   : > { %vm1086_vm14 = vmor %vm1084_vm13, %vm1085_vm12  ;;  %1340 = vmatpush.bf16.msra.mxu2 %v1883_v7 }
 0x839   : > { %v1080_v10 = vmul.f32 %v2092_v8, %v1079_v9 }
 0x83b   : > { %v1081_v11 = vmul.f32 0.5, %v1080_v10 }
 0x83d   : > { %v1082_v12 = vsub.f32 1.5, %v1081_v11 }
 0x83f   : > { %v1083_v13 = vmul.f32 %v2092_v8, %v1082_v12 }
 0x841   : > { %v1087_v15 = vsel %vm1086_vm14, %v2092_v8, %v1083_v13 }
 0x842   : > { %v1088_v16 = vmul.f32 %v1087_v15, %v1071_v0 }
 0x844   : > { %v1092_v18 = vmul.f32 %v2066_v14, %v1088_v16 }
 0x846   : > { %v1096_v19 = vadd.f32 %v2067_v17, %v1092_v18  ;;  %v2073_v17 = vld [vmem:[#allocation17 + $0x2] ss:$0 sm:$0xff] }
 0x848   : > { %v1126_v20 = vpack.c.bf16 %v1096_v19, %v1096_v19 }
 0x84a   : > { %1803 = vmatmul.msk.bf16.vlgmr.msrb.gmra.mxu3 %vm758_vm1, %v1126_v20 }
 0x8cd   : > { %v1154_v23 = vpop.f32.mrf.mxu3 }
 0x8ce   : > { %v1155_v24 = vadd.f32 %v2068_v22, %v1154_v23 }
 0x8d0   : > { %v1158_v25 = vadd.f32 %v1155_v24, %v1096_v19  ;;  %v2074_v19 = vld [vmem:[#allocation19 + $0x2] ss:$0 sm:$0xff] }
 0x8d2   : > { %v1159_v26 = vsel %vm758_vm1, %v1158_v25, 0.0 }
 0x8d3   : > { %1160 = vadd.xlane.f32.xlu2 %v1159_v26 }
 0x8d5   : > { %v1156_v27 = vpop.f32.mrf.mxu3 }
 0x946   : > { %v1161_v28 = vpop.xlane.xlu2 %1160 }
 0x947   : > { %v1162_v29 = vmul.f32 %v1161_v28, %v2860_v21 }
 0x949   : > { %v1163_v30 = vsub.f32 %v1158_v25, %v1162_v29  ;;  %v2075_v25 = vld [vmem:[#allocation10 + $0x3] ss:$0 sm:$0xff] }
 0x94b   : > { %v1164_v31 = vmul.f32 %v1163_v30, %v1163_v30 }
 0x94d   : > { %v1165_v32 = vsel %vm758_vm1, %v1164_v31, 0.0 }
 0x94e   : > { %1166 = vadd.xlane.f32.xlu0 %v1165_v32 }
 0x9c1   : > { %v1167_v36 = vpop.xlane.xlu0 %1166 }
 0x9c2   : > { %v1168_v37 = vmul.f32 %v1167_v36, %v2860_v21  ;;  %v1886_v36 = vld [vmem:[#allocation13 + $0x38] sm:$0xff] }
 0x9c3   : > { %1402 = vmatpush.bf16.msra.mxu3 %v1886_v36 }
 0x9c4   : > { %v1169_v39 = vadd.f32 1e-05, %v1168_v37  ;;  %v1885_v37 = vld [vmem:[#allocation13 + $0x30] sm:$0xff] }
 0x9c6   : > { %2093 = vrsqrt.f32 %v1169_v39  ;;  %vm1176_vm0 = vweird.f32 %v1169_v39 }
 0x9c7   : > { %1403 = vmatpush.bf16.msra.mxu3 %v1885_v37 }
 0x9cc   : > { %v2094_v40 = vpop.eup %2093 }
 0x9cd   : > { %v1171_v41 = vmul.f32 %v2094_v40, %v1169_v39  ;;  %vm1177_vm15 = vweird.f32 %v2094_v40 }
 0x9ce   : > { %vm1178_vm2 = vmor %vm1176_vm0, %vm1177_vm15 }
 0x9cf   : > { %v1172_v42 = vmul.f32 %v2094_v40, %v1171_v41  ;;  %v1887_v41 = vld [vmem:[#allocation16 + $0x30] sm:$0xff] }
 0x9d0   : > { %1436 = vmatpush.bf16.msrb.mxu0 %v1887_v41 }
 0x9d1   : > { %v1173_v43 = vmul.f32 0.5, %v1172_v42 }
 0x9d3   : > { %v1174_v44 = vsub.f32 1.5, %v1173_v43 }
 0x9d5   : > { %v1175_v45 = vmul.f32 %v2094_v40, %v1174_v44 }
 0x9d7   : > { %v1179_v47 = vsel %vm1178_vm2, %v2094_v40, %v1175_v45 }
 0x9d8   : > { %v1180_v49 = vmul.f32 %v1179_v47, %v1163_v30 }
 0x9da   : > { %v1184_v50 = vmul.f32 %v2069_v46, %v1180_v49  ;;  %v2076_v49 = vld [vmem:[%s3014_s26 + $0x3] ss:$0 sm:$0xff] }
 0x9dc   : > { %v1188_v51 = vadd.f32 %v2070_v48, %v1184_v50 }
 0x9de   : > { %v1189_v52 = vpack.c.bf16 %v1188_v51, %v1188_v51 }
 0x9e0   : > { %1812 = vmatmul.msk.bf16.vlgmr.msra.gmra.mxu0 %vm758_vm1, %v1189_v52 }
 0xa5d   : > { %v1217_v54 = vpop.f32.mrf.mxu0 }
 0xa5e   : > { %v1218_v55 = vadd.f32 %v2071_v53, %v1217_v54 }
 0xa60   : > { %v1221_v56 = vmax.f32 %v1218_v55, 0.0 }
 0xa62   : > { %v1222_v57 = vpack.c.bf16 %v1221_v56, %v1221_v56  ;;  %v2078_v56 = vld [vmem:[#allocation14 + $0x3] ss:$0 sm:$0xff] }
 0xa64   : > { %1821 = vmatmul.msk.bf16.vlgmr.msra.gmra.mxu1 %vm758_vm1, %v1222_v57 }
 0xa65   : > { %v1219_v58 = vpop.f32.mrf.mxu0 }
 0xae1   : > { %v1250_v60 = vpop.f32.mrf.mxu1 }
 0xae2   : > { %v1251_v61 = vadd.f32 %v2072_v59, %v1250_v60 }
 0xae4   : > { %v1254_v62 = vadd.f32 %v1251_v61, %v1188_v51  ;;  %v2077_v51 = vld [vmem:[#allocation11 + $0x3] ss:$0 sm:$0xff] }
 0xae6   : > { %v1255_v63 = vsel %vm758_vm1, %v1254_v62, 0.0 }
 0xae7   : > { %1256 = vadd.xlane.f32.xlu1 %v1255_v63 }
 0xae9   : > { %v1252_v0 = vpop.f32.mrf.mxu1 }
 0xb5a   : > { %v1257_v1 = vpop.xlane.xlu1 %1256 }
 0xb5b   : > { %v1258_v2 = vmul.f32 %v1257_v1, %v2860_v21 }
 0xb5d   : > { %v1259_v3 = vsub.f32 %v1254_v62, %v1258_v2  ;;  %v2079_v62 = vld [vmem:[%s3015_s5 + $0x3] ss:$0 sm:$0xff]  ;;  %s2477_s5 = scalar_lea.hbm %s2476_s25, 8 }
 0xb5e   : > { %p2478_p1 = scmp.ne.s32.totalorder %s2476_s25, %s2477_s5  ;;  %p2483_p8 = scmp.lt.s32.totalorder %s2481_s14, %s2477_s5 }
 0xb5f   : > { %v1260_v4 = vmul.f32 %v1259_v3, %v1259_v3 }
 0xb60   : > { %p2479_p3 = pnand %p2478_p1, %p2795_p13  ;;  %p2484_p7 = por %p2483_p8, %p2482_p12 }
 0xb61   : > { %v1261_v5 = vsel %vm758_vm1, %v1260_v4, 0.0 }
 0xb62   : > { %1262 = vadd.xlane.f32.xlu2 %v1261_v5  ;;  %p2480_p5 = pneg %p2479_p3 }
 0xb64   : > { %p2485_p9 = pnand %p2484_p7, %p2480_p5 }
 0xbd5   : > { %v1263_v8 = vpop.xlane.xlu2 %1262 }
 0xbd6   : > { %v1264_v9 = vmul.f32 %v1263_v8, %v2860_v21 }
 0xbd8   : > { %v1265_v10 = vadd.f32 1e-05, %v1264_v9  ;;  %v1890_v9 = vld [vmem:[#allocation20 + $0x8] sm:$0xff] }
 0xbd9   : > { %1503 = vmatpush.bf16.msrb.mxu1 %v1890_v9 }
 0xbda   : > { %2095 = vrsqrt.f32 %v1265_v10  ;;  %vm1272_vm4 = vweird.f32 %v1265_v10 }
 0xbe0   : > { %v2096_v11 = vpop.eup %2095 }
 0xbe1   : > { %v1267_v12 = vmul.f32 %v2096_v11, %v1265_v10  ;;  %vm1273_vm3 = vweird.f32 %v2096_v11  ;;  %v1889_v10 = vld [vmem:[#allocation20] sm:$0xff] }
 0xbe2   : > { %vm1274_vm5 = vmor %vm1272_vm4, %vm1273_vm3  ;;  %1504 = vmatpush.bf16.msrb.mxu1 %v1889_v10 }
 0xbe3   : > { %v1268_v13 = vmul.f32 %v2096_v11, %v1267_v12 }
 0xbe5   : > { %v1269_v14 = vmul.f32 0.5, %v1268_v13 }
 0xbe7   : > { %v1270_v15 = vsub.f32 1.5, %v1269_v14 }
 0xbe9   : > { %v1271_v16 = vmul.f32 %v2096_v11, %v1270_v15 }
 0xbeb   : > { %v1275_v18 = vsel %vm1274_vm5, %v2096_v11, %v1271_v16 }
 0xbec   : > { %v1276_v20 = vmul.f32 %v1275_v18, %v1259_v3 }
 0xbee   : > { %v1280_v22 = vmul.f32 %v2073_v17, %v1276_v20  ;;  %v2080_v20 = vld [vmem:[#allocation17 + $0x3] ss:$0 sm:$0xff] }
 0xbf0   : > { %v1284_v23 = vadd.f32 %v2074_v19, %v1280_v22 }
 0xbf2   : > { %v1314_v24 = vpack.c.bf16 %v1284_v23, %v1284_v23 }
 0xbf4   : > { %1832 = vmatmul.msk.bf16.vlgmr.msra.gmra.mxu2 %vm758_vm1, %v1314_v24  ;;  %v2081_v24 = vld [vmem:[#allocation19 + $0x3] ss:$0 sm:$0xff] }
 0xc77   : > { %v1342_v26 = vpop.f32.mrf.mxu2 }
 0xc78   : > { %v1343_v27 = vadd.f32 %v2075_v25, %v1342_v26 }
 0xc7a   : > { %v1346_v28 = vadd.f32 %v1343_v27, %v1284_v23  ;;  %v2082_v27 = vld [vmem:[%s3017_s4] ss:$0 sm:$0xff] }
 0xc7c   : > { %v1347_v29 = vsel %vm758_vm1, %v1346_v28, 0.0 }
 0xc7d   : > { %1348 = vadd.xlane.f32.xlu0 %v1347_v29 }
 0xc7f   : > { %v1344_v30 = vpop.f32.mrf.mxu2 }
 0xcf0   : > { %v1349_v31 = vpop.xlane.xlu0 %1348 }
 0xcf1   : > { %v1350_v32 = vmul.f32 %v1349_v31, %v2860_v21 }
 0xcf3   : > { %v1351_v33 = vsub.f32 %v1346_v28, %v1350_v32 }
 0xcf5   : > { %v1352_v34 = vmul.f32 %v1351_v33, %v1351_v33 }
 0xcf7   : > { %v1353_v35 = vsel %vm758_vm1, %v1352_v34, 0.0 }
 0xcf8   : > { %1354 = vadd.xlane.f32.xlu1 %v1353_v35 }
 0xd6b   : > { %v1355_v39 = vpop.xlane.xlu1 %1354 }
 0xd6c   : > { %v1356_v40 = vmul.f32 %v1355_v39, %v2860_v21 }
 0xd6e   : > { %v1357_v42 = vadd.f32 1e-05, %v1356_v40 }
 0xd70   : > { %2097 = vrsqrt.f32 %v1357_v42  ;;  %vm1364_vm7 = vweird.f32 %v1357_v42 }
 0xd76   : > { %v2098_v43 = vpop.eup %2097 }
 0xd77   : > { %v1359_v44 = vmul.f32 %v2098_v43, %v1357_v42  ;;  %vm1365_vm6 = vweird.f32 %v2098_v43 }
 0xd78   : > { %vm1366_vm8 = vmor %vm1364_vm7, %vm1365_vm6 }
 0xd79   : > { %v1360_v45 = vmul.f32 %v2098_v43, %v1359_v44 }
 0xd7b   : > { %v1361_v46 = vmul.f32 0.5, %v1360_v45 }
 0xd7d   : > { %v1362_v47 = vsub.f32 1.5, %v1361_v46 }
 0xd7f   : > { %v1363_v48 = vmul.f32 %v2098_v43, %v1362_v47 }
 0xd81   : > { %v1367_v50 = vsel %vm1366_vm8, %v2098_v43, %v1363_v48 }
 0xd82   : > { %v1368_v52 = vmul.f32 %v1367_v50, %v1351_v33 }
 0xd84   : > { %v1372_v53 = vmul.f32 %v2076_v49, %v1368_v52 }
 0xd86   : > { %v1376_v54 = vadd.f32 %v2077_v51, %v1372_v53 }
 0xd88   : > { %v1377_v55 = vpack.c.bf16 %v1376_v54, %v1376_v54 }
 0xd8a   : > { %1841 = vmatmul.msk.bf16.vlgmr.msra.gmra.mxu3 %vm758_vm1, %v1377_v55 }
 0xe0d   : > { %v1405_v57 = vpop.f32.mrf.mxu3 }
 0xe0e   : > { %v1406_v58 = vadd.f32 %v2078_v56, %v1405_v57 }
 0xe10   : > { %v1409_v59 = vmax.f32 %v1406_v58, 0.0 }
 0xe12   : > { %v1410_v60 = vpack.c.bf16 %v1409_v59, %v1409_v59 }
 0xe14   : > { %1850 = vmatmul.msk.bf16.vlgmr.msrb.gmra.mxu0 %vm758_vm1, %v1410_v60 }
 0xe15   : > { %v1407_v61 = vpop.f32.mrf.mxu3 }
 0xe91   : > { %v1438_v63 = vpop.f32.mrf.mxu0 }
 0xe92   : > { %v1439_v0 = vadd.f32 %v2079_v62, %v1438_v63 }
 0xe94   : > { %v1442_v1 = vadd.f32 %v1439_v0, %v1376_v54 }
 0xe96   : > { %v1443_v2 = vsel %vm758_vm1, %v1442_v1, 0.0 }
 0xe97   : > { %1444 = vadd.xlane.f32.xlu2 %v1443_v2 }
 0xe99   : > { %v1440_v3 = vpop.f32.mrf.mxu0 }
 0xf0a   : > { %v1445_v4 = vpop.xlane.xlu2 %1444 }
 0xf0b   : > { %v1446_v5 = vmul.f32 %v1445_v4, %v2860_v21 }
 0xf0d   : > { %v1447_v6 = vsub.f32 %v1442_v1, %v1446_v5 }
 0xf0f   : > { %v1448_v7 = vmul.f32 %v1447_v6, %v1447_v6 }
 0xf11   : > { %v1449_v8 = vsel %vm758_vm1, %v1448_v7, 0.0 }
 0xf12   : > { %1450 = vadd.xlane.f32.xlu0 %v1449_v8 }
 0xf85   : > { %v1451_v11 = vpop.xlane.xlu0 %1450 }
 0xf86   : > { %v1452_v12 = vmul.f32 %v1451_v11, %v2860_v21 }
 0xf88   : > { %v1453_v13 = vadd.f32 1e-05, %v1452_v12 }
 0xf8a   : > { %2099 = vrsqrt.f32 %v1453_v13  ;;  %vm1460_vm10 = vweird.f32 %v1453_v13 }
 0xf90   : > { %v2100_v14 = vpop.eup %2099 }
 0xf91   : > { %v1455_v15 = vmul.f32 %v2100_v14, %v1453_v13  ;;  %vm1461_vm9 = vweird.f32 %v2100_v14 }
 0xf92   : > { %vm1462_vm11 = vmor %vm1460_vm10, %vm1461_vm9 }
 0xf93   : > { %v1456_v16 = vmul.f32 %v2100_v14, %v1455_v15 }
 0xf95   : > { %v1457_v17 = vmul.f32 0.5, %v1456_v16 }
 0xf97   : > { %v1458_v18 = vsub.f32 1.5, %v1457_v17 }
 0xf99   : > { %v1459_v19 = vmul.f32 %v2100_v14, %v1458_v18 }
 0xf9b   : > { %v1463_v22 = vsel %vm1462_vm11, %v2100_v14, %v1459_v19 }
 0xf9c   : > { %v1464_v23 = vmul.f32 %v1463_v22, %v1447_v6 }
 0xf9e   : > { %v1468_v25 = vmul.f32 %v2080_v20, %v1464_v23 }
 0xfa0   : > { %v1472_v21 = vadd.f32 %v2081_v24, %v1468_v25 }
 0xfa2   : > { %v1473_v26 = vpack.c.bf16 %v1472_v21, %v1472_v21 }
 0xfa4   : > { %1859 = vmatmul.msk.bf16.vlgmr.msrb.gmra.mxu1 %vm758_vm1, %v1473_v26 }
0x1021   : > { %v1506_v28 = vpop.f32.mrf.mxu1 }
0x1022   : > { %v1507_v29 = vadd.f32 %v2082_v27, %v1506_v28 }
0x1024   : > { %1510 = vst [vmem:[%s691_s6] sm:$0xff] %v1507_v29 }
0x1025   : > { %2488 = shalt.err (!%p2485_p9)
}
0x1026   : > { %1937 = dma.vmem_to_hbm [thread:$0]  (%p2795_p13), %s1525_s17, 128, %s1527_s27, %s1512_s0  }
0x1029   : > { %v1508_v30 = vpop.f32.mrf.mxu1 }
0x102a PF: > { %s1538_s29 = sand.u32 1, %s2539_s18   ;;  %p3018_p10 = scmp.ge.s32.totalorder %s2551_s21, 2 }
0x102b   : > { %s1539_s23 = scalar_lea.sflag [#allocation4], %s1538_s29 }
0x102c   : > { %p1978_p11 = pnand %p3018_p10, %p2800_p4 }
0x102e   : > { %p1979_p0 = pneg %p1978_p11 }
0x1030   : > { %2534 = dma.done.wait (%p1979_p0), %s1539_s23, 128  }
0x1031   : > { %2536 = vsyncadd (%p1979_p0), %s1539_s23, 4294967168  ;;  %p34_p2 = scmp.ge.s32.totalorder %s2775_s2, 4   ;;  %s3019_s18 = smov %s2543_s19 }
0x1032   : > { %s3020_s19 = smov %s2547_s20  ;;  %s3021_s20 = smov %s2787_s24 }
0x1033   : > { %s3022_s21 = smov %s2775_s2  ;;  %36 = sbr.rel (!%p34_p2) target bundleno = 22 (0x16), region = 199 }
0x1038   :  { %1545 = vsyncpa [#allocation3], 1 }
0x1039   :  { %1547 = vsyncpa [#allocation3 + $0x1], 1 }
0x103a   :  { %1548 = vsyncpa [#allocation6], 1 }
0x103b   :  { %1549 = vsyncpa [#allocation9], 1 }
0x103c   :  { %1550 = vsyncpa [#allocation12], 1 }
0x103d   :  { %1551 = vsyncpa [#allocation15], 1 }
0x103e   :  { %1552 = vsyncpa [#allocation18], 1 }
0x103f   :  { %1553 = vsyncpa [#allocation21], 1 }
0x1040   :  { %1554 = vsyncpa [#allocation4], 1 }
0x1041   :  { %1556 = vsyncpa [#allocation4 + $0x1], 1 }

// kernel: tpu_custom_call.1
= control target key start
LH: loop header
LB: loop body
LE: loop exit
PB: predicated region body
PF: predicated region fallthrough
CT: control target
= control target key end

     0   :  { %s2966_s0 = inlined_call_operand.hbm [shape: bf16[16,16], index: 0, kind: input, shape index: {}]   ;;  %s2967_s1 = inlined_call_operand.hbm [shape: bf16[16,32], index: 1, kind: input, shape index: {}]   ;;  %s2968_s2 = inlined_call_operand.hbm [shape: f32[1,32], index: 2, kind: input, shape index: {}]   ;;  %s2969_s3 = inlined_call_operand.hbm [shape: bf16[4,32,32], index: 3, kind: input, shape index: {}]   ;;  %s2970_s4 = inlined_call_operand.hbm [shape: f32[4,1,32], index: 4, kind: input, shape index: {}]   ;;  %s2971_s5 = inlined_call_operand.vmem [shape: f32[4,1,32], index: 5, kind: input, shape index: {}]   ;;  %s2972_s6 = inlined_call_operand.hbm [shape: f32[4,1,32], index: 6, kind: input, shape index: {}]   ;;  %s2973_s7 = inlined_call_operand.hbm [shape: bf16[4,32,32], index: 7, kind: input, shape index: {}]   ;;  %s2974_s8 = inlined_call_operand.hbm [shape: f32[4,1,32], index: 8, kind: input, shape index: {}]   ;;  %s2975_s9 = inlined_call_operand.hbm [shape: bf16[4,32,32], index: 9, kind: input, shape index: {}]   ;;  %s2976_s10 = inlined_call_operand.vmem [shape: f32[4,1,32], index: 10, kind: input, shape index: {}]   ;;  %s2977_s11 = inlined_call_operand.hbm [shape: f32[4,1,32], index: 11, kind: input, shape index: {}]   ;;  %s2978_s12 = inlined_call_operand.hbm [shape: f32[4,1,32], index: 12, kind: input, shape index: {}]   ;;  %s2979_s13 = inlined_call_operand.hbm [shape: bf16[32,128], index: 13, kind: input, shape index: {}]   ;;  %s2980_s14 = inlined_call_operand.vmem [shape: f32[1,128], index: 14, kind: input, shape index: {}]   ;;  %s2981_s15 = inlined_call_operand.hbm [shape: f32[16,128], index: 15, kind: output, shape index: {}]  }
   0x1   :  { %2990 = sst [smem:[#allocation31_spill]] %s2966_s0 }
   0x2   :  { %2991 = sst [smem:[#allocation32_spill]] %s2967_s1 }
   0x3   :  { %2992 = sst [smem:[#allocation33_spill]] %s2968_s2 }
   0x4   :  { %2993 = sst [smem:[#allocation34_spill]] %s2969_s3 }
   0x5   :  { %2994 = sst [smem:[#allocation35_spill]] %s2970_s4 }
   0x6   :  { %2995 = sst [smem:[#allocation36_spill]] %s2971_s5 }
   0x7   :  { %2996 = sst [smem:[#allocation37_spill]] %s2972_s6 }
   0x8   :  { %2997 = sst [smem:[#allocation38_spill]] %s2976_s10 }
   0x9   :  { %2998 = sst [smem:[#allocation39_spill]] %s2980_s14 }
   0xa   :  { %2999 = sst [smem:[#allocation40_spill]] %s2981_s15 }
   0xb   :  { %20 = vsyncpa [#allocation3], 0 }
   0xc   :  { %22 = vsyncpa [#allocation3 + $0x1], 0 }
   0xd   :  { %23 = vsyncpa [#allocation6], 0 }
   0xe   :  { %24 = vsyncpa [#allocation9], 0 }
   0xf   :  { %25 = vsyncpa [#allocation12], 0 }
  0x10   :  { %26 = vsyncpa [#allocation15], 0 }
  0x11   :  { %27 = vsyncpa [#allocation18], 0 }
  0x12   :  { %28 = vsyncpa [#allocation21], 0 }
  0x13   :  { %29 = vsyncpa [#allocation4], 0 }
  0x14   :  { %31 = vsyncpa [#allocation4 + $0x1], 0  ;;  %s2649_s18 = smov 0   ;;  %s2651_s19 = smov 0  }
  0x15   :  { %s2653_s20 = smov 0   ;;  %s2655_s21 = smov 0  }
  0x16 LB: > { %s3000_s1 = sld [smem:[#allocation32_spill]]  ;;  %s2673_s25 = sadd.s32 4294967295, %s2551_s21   ;;  %s2551_s21 = sphi %s2655_s21, %s3022_s21   ;;  %s2547_s20 = sphi %s2653_s20, %s3021_s20   ;;  %s2543_s19 = sphi %s2651_s19, %s3020_s19   ;;  %s2539_s18 = sphi %s2649_s18, %s3019_s18  }
  0x17   : > { %p1703_p0 = scmp.ge.s32.totalorder %s2551_s21, 1  ;;  %p58_p1 = scmp.eq.s32.totalorder %s2673_s25, 0 }
  0x18   : > { %p388_p2 = scmp.lt.s32.totalorder %s2551_s21, 3  ;;  %s2553_s27 = smov [#allocation5]  }
  0x19   : > { %s401_s28 = sshll.u32 %s2553_s27, 4  ;;  %s3002_s3 = sld [smem:[#allocation34_spill]]  ;;  %s402_s28 = int_to_ptr.vmem [resolvable:$true] %s401_s28 }
  0x1a   : > { %p2678_p3 = pnand %p1703_p0, %p388_p2  ;;  %s2554_s22 = smov [#allocation8]  }
  0x1b   : > { %s427_s23 = sshll.u32 %s2554_s22, 4  ;;  %s2985_s27 = smov 64   ;;  %s428_s23 = int_to_ptr.vmem [resolvable:$true] %s427_s23 }
  0x1c   : > { %s399_s24 = sshll.u32 %s3000_s1, 4  ;;  %p1939_p4 = pneg %p2678_p3  ;;  %s400_s24 = int_to_ptr.hbm [resolvable:$true] %s399_s24 }
  0x1d   : > { %s2987_s1 = smov 4   ;;  %s3004_s6 = sld [smem:[#allocation37_spill]] }
  0x1e   : > { %p2690_p6 = pnand %p1939_p4, %p58_p1  ;;  %s2557_s22 = smov [#allocation11]  }
  0x1f   : > { %s425_s16 = sshll.u32 %s3002_s3, 4  ;;  %s458_s14 = sshll.u32 %s2557_s22, 4  ;;  %s426_s16 = int_to_ptr.hbm [resolvable:$true] %s425_s16  ;;  %s459_s14 = int_to_ptr.vmem [resolvable:$true] %s458_s14 }
  0x20   : > { %1942 = dma.hbm_to_vmem [thread:$0]  (!%p2690_p6), %s400_s24, 128, %s402_s28, [#allocation6], %s2985_s27, %s2985_s27, %s2987_s1  }
  0x21   : > { %1948 = dma.hbm_to_vmem [thread:$0]  (!%p2690_p6), %s426_s16, 1024, %s428_s23, [#allocation9], %s2985_s27, %s2985_s27, %s2987_s1  }
  0x22   : > { %s484_s5 = sshll.u32 %s2974_s8, 4  ;;  %s2558_s24 = smov 16   ;;  %s485_s5 = int_to_ptr.hbm [resolvable:$true] %s484_s5 }
  0x23   : > { %s456_s3 = sshll.u32 %s3004_s6, 4  ;;  %s2559_s28 = smov 1   ;;  %s457_s3 = int_to_ptr.hbm [resolvable:$true] %s456_s3 }
  0x24   : > { %1954 = dma.hbm_to_vmem [thread:$0]  (!%p2690_p6), %s457_s3, 64, %s459_s14, [#allocation12], %s2558_s24, %s2558_s24, %s2559_s28  }
  0x25   : > { %s2560_s16 = smov [#allocation14]   ;;  %s515_s22 = sshll.u32 %s2977_s11, 4  ;;  %s516_s22 = int_to_ptr.hbm [resolvable:$true] %s515_s22 }
  0x26   : > { %s486_s23 = sshll.u32 %s2560_s16, 4  ;;  %s3005_s2 = sld [smem:[#allocation33_spill]]  ;;  %s487_s23 = int_to_ptr.vmem [resolvable:$true] %s486_s23 }
  0x27   : > { %1960 = dma.hbm_to_vmem [thread:$0]  (!%p2690_p6), %s485_s5, 64, %s487_s23, [#allocation15], %s2558_s24, %s2558_s24, %s2559_s28  }
  0x28   : > { %s2561_s3 = smov [#allocation17]   ;;  %s2562_s16 = smov [#allocation7]  }
  0x29   : > { %s517_s14 = sshll.u32 %s2561_s3, 4  ;;  %s416_s29 = sshll.u32 %s2562_s16, 4  ;;  %s518_s14 = int_to_ptr.vmem [resolvable:$true] %s517_s14  ;;  %s417_s29 = int_to_ptr.vmem [resolvable:$true] %s416_s29 }
  0x2a   : > { %1966 = dma.hbm_to_vmem [thread:$0]  (!%p2690_p6), %s516_s22, 64, %s518_s14, [#allocation18], %s2558_s24, %s2558_s24, %s2559_s28  }
  0x2b   : > { %s3006_s4 = sld [smem:[#allocation35_spill]]  ;;  %s470_s15 = sshll.u32 %s2973_s7, 4  ;;  %s471_s15 = int_to_ptr.hbm [resolvable:$true] %s470_s15 }
  0x2c   : > { %s414_s27 = sshll.u32 %s3005_s2, 4  ;;  %s2563_s3 = smov [#allocation10]   ;;  %s415_s27 = int_to_ptr.hbm [resolvable:$true] %s414_s27 }
  0x2d   : > { %1945 = dma.hbm_to_vmem [thread:$0]  (!%p2690_p6), %s415_s27, 16, %s417_s29, [#allocation6]  }
  0x2e   : > { %s441_s2 = sshll.u32 %s2563_s3, 4  ;;  %s2564_s1 = smov [#allocation13]   ;;  %s442_s2 = int_to_ptr.vmem [resolvable:$true] %s441_s2 }
  0x2f   : > { %s472_s22 = sshll.u32 %s2564_s1, 4  ;;  %s498_s27 = sshll.u32 %s2975_s9, 4  ;;  %s473_s22 = int_to_ptr.vmem [resolvable:$true] %s472_s22  ;;  %s499_s27 = int_to_ptr.hbm [resolvable:$true] %s498_s27 }
  0x30   : > { %s3007_s29 = smov 4   ;;  %s3008_s30 = smov 64  }
  0x31   : > { %s439_s5 = sshll.u32 %s3006_s4, 4  ;;  %s529_s3 = sshll.u32 %s2978_s12, 4  ;;  %s440_s5 = int_to_ptr.hbm [resolvable:$true] %s439_s5  ;;  %s530_s3 = int_to_ptr.hbm [resolvable:$true] %s529_s3 }
  0x32   : > { %1951 = dma.hbm_to_vmem [thread:$0]  (!%p2690_p6), %s440_s5, 64, %s442_s2, [#allocation9], %s2558_s24, %s2558_s24, %s2559_s28  }
  0x33   : > { %1957 = dma.hbm_to_vmem [thread:$0]  (!%p2690_p6), %s471_s15, 1024, %s473_s22, [#allocation12], %s3008_s30, %s3008_s30, %s3007_s29  }
  0x34   : > { %s2565_s2 = smov [#allocation16]   ;;  %s2566_s15 = smov [#allocation19]  }
  0x35   : > { %s500_s5 = sshll.u32 %s2565_s2, 4  ;;  %s531_s1 = sshll.u32 %s2566_s15, 4  ;;  %s501_s5 = int_to_ptr.vmem [resolvable:$true] %s500_s5  ;;  %s532_s1 = int_to_ptr.vmem [resolvable:$true] %s531_s1 }
  0x36   : > { %1963 = dma.hbm_to_vmem [thread:$0]  (!%p2690_p6), %s499_s27, 1024, %s501_s5, [#allocation15], %s3008_s30, %s3008_s30, %s3007_s29  }
  0x37   : > { %s543_s16 = sshll.u32 %s2979_s13, 4  ;;  %s2567_s27 = smov [#allocation20]   ;;  %s544_s16 = int_to_ptr.hbm [resolvable:$true] %s543_s16 }
  0x38   : > { %1969 = dma.hbm_to_vmem [thread:$0]  (!%p2690_p6), %s530_s3, 64, %s532_s1, [#allocation18], %s2558_s24, %s2558_s24, %s2559_s28  }
  0x39   : > { %s545_s23 = sshll.u32 %s2567_s27, 4  ;;  %s1702_s10 = sadd.s32 4294967294, %s2551_s21   ;;  %s546_s23 = int_to_ptr.vmem [resolvable:$true] %s545_s23 }
  0x3a   : > { %1972 = dma.hbm_to_vmem [thread:$0]  (!%p2690_p6), %s544_s16, 256, %s546_s23, [#allocation21], %s3008_s30, %s3008_s30, %s3007_s29  }
  0x3b   : > { %s2775_s2 = sadd.s32 1, %s2551_s21   ;;  %s44_s5 = sadd.s32 1, %s2547_s20 }
  0x3c   : > { %s41_s15 = ssub.s32 %s2551_s21, %s2775_s2  ;;  %p51_p7 = scmp.ne.s32.totalorder %s2547_s20, %s2543_s19 }
  0x3d   : > { %p42_p8 = scmp.eq.s32.totalorder %s41_s15, 0  ;;  %p52_p9 = scmp.eq.s32.totalorder %s2551_s21, 0 }
  0x3e   : > { %p57_p10 = scmp.ne.s32.totalorder %s2543_s19, %s2539_s18  ;;  %p375_p11 = scmp.eq.s32.totalorder %s2673_s25, 1 }
  0x3f   : > { %s2787_s24 = scalar_select %p42_p8, %s2547_s20, %s44_s5  }
  0x40   : > { %p2791_p12 = por %p58_p1, %p57_p10  ;;  %p2795_p13 = por %p375_p11, %p51_p7 }
  0x41   : > { %p381_p0 = scmp.eq.s32.totalorder %s1702_s10, 1  ;;  %p53_p2 = por %p52_p9, %p51_p7 }
  0x42   : > { %s562_s29 = sand.u32 1, %s2547_s20   ;;  %p1992_p6 = scmp.lt.s32.totalorder %s2551_s21, 2 }
  0x43   : > { %p2800_p4 = por %p381_p0, %p57_p10  ;;  %s1716_s3 = sshll.u32 %s562_s29, 2 }
  0x44   : > { %s1717_s1 = sshll.u32 %s2551_s21, 2  ;;  %s3012_s0 = sld [smem:[#allocation31_spill]] }
  0x45   : > { %s566_s23 = scalar_lea.vmem [#allocation2], %s1716_s3  ;;  %p2809_p8 = pnand %p1992_p6, %p53_p2 }
  0x46   : > { %s574_s5 = sshll.u32 %s566_s23, 4  ;;  %s563_s15 = scalar_lea.sflag [#allocation3], %s562_s29  ;;  %s575_s5 = int_to_ptr.vmem [resolvable:$true] %s574_s5 }
  0x47   : > { %p2435_p9 = pneg %p2809_p8 }
  0x4a   : > { %s570_s16 = scalar_lea.hbm %s3012_s0, %s1717_s1  ;;  %s2438_s3 = scalar_lea.hbm %s3012_s0, 8 }
  0x4b   : > { %s572_s27 = sshll.u32 %s570_s16, 4  ;;  %s573_s27 = int_to_ptr.hbm [resolvable:$true] %s572_s27 }
  0x4c   : > { %s2431_s4 = sshra.s32 %s573_s27, 4  ;;  %s2432_s4 = int_to_ptr.hbm [resolvable:$true] %s2431_s4 }
  0x4d   : > { %s2433_s6 = scalar_lea.hbm %s2432_s4, 4  ;;  %p2439_p0 = scmp.lt.s32.totalorder %s2432_s4, %s3012_s0 }
  0x4e   : > { %p2434_p7 = scmp.ne.s32.totalorder %s2432_s4, %s2433_s6  ;;  %p2440_p2 = scmp.lt.s32.totalorder %s2438_s3, %s2433_s6 }
  0x50   : > { %p2436_p10 = pnand %p2435_p9, %p2434_p7  ;;  %p2441_p6 = por %p2440_p2, %p2439_p0 }
  0x52   : > { %p2437_p11 = pneg %p2436_p10 }
  0x54   : > { %p2442_p5 = pnand %p2441_p6, %p2437_p11 }
  0x56   : > { %2445 = shalt.err (!%p2442_p5)
}
  0x57   : > { %1976 = dma.hbm_to_vmem [thread:$0]  (!%p2809_p8), %s573_s27, 64, %s575_s5, %s563_s15  }
  0x58   : > { %583 = sbr.rel (%p2678_p3) target bundleno = 4138 (0x102a), region = 80  ;;  %s2826_s29 = sand.u32 (!%p2678_p3), 1, %s2543_s19  }
  0x59   : > { %s1719_s23 = sshll.u32 (!%p2678_p3), %s2826_s29, 2  ;;  %s586_s1 = scalar_lea.sflag (!%p2678_p3), [#allocation3], %s2826_s29 }
  0x5a   : > { %s589_s22 = scalar_lea.vmem (!%p2678_p3), [#allocation2], %s1719_s23 }
  0x5d   : > { %2506 = dma.done.wait (%p2791_p12), %s586_s1, 64  }
  0x5e   : > { %2508 = vsyncadd (%p2791_p12), %s586_s1, 4294967232 }
  0x5f   : > { %2510 = dma.done.wait (%p58_p1), [#allocation6], 144  }
  0x60   : > { %2512 = vsyncadd (%p58_p1), [#allocation6], 4294967152 }
  0x61   : > { %2514 = dma.done.wait (%p58_p1), [#allocation9], 1088  }
  0x62   : > { %2516 = vsyncadd (%p58_p1), [#allocation9], 4294966208 }
  0x63   : > { %2518 = dma.done.wait (%p58_p1), [#allocation12], 1088  }
  0x64   : > { %2520 = vsyncadd (%p58_p1), [#allocation12], 4294966208 }
  0x65   : > { %2522 = dma.done.wait (%p58_p1), [#allocation15], 1088  }
  0x66   : > { %2524 = vsyncadd (%p58_p1), [#allocation15], 4294966208 }
  0x67   : > { %2526 = dma.done.wait (%p58_p1), [#allocation18], 128  }
  0x68   : > { %2528 = vsyncadd (%p58_p1), [#allocation18], 4294967168 }
  0x69   : > { %2530 = dma.done.wait (%p58_p1), [#allocation21], 256  }
  0x6a   : > { %2532 = vsyncadd (%p58_p1), [#allocation21], 4294967040  ;;  %v1864_v0 = vld [vmem:[#allocation5] sm:$0xff]  ;;  %vm706_vm0 = vcmask 130048   ;;  %v1866_v1 = vld [vmem:[#allocation8 + $0x8] sm:$0xff]  ;;  %vm758_vm1 = vcmask 261120  }
  0x6b   : > { %v693_v2 = vld [vmem:[%s589_s22] sm:$0xf]  ;;  %717 = vmatpush.bf16.msra.mxu0 %v1864_v0  ;;  %768 = vmatpush.bf16.msra.mxu1 %v1866_v1  ;;  %v1865_v3 = vld [vmem:[#allocation8] sm:$0xff]  ;;  %v2053_v4 = vld [vmem:[#allocation7] ss:$0 sm:$0xff]  ;;  %v2568_v15 = vmov 32.0  }
  0x6c   : > { %v2054_v9 = vld [vmem:[#allocation10] ss:$0 sm:$0xff]  ;;  %2083 = vrcp.f32 %v2568_v15  ;;  %v1868_v27 = vld [vmem:[#allocation13 + $0x8] sm:$0xff]  ;;  %v1867_v28 = vld [vmem:[#allocation13] sm:$0xff]  ;;  %s3014_s26 = sld [smem:[#allocation36_spill]]  ;;  %s1861_s10 = sshll.u32 %s2673_s25, 3 }
  0x6d   : > { %838 = vmatpush.bf16.msra.mxu2 %v1868_v27  ;;  %v2056_v41 = vld [vmem:[#allocation11] ss:$0 sm:$0xff]  ;;  %v1870_v45 = vld [vmem:[#allocation16 + $0x8] sm:$0xff]  ;;  %v1869_v46 = vld [vmem:[#allocation16] sm:$0xff]  ;;  %s3015_s5 = sld [smem:[#allocation38_spill]]  ;;  %s1731_s15 = sshll.u32 %s2826_s29, 3 }
  0x6e   : > { %1736 = vmatmul.msk.bf16.vlgmr.msra.gmra.mxu0 %vm706_vm0, %v693_v2  ;;  %871 = vmatpush.bf16.msra.mxu3 %v1870_v45  ;;  %v2057_v47 = vld [vmem:[#allocation14] ss:$0 sm:$0xff]  ;;  %v1872_v0 = vld [vmem:[#allocation8 + $0x18] sm:$0xff]  ;;  %v1871_v1 = vld [vmem:[#allocation8 + $0x10] sm:$0xff]  ;;  %s3016_s16 = sld [smem:[#allocation40_spill]]  ;;  %s691_s6 = scalar_lea.vmem [#allocation22], %s1731_s15 }
  0x6f   : > { %769 = vmatpush.bf16.msra.mxu1 %v1865_v3  ;;  %963 = vmatpush.bf16.msrb.mxu0 %v1872_v0  ;;  %s3017_s4 = sld [smem:[#allocation39_spill]]  ;;  %s1524_s17 = sshll.u32 %s691_s6, 4  ;;  %s1525_s17 = int_to_ptr.vmem [resolvable:$true] %s1524_s17 }
  0x70   : > { %s1512_s0 = scalar_lea.sflag [#allocation4], %s2826_s29 }
  0x71   : > { %839 = vmatpush.bf16.msra.mxu2 %v1867_v28 }
  0x72   : > { %v2084_v16 = vpop.eup %2083  ;;  %v2055_v38 = vld [vmem:[%s3014_s26] ss:$0 sm:$0xff]  ;;  %872 = vmatpush.bf16.msra.mxu3 %v1869_v46  ;;  %v2063_v46 = vld [vmem:[#allocation11 + $0x1] ss:$0 sm:$0xff] }
  0x73   : > { %v780_v17 = vmul.f32 32.0, %v2084_v16  ;;  %vm784_vm2 = vweird.f32 %v2084_v16  ;;  %v2058_v53 = vld [vmem:[%s3015_s5] ss:$0 sm:$0xff]  ;;  %964 = vmatpush.bf16.msrb.mxu0 %v1871_v1 }
  0x74   : > { %s1522_s23 = scalar_lea.hbm %s3016_s16, %s1861_s10  ;;  %s2481_s14 = scalar_lea.hbm %s3016_s16, 16 }
  0x75   : > { %v781_v18 = vsub.f32 1.0, %v780_v17  ;;  %s1526_s27 = sshll.u32 %s1522_s23, 4  ;;  %s1527_s27 = int_to_ptr.hbm [resolvable:$true] %s1526_s27 }
  0x76   : > { %s2475_s25 = sshra.s32 %s1527_s27, 4  ;;  %s2476_s25 = int_to_ptr.hbm [resolvable:$true] %s2475_s25 }
  0x77   : > { %v782_v19 = vmul.f32 %v2084_v16, %v781_v18  ;;  %v2061_v18 = vld [vmem:[#allocation10 + $0x1] ss:$0 sm:$0xff]  ;;  %p2482_p12 = scmp.lt.s32.totalorder %s2476_s25, %s3016_s16 }
  0x79   : > { %v783_v20 = vadd.f32 %v2084_v16, %v782_v19 }
  0x7b   : > { %v2860_v21 = vsel %vm784_vm2, %v2084_v16, %v783_v20 }
  0xeb   : > { %v719_v5 = vpop.f32.mrf.mxu0 }
  0xec   : > { %v720_v6 = vadd.f32 %v2053_v4, %v719_v5 }
  0xee   : > { %v742_v7 = vpack.c.bf16 %v720_v6, %v720_v6 }
  0xf0   : > { %1745 = vmatmul.msk.bf16.vlgmr.msra.gmra.mxu1 %vm758_vm1, %v742_v7 }
  0xf3   : > { %v721_v8 = vpop.f32.mrf.mxu0 }
 0x16d   : > { %v771_v10 = vpop.f32.mrf.mxu1 }
 0x16e   : > { %v772_v11 = vadd.f32 %v2054_v9, %v771_v10 }
 0x170   : > { %v775_v12 = vadd.f32 %v772_v11, %v720_v6  ;;  %v2059_v11 = vld [vmem:[#allocation17] ss:$0 sm:$0xff] }
 0x172   : > { %v776_v13 = vsel %vm758_vm1, %v775_v12, 0.0 }
 0x173   : > { %777 = vadd.xlane.f32.xlu0 %v776_v13 }
 0x175   : > { %v773_v14 = vpop.f32.mrf.mxu1 }
 0x176   : > { %v2060_v14 = vld [vmem:[#allocation19] ss:$0 sm:$0xff] }
 0x1e6   : > { %v778_v22 = vpop.xlane.xlu0 %777 }
 0x1e7   : > { %v786_v23 = vmul.f32 %v2860_v21, %v778_v22 }
 0x1e9   : > { %v787_v24 = vsub.f32 %v775_v12, %v786_v23 }
 0x1eb   : > { %v788_v25 = vmul.f32 %v787_v24, %v787_v24 }
 0x1ed   : > { %v789_v26 = vsel %vm758_vm1, %v788_v25, 0.0 }
 0x1ee   : > { %790 = vadd.xlane.f32.xlu0 %v789_v26 }
 0x261   : > { %v791_v29 = vpop.xlane.xlu0 %790 }
 0x262   : > { %v792_v30 = vmul.f32 %v791_v29, %v2860_v21 }
 0x264   : > { %v793_v31 = vadd.f32 1e-05, %v792_v30  ;;  %v1874_v30 = vld [vmem:[#allocation13 + $0x18] sm:$0xff] }
 0x265   : > { %1026 = vmatpush.bf16.msrb.mxu1 %v1874_v30 }
 0x266   : > { %2085 = vrsqrt.f32 %v793_v31  ;;  %vm800_vm4 = vweird.f32 %v793_v31 }
 0x26c   : > { %v2086_v32 = vpop.eup %2085 }
 0x26d   : > { %v795_v33 = vmul.f32 %v2086_v32, %v793_v31  ;;  %vm801_vm3 = vweird.f32 %v2086_v32  ;;  %v1873_v31 = vld [vmem:[#allocation13 + $0x10] sm:$0xff] }
 0x26e   : > { %vm802_vm5 = vmor %vm800_vm4, %vm801_vm3  ;;  %1027 = vmatpush.bf16.msrb.mxu1 %v1873_v31 }
 0x26f   : > { %v796_v34 = vmul.f32 %v2086_v32, %v795_v33 }
 0x271   : > { %v797_v35 = vmul.f32 0.5, %v796_v34 }
 0x273   : > { %v798_v36 = vsub.f32 1.5, %v797_v35  ;;  %v1875_v35 = vld [vmem:[#allocation16 + $0x10] sm:$0xff] }
 0x275   : > { %v799_v37 = vmul.f32 %v2086_v32, %v798_v36 }
 0x277   : > { %v803_v39 = vsel %vm802_vm5, %v2086_v32, %v799_v37  ;;  %v1876_v32 = vld [vmem:[#allocation16 + $0x18] sm:$0xff] }
 0x278   : > { %v804_v40 = vmul.f32 %v803_v39, %v787_v24  ;;  %1059 = vmatpush.bf16.msrb.mxu2 %v1876_v32 }
 0x27a   : > { %v808_v42 = vmul.f32 %v2055_v38, %v804_v40 }
 0x27c   : > { %v812_v43 = vadd.f32 %v2056_v41, %v808_v42  ;;  %1060 = vmatpush.bf16.msrb.mxu2 %v1875_v35  ;;  %v1882_v35 = vld [vmem:[#allocation16 + $0x28] sm:$0xff] }
 0x27d   : > { %1247 = vmatpush.bf16.msra.mxu1 %v1882_v35 }
 0x27e   : > { %v813_v44 = vpack.c.bf16 %v812_v43, %v812_v43 }
 0x280   : > { %1754 = vmatmul.msk.bf16.vlgmr.msra.gmra.mxu2 %vm758_vm1, %v813_v44 }
 0x303   : > { %v841_v48 = vpop.f32.mrf.mxu2 }
 0x304   : > { %v842_v49 = vadd.f32 %v2057_v47, %v841_v48 }
 0x306   : > { %v845_v50 = vmax.f32 %v842_v49, 0.0 }
 0x308   : > { %v846_v51 = vpack.c.bf16 %v845_v50, %v845_v50  ;;  %v2064_v50 = vld [vmem:[#allocation14 + $0x1] ss:$0 sm:$0xff] }
 0x30a   : > { %1763 = vmatmul.msk.bf16.vlgmr.msra.gmra.mxu3 %vm758_vm1, %v846_v51 }
 0x30b   : > { %v843_v52 = vpop.f32.mrf.mxu2 }
 0x38d   : > { %v874_v54 = vpop.f32.mrf.mxu3 }
 0x38e   : > { %v875_v55 = vadd.f32 %v2058_v53, %v874_v54 }
 0x390   : > { %v878_v56 = vadd.f32 %v875_v55, %v812_v43  ;;  %v2062_v43 = vld [vmem:[%s3014_s26 + $0x1] ss:$0 sm:$0xff] }
 0x392   : > { %v879_v57 = vsel %vm758_vm1, %v878_v56, 0.0 }
 0x393   : > { %880 = vadd.xlane.f32.xlu1 %v879_v57 }
 0x395   : > { %v876_v58 = vpop.f32.mrf.mxu3 }
 0x406   : > { %v881_v59 = vpop.xlane.xlu1 %880 }
 0x407   : > { %v882_v60 = vmul.f32 %v881_v59, %v2860_v21 }
 0x409   : > { %v883_v61 = vsub.f32 %v878_v56, %v882_v60  ;;  %v2065_v56 = vld [vmem:[%s3015_s5 + $0x1] ss:$0 sm:$0xff] }
 0x40b   : > { %v884_v62 = vmul.f32 %v883_v61, %v883_v61 }
 0x40d   : > { %v885_v63 = vsel %vm758_vm1, %v884_v62, 0.0 }
 0x40e   : > { %886 = vadd.xlane.f32.xlu1 %v885_v63 }
 0x481   : > { %v887_v2 = vpop.xlane.xlu1 %886 }
 0x482   : > { %v888_v3 = vmul.f32 %v887_v2, %v2860_v21 }
 0x484   : > { %v889_v4 = vadd.f32 1e-05, %v888_v3  ;;  %v1878_v3 = vld [vmem:[#allocation8 + $0x28] sm:$0xff] }
 0x485   : > { %1151 = vmatpush.bf16.msrb.mxu3 %v1878_v3 }
 0x486   : > { %2087 = vrsqrt.f32 %v889_v4  ;;  %vm896_vm7 = vweird.f32 %v889_v4 }
 0x48c   : > { %v2088_v5 = vpop.eup %2087 }
 0x48d   : > { %v891_v6 = vmul.f32 %v2088_v5, %v889_v4  ;;  %vm897_vm6 = vweird.f32 %v2088_v5  ;;  %v1877_v4 = vld [vmem:[#allocation8 + $0x20] sm:$0xff] }
 0x48e   : > { %vm898_vm8 = vmor %vm896_vm7, %vm897_vm6  ;;  %1152 = vmatpush.bf16.msrb.mxu3 %v1877_v4 }
 0x48f   : > { %v892_v7 = vmul.f32 %v2088_v5, %v891_v6 }
 0x491   : > { %v893_v8 = vmul.f32 0.5, %v892_v7 }
 0x493   : > { %v894_v9 = vsub.f32 1.5, %v893_v8 }
 0x495   : > { %v895_v10 = vmul.f32 %v2088_v5, %v894_v9 }
 0x497   : > { %v899_v12 = vsel %vm898_vm8, %v2088_v5, %v895_v10 }
 0x498   : > { %v900_v13 = vmul.f32 %v899_v12, %v883_v61 }
 0x49a   : > { %v904_v15 = vmul.f32 %v2059_v11, %v900_v13 }
 0x49c   : > { %v908_v16 = vadd.f32 %v2060_v14, %v904_v15  ;;  %v2066_v14 = vld [vmem:[#allocation17 + $0x1] ss:$0 sm:$0xff] }
 0x49e   : > { %v938_v17 = vpack.c.bf16 %v908_v16, %v908_v16 }
 0x4a0   : > { %1774 = vmatmul.msk.bf16.vlgmr.msrb.gmra.mxu0 %vm758_vm1, %v938_v17  ;;  %v2067_v17 = vld [vmem:[#allocation19 + $0x1] ss:$0 sm:$0xff] }
 0x51d   : > { %v966_v19 = vpop.f32.mrf.mxu0 }
 0x51e   : > { %v967_v20 = vadd.f32 %v2061_v18, %v966_v19 }
 0x520   : > { %v970_v22 = vadd.f32 %v967_v20, %v908_v16 }
 0x522   : > { %v971_v23 = vsel %vm758_vm1, %v970_v22, 0.0 }
 0x523   : > { %972 = vadd.xlane.f32.xlu2 %v971_v23 }
 0x525   : > { %v968_v24 = vpop.f32.mrf.mxu0 }
 0x596   : > { %v973_v25 = vpop.xlane.xlu2 %972 }
 0x597   : > { %v974_v26 = vmul.f32 %v973_v25, %v2860_v21 }
 0x599   : > { %v975_v27 = vsub.f32 %v970_v22, %v974_v26  ;;  %v2068_v22 = vld [vmem:[#allocation10 + $0x2] ss:$0 sm:$0xff] }
 0x59b   : > { %v976_v28 = vmul.f32 %v975_v27, %v975_v27 }
 0x59d   : > { %v977_v29 = vsel %vm758_vm1, %v976_v28, 0.0 }
 0x59e   : > { %978 = vadd.xlane.f32.xlu2 %v977_v29 }
 0x611   : > { %v979_v33 = vpop.xlane.xlu2 %978 }
 0x612   : > { %v980_v34 = vmul.f32 %v979_v33, %v2860_v21  ;;  %v1880_v33 = vld [vmem:[#allocation13 + $0x28] sm:$0xff] }
 0x613   : > { %1214 = vmatpush.bf16.msra.mxu0 %v1880_v33 }
 0x614   : > { %v981_v36 = vadd.f32 1e-05, %v980_v34  ;;  %v1879_v34 = vld [vmem:[#allocation13 + $0x20] sm:$0xff] }
 0x616   : > { %2089 = vrsqrt.f32 %v981_v36  ;;  %vm988_vm10 = vweird.f32 %v981_v36 }
 0x617   : > { %1215 = vmatpush.bf16.msra.mxu0 %v1879_v34 }
 0x61c   : > { %v2090_v37 = vpop.eup %2089 }
 0x61d   : > { %v983_v38 = vmul.f32 %v2090_v37, %v981_v36  ;;  %vm989_vm9 = vweird.f32 %v2090_v37 }
 0x61e   : > { %vm990_vm11 = vmor %vm988_vm10, %vm989_vm9 }
 0x61f   : > { %v984_v39 = vmul.f32 %v2090_v37, %v983_v38  ;;  %v1881_v38 = vld [vmem:[#allocation16 + $0x20] sm:$0xff] }
 0x620   : > { %1248 = vmatpush.bf16.msra.mxu1 %v1881_v38  ;;  %v1888_v38 = vld [vmem:[#allocation16 + $0x38] sm:$0xff] }
 0x621   : > { %v985_v40 = vmul.f32 0.5, %v984_v39  ;;  %1435 = vmatpush.bf16.msrb.mxu0 %v1888_v38 }
 0x623   : > { %v986_v41 = vsub.f32 1.5, %v985_v40 }
 0x625   : > { %v987_v42 = vmul.f32 %v2090_v37, %v986_v41 }
 0x627   : > { %v991_v44 = vsel %vm990_vm11, %v2090_v37, %v987_v42 }
 0x628   : > { %v992_v45 = vmul.f32 %v991_v44, %v975_v27 }
 0x62a   : > { %v996_v47 = vmul.f32 %v2062_v43, %v992_v45 }
 0x62c   : > { %v1000_v48 = vadd.f32 %v2063_v46, %v996_v47  ;;  %v2069_v46 = vld [vmem:[%s3014_s26 + $0x2] ss:$0 sm:$0xff] }
 0x62e   : > { %v1001_v49 = vpack.c.bf16 %v1000_v48, %v1000_v48 }
 0x630   : > { %1783 = vmatmul.msk.bf16.vlgmr.msrb.gmra.mxu1 %vm758_vm1, %v1001_v49 }
 0x6ad   : > { %v1029_v51 = vpop.f32.mrf.mxu1 }
 0x6ae   : > { %v1030_v52 = vadd.f32 %v2064_v50, %v1029_v51 }
 0x6b0   : > { %v1033_v53 = vmax.f32 %v1030_v52, 0.0 }
 0x6b2   : > { %v1034_v54 = vpack.c.bf16 %v1033_v53, %v1033_v53  ;;  %v2071_v53 = vld [vmem:[#allocation14 + $0x2] ss:$0 sm:$0xff] }
 0x6b4   : > { %1792 = vmatmul.msk.bf16.vlgmr.msrb.gmra.mxu2 %vm758_vm1, %v1034_v54 }
 0x6b5   : > { %v1031_v55 = vpop.f32.mrf.mxu1 }
 0x737   : > { %v1062_v57 = vpop.f32.mrf.mxu2 }
 0x738   : > { %v1063_v58 = vadd.f32 %v2065_v56, %v1062_v57 }
 0x73a   : > { %v1066_v59 = vadd.f32 %v1063_v58, %v1000_v48  ;;  %v2070_v48 = vld [vmem:[#allocation11 + $0x2] ss:$0 sm:$0xff] }
 0x73c   : > { %v1067_v60 = vsel %vm758_vm1, %v1066_v59, 0.0 }
 0x73d   : > { %1068 = vadd.xlane.f32.xlu0 %v1067_v60 }
 0x73f   : > { %v1064_v61 = vpop.f32.mrf.mxu2 }
 0x7b0   : > { %v1069_v62 = vpop.xlane.xlu0 %1068 }
 0x7b1   : > { %v1070_v63 = vmul.f32 %v1069_v62, %v2860_v21 }
 0x7b3   : > { %v1071_v0 = vsub.f32 %v1066_v59, %v1070_v63  ;;  %v2072_v59 = vld [vmem:[%s3015_s5 + $0x2] ss:$0 sm:$0xff] }
 0x7b5   : > { %v1072_v1 = vmul.f32 %v1071_v0, %v1071_v0 }
 0x7b7   : > { %v1073_v2 = vsel %vm758_vm1, %v1072_v1, 0.0 }
 0x7b8   : > { %1074 = vadd.xlane.f32.xlu1 %v1073_v2 }
 0x82b   : > { %v1075_v5 = vpop.xlane.xlu1 %1074 }
 0x82c   : > { %v1076_v6 = vmul.f32 %v1075_v5, %v2860_v21 }
 0x82e   : > { %v1077_v7 = vadd.f32 1e-05, %v1076_v6  ;;  %v1884_v6 = vld [vmem:[#allocation8 + $0x38] sm:$0xff] }
 0x82f   : > { %1339 = vmatpush.bf16.msra.mxu2 %v1884_v6 }
 0x830   : > { %2091 = vrsqrt.f32 %v1077_v7  ;;  %vm1084_vm13 = vweird.f32 %v1077_v7 }
 0x836   : > { %v2092_v8 = vpop.eup %2091 }
 0x837   : > { %v1079_v9 = vmul.f32 %v2092_v8, %v1077_v7  ;;  %vm1085_vm12 = vweird.f32 %v2092_v8  ;;  %v1883_v7 = vld [vmem:[#allocation8 + $0x30] sm:$0xff] }
 0x838   : > { %vm1086_vm14 = vmor %vm1084_vm13, %vm1085_vm12  ;;  %1340 = vmatpush.bf16.msra.mxu2 %v1883_v7 }
 0x839   : > { %v1080_v10 = vmul.f32 %v2092_v8, %v1079_v9 }
 0x83b   : > { %v1081_v11 = vmul.f32 0.5, %v1080_v10 }
 0x83d   : > { %v1082_v12 = vsub.f32 1.5, %v1081_v11 }
 0x83f   : > { %v1083_v13 = vmul.f32 %v2092_v8, %v1082_v12 }
 0x841   : > { %v1087_v15 = vsel %vm1086_vm14, %v2092_v8, %v1083_v13 }
 0x842   : > { %v1088_v16 = vmul.f32 %v1087_v15, %v1071_v0 }
 0x844   : > { %v1092_v18 = vmul.f32 %v2066_v14, %v1088_v16 }
 0x846   : > { %v1096_v19 = vadd.f32 %v2067_v17, %v1092_v18  ;;  %v2073_v17 = vld [vmem:[#allocation17 + $0x2] ss:$0 sm:$0xff] }
 0x848   : > { %v1126_v20 = vpack.c.bf16 %v1096_v19, %v1096_v19 }
 0x84a   : > { %1803 = vmatmul.msk.bf16.vlgmr.msrb.gmra.mxu3 %vm758_vm1, %v1126_v20 }
 0x8cd   : > { %v1154_v23 = vpop.f32.mrf.mxu3 }
 0x8ce   : > { %v1155_v24 = vadd.f32 %v2068_v22, %v1154_v23 }
 0x8d0   : > { %v1158_v25 = vadd.f32 %v1155_v24, %v1096_v19  ;;  %v2074_v19 = vld [vmem:[#allocation19 + $0x2] ss:$0 sm:$0xff] }
 0x8d2   : > { %v1159_v26 = vsel %vm758_vm1, %v1158_v25, 0.0 }
 0x8d3   : > { %1160 = vadd.xlane.f32.xlu2 %v1159_v26 }
 0x8d5   : > { %v1156_v27 = vpop.f32.mrf.mxu3 }
 0x946   : > { %v1161_v28 = vpop.xlane.xlu2 %1160 }
 0x947   : > { %v1162_v29 = vmul.f32 %v1161_v28, %v2860_v21 }
 0x949   : > { %v1163_v30 = vsub.f32 %v1158_v25, %v1162_v29  ;;  %v2075_v25 = vld [vmem:[#allocation10 + $0x3] ss:$0 sm:$0xff] }
 0x94b   : > { %v1164_v31 = vmul.f32 %v1163_v30, %v1163_v30 }
 0x94d   : > { %v1165_v32 = vsel %vm758_vm1, %v1164_v31, 0.0 }
 0x94e   : > { %1166 = vadd.xlane.f32.xlu0 %v1165_v32 }
 0x9c1   : > { %v1167_v36 = vpop.xlane.xlu0 %1166 }
 0x9c2   : > { %v1168_v37 = vmul.f32 %v1167_v36, %v2860_v21  ;;  %v1886_v36 = vld [vmem:[#allocation13 + $0x38] sm:$0xff] }
 0x9c3   : > { %1402 = vmatpush.bf16.msra.mxu3 %v1886_v36 }
 0x9c4   : > { %v1169_v39 = vadd.f32 1e-05, %v1168_v37  ;;  %v1885_v37 = vld [vmem:[#allocation13 + $0x30] sm:$0xff] }
 0x9c6   : > { %2093 = vrsqrt.f32 %v1169_v39  ;;  %vm1176_vm0 = vweird.f32 %v1169_v39 }
 0x9c7   : > { %1403 = vmatpush.bf16.msra.mxu3 %v1885_v37 }
 0x9cc   : > { %v2094_v40 = vpop.eup %2093 }
 0x9cd   : > { %v1171_v41 = vmul.f32 %v2094_v40, %v1169_v39  ;;  %vm1177_vm15 = vweird.f32 %v2094_v40 }
 0x9ce   : > { %vm1178_vm2 = vmor %vm1176_vm0, %vm1177_vm15 }
 0x9cf   : > { %v1172_v42 = vmul.f32 %v2094_v40, %v1171_v41  ;;  %v1887_v41 = vld [vmem:[#allocation16 + $0x30] sm:$0xff] }
 0x9d0   : > { %1436 = vmatpush.bf16.msrb.mxu0 %v1887_v41 }
 0x9d1   : > { %v1173_v43 = vmul.f32 0.5, %v1172_v42 }
 0x9d3   : > { %v1174_v44 = vsub.f32 1.5, %v1173_v43 }
 0x9d5   : > { %v1175_v45 = vmul.f32 %v2094_v40, %v1174_v44 }
 0x9d7   : > { %v1179_v47 = vsel %vm1178_vm2, %v2094_v40, %v1175_v45 }
 0x9d8   : > { %v1180_v49 = vmul.f32 %v1179_v47, %v1163_v30 }
 0x9da   : > { %v1184_v50 = vmul.f32 %v2069_v46, %v1180_v49  ;;  %v2076_v49 = vld [vmem:[%s3014_s26 + $0x3] ss:$0 sm:$0xff] }
 0x9dc   : > { %v1188_v51 = vadd.f32 %v2070_v48, %v1184_v50 }
 0x9de   : > { %v1189_v52 = vpack.c.bf16 %v1188_v51, %v1188_v51 }
 0x9e0   : > { %1812 = vmatmul.msk.bf16.vlgmr.msra.gmra.mxu0 %vm758_vm1, %v1189_v52 }
 0xa5d   : > { %v1217_v54 = vpop.f32.mrf.mxu0 }
 0xa5e   : > { %v1218_v55 = vadd.f32 %v2071_v53, %v1217_v54 }
 0xa60   : > { %v1221_v56 = vmax.f32 %v1218_v55, 0.0 }
 0xa62   : > { %v1222_v57 = vpack.c.bf16 %v1221_v56, %v1221_v56  ;;  %v2078_v56 = vld [vmem:[#allocation14 + $0x3] ss:$0 sm:$0xff] }
 0xa64   : > { %1821 = vmatmul.msk.bf16.vlgmr.msra.gmra.mxu1 %vm758_vm1, %v1222_v57 }
 0xa65   : > { %v1219_v58 = vpop.f32.mrf.mxu0 }
 0xae1   : > { %v1250_v60 = vpop.f32.mrf.mxu1 }
 0xae2   : > { %v1251_v61 = vadd.f32 %v2072_v59, %v1250_v60 }
 0xae4   : > { %v1254_v62 = vadd.f32 %v1251_v61, %v1188_v51  ;;  %v2077_v51 = vld [vmem:[#allocation11 + $0x3] ss:$0 sm:$0xff] }
 0xae6   : > { %v1255_v63 = vsel %vm758_vm1, %v1254_v62, 0.0 }
 0xae7   : > { %1256 = vadd.xlane.f32.xlu1 %v1255_v63 }
 0xae9   : > { %v1252_v0 = vpop.f32.mrf.mxu1 }
 0xb5a   : > { %v1257_v1 = vpop.xlane.xlu1 %1256 }
 0xb5b   : > { %v1258_v2 = vmul.f32 %v1257_v1, %v2860_v21 }
 0xb5d   : > { %v1259_v3 = vsub.f32 %v1254_v62, %v1258_v2  ;;  %v2079_v62 = vld [vmem:[%s3015_s5 + $0x3] ss:$0 sm:$0xff]  ;;  %s2477_s5 = scalar_lea.hbm %s2476_s25, 8 }
 0xb5e   : > { %p2478_p1 = scmp.ne.s32.totalorder %s2476_s25, %s2477_s5  ;;  %p2483_p8 = scmp.lt.s32.totalorder %s2481_s14, %s2477_s5 }
 0xb5f   : > { %v1260_v4 = vmul.f32 %v1259_v3, %v1259_v3 }
 0xb60   : > { %p2479_p3 = pnand %p2478_p1, %p2795_p13  ;;  %p2484_p7 = por %p2483_p8, %p2482_p12 }
 0xb61   : > { %v1261_v5 = vsel %vm758_vm1, %v1260_v4, 0.0 }
 0xb62   : > { %1262 = vadd.xlane.f32.xlu2 %v1261_v5  ;;  %p2480_p5 = pneg %p2479_p3 }
 0xb64   : > { %p2485_p9 = pnand %p2484_p7, %p2480_p5 }
 0xbd5   : > { %v1263_v8 = vpop.xlane.xlu2 %1262 }
 0xbd6   : > { %v1264_v9 = vmul.f32 %v1263_v8, %v2860_v21 }
 0xbd8   : > { %v1265_v10 = vadd.f32 1e-05, %v1264_v9  ;;  %v1890_v9 = vld [vmem:[#allocation20 + $0x8] sm:$0xff] }
 0xbd9   : > { %1503 = vmatpush.bf16.msrb.mxu1 %v1890_v9 }
 0xbda   : > { %2095 = vrsqrt.f32 %v1265_v10  ;;  %vm1272_vm4 = vweird.f32 %v1265_v10 }
 0xbe0   : > { %v2096_v11 = vpop.eup %2095 }
 0xbe1   : > { %v1267_v12 = vmul.f32 %v2096_v11, %v1265_v10  ;;  %vm1273_vm3 = vweird.f32 %v2096_v11  ;;  %v1889_v10 = vld [vmem:[#allocation20] sm:$0xff] }
 0xbe2   : > { %vm1274_vm5 = vmor %vm1272_vm4, %vm1273_vm3  ;;  %1504 = vmatpush.bf16.msrb.mxu1 %v1889_v10 }
 0xbe3   : > { %v1268_v13 = vmul.f32 %v2096_v11, %v1267_v12 }
 0xbe5   : > { %v1269_v14 = vmul.f32 0.5, %v1268_v13 }
 0xbe7   : > { %v1270_v15 = vsub.f32 1.5, %v1269_v14 }
 0xbe9   : > { %v1271_v16 = vmul.f32 %v2096_v11, %v1270_v15 }
 0xbeb   : > { %v1275_v18 = vsel %vm1274_vm5, %v2096_v11, %v1271_v16 }
 0xbec   : > { %v1276_v20 = vmul.f32 %v1275_v18, %v1259_v3 }
 0xbee   : > { %v1280_v22 = vmul.f32 %v2073_v17, %v1276_v20  ;;  %v2080_v20 = vld [vmem:[#allocation17 + $0x3] ss:$0 sm:$0xff] }
 0xbf0   : > { %v1284_v23 = vadd.f32 %v2074_v19, %v1280_v22 }
 0xbf2   : > { %v1314_v24 = vpack.c.bf16 %v1284_v23, %v1284_v23 }
 0xbf4   : > { %1832 = vmatmul.msk.bf16.vlgmr.msra.gmra.mxu2 %vm758_vm1, %v1314_v24  ;;  %v2081_v24 = vld [vmem:[#allocation19 + $0x3] ss:$0 sm:$0xff] }
 0xc77   : > { %v1342_v26 = vpop.f32.mrf.mxu2 }
 0xc78   : > { %v1343_v27 = vadd.f32 %v2075_v25, %v1342_v26 }
 0xc7a   : > { %v1346_v28 = vadd.f32 %v1343_v27, %v1284_v23  ;;  %v2082_v27 = vld [vmem:[%s3017_s4] ss:$0 sm:$0xff] }
 0xc7c   : > { %v1347_v29 = vsel %vm758_vm1, %v1346_v28, 0.0 }
 0xc7d   : > { %1348 = vadd.xlane.f32.xlu0 %v1347_v29 }
 0xc7f   : > { %v1344_v30 = vpop.f32.mrf.mxu2 }
 0xcf0   : > { %v1349_v31 = vpop.xlane.xlu0 %1348 }
 0xcf1   : > { %v1350_v32 = vmul.f32 %v1349_v31, %v2860_v21 }
 0xcf3   : > { %v1351_v33 = vsub.f32 %v1346_v28, %v1350_v32 }
 0xcf5   : > { %v1352_v34 = vmul.f32 %v1351_v33, %v1351_v33 }
 0xcf7   : > { %v1353_v35 = vsel %vm758_vm1, %v1352_v34, 0.0 }
 0xcf8   : > { %1354 = vadd.xlane.f32.xlu1 %v1353_v35 }
 0xd6b   : > { %v1355_v39 = vpop.xlane.xlu1 %1354 }
 0xd6c   : > { %v1356_v40 = vmul.f32 %v1355_v39, %v2860_v21 }
 0xd6e   : > { %v1357_v42 = vadd.f32 1e-05, %v1356_v40 }
 0xd70   : > { %2097 = vrsqrt.f32 %v1357_v42  ;;  %vm1364_vm7 = vweird.f32 %v1357_v42 }
 0xd76   : > { %v2098_v43 = vpop.eup %2097 }
 0xd77   : > { %v1359_v44 = vmul.f32 %v2098_v43, %v1357_v42  ;;  %vm1365_vm6 = vweird.f32 %v2098_v43 }
 0xd78   : > { %vm1366_vm8 = vmor %vm1364_vm7, %vm1365_vm6 }
 0xd79   : > { %v1360_v45 = vmul.f32 %v2098_v43, %v1359_v44 }
 0xd7b   : > { %v1361_v46 = vmul.f32 0.5, %v1360_v45 }
 0xd7d   : > { %v1362_v47 = vsub.f32 1.5, %v1361_v46 }
 0xd7f   : > { %v1363_v48 = vmul.f32 %v2098_v43, %v1362_v47 }
 0xd81   : > { %v1367_v50 = vsel %vm1366_vm8, %v2098_v43, %v1363_v48 }
 0xd82   : > { %v1368_v52 = vmul.f32 %v1367_v50, %v1351_v33 }
 0xd84   : > { %v1372_v53 = vmul.f32 %v2076_v49, %v1368_v52 }
 0xd86   : > { %v1376_v54 = vadd.f32 %v2077_v51, %v1372_v53 }
 0xd88   : > { %v1377_v55 = vpack.c.bf16 %v1376_v54, %v1376_v54 }
 0xd8a   : > { %1841 = vmatmul.msk.bf16.vlgmr.msra.gmra.mxu3 %vm758_vm1, %v1377_v55 }
 0xe0d   : > { %v1405_v57 = vpop.f32.mrf.mxu3 }
 0xe0e   : > { %v1406_v58 = vadd.f32 %v2078_v56, %v1405_v57 }
 0xe10   : > { %v1409_v59 = vmax.f32 %v1406_v58, 0.0 }
 0xe12   : > { %v1410_v60 = vpack.c.bf16 %v1409_v59, %v1409_v59 }
 0xe14   : > { %1850 = vmatmul.msk.bf16.vlgmr.msrb.gmra.mxu0 %vm758_vm1, %v1410_v60 }
 0xe15   : > { %v1407_v61 = vpop.f32.mrf.mxu3 }
 0xe91   : > { %v1438_v63 = vpop.f32.mrf.mxu0 }
 0xe92   : > { %v1439_v0 = vadd.f32 %v2079_v62, %v1438_v63 }
 0xe94   : > { %v1442_v1 = vadd.f32 %v1439_v0, %v1376_v54 }
 0xe96   : > { %v1443_v2 = vsel %vm758_vm1, %v1442_v1, 0.0 }
 0xe97   : > { %1444 = vadd.xlane.f32.xlu2 %v1443_v2 }
 0xe99   : > { %v1440_v3 = vpop.f32.mrf.mxu0 }
 0xf0a   : > { %v1445_v4 = vpop.xlane.xlu2 %1444 }
 0xf0b   : > { %v1446_v5 = vmul.f32 %v1445_v4, %v2860_v21 }
 0xf0d   : > { %v1447_v6 = vsub.f32 %v1442_v1, %v1446_v5 }
 0xf0f   : > { %v1448_v7 = vmul.f32 %v1447_v6, %v1447_v6 }
 0xf11   : > { %v1449_v8 = vsel %vm758_vm1, %v1448_v7, 0.0 }
 0xf12   : > { %1450 = vadd.xlane.f32.xlu0 %v1449_v8 }
 0xf85   : > { %v1451_v11 = vpop.xlane.xlu0 %1450 }
 0xf86   : > { %v1452_v12 = vmul.f32 %v1451_v11, %v2860_v21 }
 0xf88   : > { %v1453_v13 = vadd.f32 1e-05, %v1452_v12 }
 0xf8a   : > { %2099 = vrsqrt.f32 %v1453_v13  ;;  %vm1460_vm10 = vweird.f32 %v1453_v13 }
 0xf90   : > { %v2100_v14 = vpop.eup %2099 }
 0xf91   : > { %v1455_v15 = vmul.f32 %v2100_v14, %v1453_v13  ;;  %vm1461_vm9 = vweird.f32 %v2100_v14 }
 0xf92   : > { %vm1462_vm11 = vmor %vm1460_vm10, %vm1461_vm9 }
 0xf93   : > { %v1456_v16 = vmul.f32 %v2100_v14, %v1455_v15 }
 0xf95   : > { %v1457_v17 = vmul.f32 0.5, %v1456_v16 }
 0xf97   : > { %v1458_v18 = vsub.f32 1.5, %v1457_v17 }
 0xf99   : > { %v1459_v19 = vmul.f32 %v2100_v14, %v1458_v18 }
 0xf9b   : > { %v1463_v22 = vsel %vm1462_vm11, %v2100_v14, %v1459_v19 }
 0xf9c   : > { %v1464_v23 = vmul.f32 %v1463_v22, %v1447_v6 }
 0xf9e   : > { %v1468_v25 = vmul.f32 %v2080_v20, %v1464_v23 }
 0xfa0   : > { %v1472_v21 = vadd.f32 %v2081_v24, %v1468_v25 }
 0xfa2   : > { %v1473_v26 = vpack.c.bf16 %v1472_v21, %v1472_v21 }
 0xfa4   : > { %1859 = vmatmul.msk.bf16.vlgmr.msrb.gmra.mxu1 %vm758_vm1, %v1473_v26 }
0x1021   : > { %v1506_v28 = vpop.f32.mrf.mxu1 }
0x1022   : > { %v1507_v29 = vadd.f32 %v2082_v27, %v1506_v28 }
0x1024   : > { %1510 = vst [vmem:[%s691_s6] sm:$0xff] %v1507_v29 }
0x1025   : > { %2488 = shalt.err (!%p2485_p9)
}
0x1026   : > { %1937 = dma.vmem_to_hbm [thread:$0]  (%p2795_p13), %s1525_s17, 128, %s1527_s27, %s1512_s0  }
0x1029   : > { %v1508_v30 = vpop.f32.mrf.mxu1 }
0x102a PF: > { %s1538_s29 = sand.u32 1, %s2539_s18   ;;  %p3018_p10 = scmp.ge.s32.totalorder %s2551_s21, 2 }
0x102b   : > { %s1539_s23 = scalar_lea.sflag [#allocation4], %s1538_s29 }
0x102c   : > { %p1978_p11 = pnand %p3018_p10, %p2800_p4 }
0x102e   : > { %p1979_p0 = pneg %p1978_p11 }
0x1030   : > { %2534 = dma.done.wait (%p1979_p0), %s1539_s23, 128  }
0x1031   : > { %2536 = vsyncadd (%p1979_p0), %s1539_s23, 4294967168  ;;  %p34_p2 = scmp.ge.s32.totalorder %s2775_s2, 4   ;;  %s3019_s18 = smov %s2543_s19 }
0x1032   : > { %s3020_s19 = smov %s2547_s20  ;;  %s3021_s20 = smov %s2787_s24 }
0x1033   : > { %s3022_s21 = smov %s2775_s2  ;;  %36 = sbr.rel (!%p34_p2) target bundleno = 22 (0x16), region = 199 }
0x1038   :  { %1545 = vsyncpa [#allocation3], 1 }
0x1039   :  { %1547 = vsyncpa [#allocation3 + $0x1], 1 }
0x103a   :  { %1548 = vsyncpa [#allocation6], 1 }
0x103b   :  { %1549 = vsyncpa [#allocation9], 1 }
0x103c   :  { %1550 = vsyncpa [#allocation12], 1 }
0x103d   :  { %1551 = vsyncpa [#allocation15], 1 }
0x103e   :  { %1552 = vsyncpa [#allocation18], 1 }
0x103f   :  { %1553 = vsyncpa [#allocation21], 1 }
0x1040   :  { %1554 = vsyncpa [#allocation4], 1 }
0x1041   :  { %1556 = vsyncpa [#allocation4 + $0x1], 1 }

</bundles_post_ra>
